<compile_context>
chip_gen: v7x
topology: tpu7x:2x2x1
jax: 0.10.0
libtpu: 0.0.40
codegen_flags: <defaults>
</compile_context>

<pallas_src>
import functools

import jax
import jax.numpy as jnp
from jax.experimental import pallas as pl
from jax.experimental.pallas import tpu as pltpu


def _device_kind():
    try:
        return jax.devices()[0].device_kind.lower()
    except Exception:
        return ""


_IS_V5 = "v5" in _device_kind()
# v5e: f32 elementwise epilogue (no bf16 VPU/EUP) and Kp padded to 128 (full MXU
# K depth).  v6e/v7x: bf16 epilogue halves EUP/VALU vreg traffic on the hot
# (TS, 1280) swish; Kp padded to 32 is enough for aligned DMA.
_EPI_DTYPE = jnp.float32 if _IS_V5 else jnp.bfloat16
_KP_PAD = 128 if _IS_V5 else 32


# ---------------------------------------------------------------------------
# Shared per-tile compute body.
# ---------------------------------------------------------------------------
def _stem_head_pool8(patch, stem_w, stem_b, head_w, head_b, epi_dtype):
    """stem matmul+swish -> head matmul+swish -> (8, C_head) f32 partial pool."""
    ts = patch.shape[0]
    # Stem 3x3/s2 conv as matmul over zero-padded im2col patches (bf16 MXU, f32 acc).
    y = jnp.dot(patch, stem_w, preferred_element_type=jnp.float32)
    y = y + stem_b                        # folded-BN bias
    y = y * jax.nn.sigmoid(y)             # swish; only 32 lanes wide, keep f32
    # Head 1x1 conv (bf16 MXU, f32 acc); elementwise epilogue in epi_dtype.
    z = jnp.dot(y.astype(jnp.bfloat16), head_w, preferred_element_type=jnp.float32)
    z = z.astype(epi_dtype) + head_b.astype(epi_dtype)
    z = z * jax.nn.sigmoid(z)
    # Partial global-average pool: cast to f32 first so the reshape splits on
    # clean (8,128) tile boundaries, then sum over the leading (non-layout)
    # axis -> pure VALU adds, no XLU on the per-step critical path.
    zf = z.astype(jnp.float32)
    return jnp.sum(zf.reshape(ts // 8, 8, zf.shape[-1]), axis=0)      # (8, C_head)


def _fc_sigmoid_store(pool8, fc_w, fc_b, out_ref, inv_s_total):
    """Single 8->1 pool fold, FC(1) as VPU mul + lane reduce, sigmoid, store."""
    pooled = jnp.sum(pool8, axis=0, keepdims=True) * inv_s_total      # (1, C_head)
    logit = jnp.sum(pooled * fc_w, axis=-1, keepdims=True) + fc_b     # (1, 1)
    prob = jax.nn.sigmoid(logit)
    # Lane-dense padded (8, 128) output block; wrapper slices [:, 0, 0:1].
    out_ref[...] = jnp.broadcast_to(prob, out_ref.shape).astype(out_ref.dtype)


# ---------------------------------------------------------------------------
# Kernel A: whole spatial extent per batch row in one grid step (grid=(B,)).
# No accumulator, no pl.when phases.
# ---------------------------------------------------------------------------
def _fused_single_kernel(patch_ref, stem_w_ref, stem_b_ref, head_w_ref,
                         head_b_ref, fc_w_ref, fc_b_ref, out_ref,
                         *, inv_s_total, epi_dtype):
    pool8 = _stem_head_pool8(patch_ref[...], stem_w_ref[...], stem_b_ref[...],
                             head_w_ref[...], head_b_ref[...], epi_dtype)
    _fc_sigmoid_store(pool8, fc_w_ref[...], fc_b_ref[...], out_ref, inv_s_total)


# ---------------------------------------------------------------------------
# Kernel B: tiled over spatial rows (grid=(B, S//TS)) with an (8, C_head)
# f32 VMEM accumulator; init / finalize via pl.when.
# ---------------------------------------------------------------------------
def _fused_tiled_kernel(patch_ref, stem_w_ref, stem_b_ref, head_w_ref,
                        head_b_ref, fc_w_ref, fc_b_ref, out_ref, acc_ref,
                        *, inv_s_total, epi_dtype):
    s = pl.program_id(1)

    @pl.when(s == 0)
    def _():
        acc_ref[...] = jnp.zeros_like(acc_ref)

    acc_ref[...] += _stem_head_pool8(patch_ref[...], stem_w_ref[...],
                                     stem_b_ref[...], head_w_ref[...],
                                     head_b_ref[...], epi_dtype)

    @pl.when(s == pl.num_programs(1) - 1)
    def _():
        _fc_sigmoid_store(acc_ref[...], fc_w_ref[...], fc_b_ref[...], out_ref,
                          inv_s_total)


def _pick_ts(S, max_ts=1024):
    """Largest multiple-of-8 spatial tile <= max_ts that divides S."""
    if S % 8 == 0 and S <= max_ts:
        return S                                  # single grid step per batch row
    for t in range(max_ts - max_ts % 8, 7, -8):
        if S % t == 0:
            return t
    # TODO(synk): masked ragged last tile for S with no multiple-of-8 divisor.
    raise ValueError(f"no multiple-of-8 spatial tile <= {max_ts} divides S={S}")


def fused_forward(patches, stem_w, stem_b, head_w, head_b, fc_w, fc_b,
                  *, ts=None, epi_dtype=_EPI_DTYPE):
    B, S, Kp = patches.shape
    c_stem = stem_w.shape[1]
    c_head = head_w.shape[1]
    if ts is None:
        ts = _pick_ts(S)
    assert S % ts == 0 and ts % 8 == 0
    n_s = S // ts

    out_shape = jax.ShapeDtypeStruct((B, 8, 128), jnp.float32)

    if n_s == 1:
        kernel = functools.partial(_fused_single_kernel,
                                   inv_s_total=1.0 / float(S), epi_dtype=epi_dtype)
        grid_spec = pltpu.PrefetchScalarGridSpec(
            num_scalar_prefetch=0,
            grid=(B,),
            in_specs=[
                pl.BlockSpec((None, ts, Kp), lambda b: (b, 0, 0)),
                pl.BlockSpec((Kp, c_stem), lambda b: (0, 0)),
                pl.BlockSpec((1, c_stem), lambda b: (0, 0)),
                pl.BlockSpec((c_stem, c_head), lambda b: (0, 0)),
                pl.BlockSpec((1, c_head), lambda b: (0, 0)),
                pl.BlockSpec((1, c_head), lambda b: (0, 0)),
                pl.BlockSpec((1, 1), lambda b: (0, 0)),
            ],
            out_specs=pl.BlockSpec((None, 8, 128), lambda b: (b, 0, 0)),
        )
        dim_sem = ("parallel",)
    else:
        kernel = functools.partial(_fused_tiled_kernel,
                                   inv_s_total=1.0 / float(S), epi_dtype=epi_dtype)
        grid_spec = pltpu.PrefetchScalarGridSpec(
            num_scalar_prefetch=0,
            grid=(B, n_s),
            in_specs=[
                pl.BlockSpec((None, ts, Kp), lambda b, s: (b, s, 0)),
                pl.BlockSpec((Kp, c_stem), lambda b, s: (0, 0)),
                pl.BlockSpec((1, c_stem), lambda b, s: (0, 0)),
                pl.BlockSpec((c_stem, c_head), lambda b, s: (0, 0)),
                pl.BlockSpec((1, c_head), lambda b, s: (0, 0)),
                pl.BlockSpec((1, c_head), lambda b, s: (0, 0)),
                pl.BlockSpec((1, 1), lambda b, s: (0, 0)),
            ],
            out_specs=pl.BlockSpec((None, 8, 128), lambda b, s: (b, 0, 0)),
            scratch_shapes=[pltpu.VMEM((8, c_head), jnp.float32)],
        )
        dim_sem = ("parallel", "arbitrary")

    out = pl.pallas_call(
        kernel,
        out_shape=out_shape,
        grid_spec=grid_spec,
        compiler_params=pltpu.CompilerParams(
            dimension_semantics=dim_sem,
            # == v7x scoped default; per-step working set (<= ~6 MiB at ts=896,
            # ~1 MiB for the toy) leaves large headroom on every generation.
            vmem_limit_bytes=32 * 1024 * 1024,
        ),
    )(patches, stem_w, stem_b, head_w, head_b, fc_w, fc_b)

    return out[:, 0, 0:1]                                      # (B, 1)


# ---------------------------------------------------------------------------
# Glue: im2col for the 3x3 / stride-2 / pad-1 stem conv (NHWC input), with the
# patch channel axis zero-padded to a lane/byte-aligned width.  Runs under jit
# so the transpose/pad/slices/concat/cast fuse into one materialization.
# ---------------------------------------------------------------------------
def im2col_3x3_s2(x_nhwc, kp_pad):
    B, H, W, C = x_nhwc.shape
    assert H % 2 == 0 and W % 2 == 0, "stem stride-2 path assumes even H, W"
    Ho, Wo = H // 2, W // 2
    xp = jnp.pad(x_nhwc, ((0, 0), (1, 1), (1, 1), (0, 0)))
    cols = []
    for dh in range(3):
        for dw in range(3):
            cols.append(xp[:, dh:dh + 2 * Ho:2, dw:dw + 2 * Wo:2, :])
    patches = jnp.concatenate(cols, axis=-1)                    # [B, Ho, Wo, 9*C]
    k = patches.shape[-1]
    if kp_pad > k:
        patches = jnp.pad(patches, ((0, 0), (0, 0), (0, 0), (0, kp_pad - k)))
    return patches.reshape(B, Ho * Wo, kp_pad), (Ho, Wo)


# ---------------------------------------------------------------------------
# Full forward pass of AIModel (stem -> head -> pool -> FC -> sigmoid).
# ---------------------------------------------------------------------------
@jax.jit
def ai_model_forward(x_nchw, params):
    kp_pad = params["stem_w"].shape[0]
    x_nhwc = jnp.transpose(x_nchw, (0, 2, 3, 1)).astype(jnp.float32)  # NCHW -> NHWC
    patches, _ = im2col_3x3_s2(x_nhwc, kp_pad)                  # [B, S, Kp]
    patches = patches.astype(jnp.bfloat16)                      # bf16 MXU input
    # TODO(synk): EfficientNet-B0 MBConv blocks omitted (no pretrained weights).
    return fused_forward(patches,
                         params["stem_w"], params["stem_bias"],
                         params["head_w"], params["head_bias"],
                         params["fc_w"], params["fc_b"])


def init_params(key, c_in=3, c_stem=32, c_head=1280, kp_pad=_KP_PAD):
    assert kp_pad >= 9 * c_in
    ks = jax.random.split(key, 4)
    stem_w = 0.1 * jax.random.normal(ks[0], (9 * c_in, c_stem), jnp.float32)
    stem_w = jnp.pad(stem_w, ((0, kp_pad - 9 * c_in), (0, 0)))   # zero rows for padded Kp
    head_w = 0.05 * jax.random.normal(ks[1], (c_stem, c_head), jnp.float32)
    stem_scale = jnp.ones((1, c_stem), jnp.float32)
    head_scale = jnp.ones((1, c_head), jnp.float32)
    return {
        # BatchNorm scale folded into weight columns on the host (w' = w * scale).
        # TODO(synk): with a real checkpoint, bias = beta - mean*gamma/sqrt(var+eps).
        "stem_w":    (stem_w * stem_scale).astype(jnp.bfloat16),
        "stem_bias": jnp.zeros((1, c_stem), jnp.float32),
        "head_w":    (head_w * head_scale).astype(jnp.bfloat16),
        "head_bias": jnp.zeros((1, c_head), jnp.float32),
        # FC weight kept as a (1, C) row vector: applied as VPU mul + lane reduce.
        "fc_w":      0.02 * jax.random.normal(ks[2], (1, c_head), jnp.float32),
        "fc_b":      jnp.zeros((1, 1), jnp.float32),
    }


if __name__ == "__main__":
    key = jax.random.PRNGKey(0)
    k_x, k_p = jax.random.split(key)

    B, C_in, H, W = 2, 3, 32, 32
    x = jax.random.normal(k_x, (B, C_in, H, W), jnp.float32)     # NCHW like PyTorch
    params = init_params(k_p, c_in=C_in)

    out = jax.block_until_ready(ai_model_forward(x, params))
    assert out.shape == (B, 1)
    assert bool(jnp.all((out >= 0.0) & (out <= 1.0)))
    print("KERNEL_OK")
</pallas_src>

<mosaic_0001>
module attributes {stable_mosaic.version = 11 : i64} {
  func.func @_fused_single_kernel(%arg0: i32, %arg1: memref<1x256x32xbf16, #tpu.memory_space<vmem>>, %arg2: memref<32x32xbf16, #tpu.memory_space<vmem>>, %arg3: memref<1x32xf32, #tpu.memory_space<vmem>>, %arg4: memref<32x1280xbf16, #tpu.memory_space<vmem>>, %arg5: memref<1x1280xf32, #tpu.memory_space<vmem>>, %arg6: memref<1x1280xf32, #tpu.memory_space<vmem>>, %arg7: memref<1x1xf32, #tpu.memory_space<vmem>>, %arg8: memref<1x8x128xf32, #tpu.memory_space<vmem>>) attributes {dimension_semantics = [#tpu.dimension_semantics<parallel>], iteration_bounds = array<i64: 2>, scalar_prefetch = 0 : i64, scratch_operands = 0 : i64, tpu.core_type = #tpu.core_type<tc>, window_params = [{transform_indices = @transform_0, window_bounds = array<i64: 1, 256, 32>}, {pipeline_mode = #tpu.pipeline_mode<synchronous>, transform_indices = @transform_1, window_bounds = array<i64: 32, 32>}, {pipeline_mode = #tpu.pipeline_mode<synchronous>, transform_indices = @transform_2, window_bounds = array<i64: 1, 32>}, {pipeline_mode = #tpu.pipeline_mode<synchronous>, transform_indices = @transform_3, window_bounds = array<i64: 32, 1280>}, {pipeline_mode = #tpu.pipeline_mode<synchronous>, transform_indices = @transform_4, window_bounds = array<i64: 1, 1280>}, {pipeline_mode = #tpu.pipeline_mode<synchronous>, transform_indices = @transform_5, window_bounds = array<i64: 1, 1280>}, {pipeline_mode = #tpu.pipeline_mode<synchronous>, transform_indices = @transform_6, window_bounds = array<i64: 1, 1>}, {transform_indices = @transform_7, window_bounds = array<i64: 1, 8, 128>}]} {
    %c0 = arith.constant 0 : index
    %c0_0 = arith.constant 0 : index
    %c0_1 = arith.constant 0 : index
    %0 = vector.load %arg1[%c0, %c0_0, %c0_1] : memref<1x256x32xbf16, #tpu.memory_space<vmem>>, vector<1x256x32xbf16>
    %1 = vector.shape_cast %0 : vector<1x256x32xbf16> to vector<256x32xbf16>
    %c0_2 = arith.constant 0 : index
    %c0_3 = arith.constant 0 : index
    %2 = vector.load %arg2[%c0_2, %c0_3] : memref<32x32xbf16, #tpu.memory_space<vmem>>, vector<32x32xbf16>
    %c0_4 = arith.constant 0 : index
    %c0_5 = arith.constant 0 : index
    %3 = vector.load %arg3[%c0_4, %c0_5] : memref<1x32xf32, #tpu.memory_space<vmem>>, vector<1x32xf32>
    %c0_6 = arith.constant 0 : index
    %c0_7 = arith.constant 0 : index
    %4 = vector.load %arg4[%c0_6, %c0_7] : memref<32x1280xbf16, #tpu.memory_space<vmem>>, vector<32x1280xbf16>
    %c0_8 = arith.constant 0 : index
    %c0_9 = arith.constant 0 : index
    %5 = vector.load %arg5[%c0_8, %c0_9] : memref<1x1280xf32, #tpu.memory_space<vmem>>, vector<1x1280xf32>
    %cst = arith.constant dense<0.000000e+00> : vector<256x32xf32>
    %6 = tpu.matmul %1, %2, %cst {dimension_numbers = #tpu.dot_dimension_numbers<[1], [0], [0], [1], [0, 0, 1, 1], [], []>} : vector<256x32xbf16>, vector<32x32xbf16>, vector<256x32xf32> -> vector<256x32xf32>
    %7 = vector.broadcast %3 : vector<1x32xf32> to vector<256x32xf32>
    %8 = arith.addf %6, %7 : vector<256x32xf32>
    %9 = arith.negf %8 : vector<256x32xf32>
    %10 = math.exp %9 : vector<256x32xf32>
    %cst_10 = arith.constant 1.000000e+00 : f32
    %11 = vector.broadcast %cst_10 : f32 to vector<256x32xf32>
    %12 = arith.addf %11, %10 : vector<256x32xf32>
    %13 = arith.divf %11, %12 : vector<256x32xf32>
    %14 = arith.mulf %8, %13 : vector<256x32xf32>
    %15 = arith.truncf %14 : vector<256x32xf32> to vector<256x32xbf16>
    %cst_11 = arith.constant dense<0.000000e+00> : vector<256x1280xf32>
    %16 = tpu.matmul %15, %4, %cst_11 {dimension_numbers = #tpu.dot_dimension_numbers<[1], [0], [0], [1], [0, 0, 1, 1], [], []>} : vector<256x32xbf16>, vector<32x1280xbf16>, vector<256x1280xf32> -> vector<256x1280xf32>
    %17 = arith.truncf %16 : vector<256x1280xf32> to vector<256x1280xbf16>
    %18 = arith.truncf %5 : vector<1x1280xf32> to vector<1x1280xbf16>
    %19 = vector.broadcast %18 : vector<1x1280xbf16> to vector<256x1280xbf16>
    %20 = arith.addf %17, %19 : vector<256x1280xbf16>
    %21 = arith.negf %20 : vector<256x1280xbf16>
    %22 = math.exp %21 : vector<256x1280xbf16>
    %cst_12 = arith.constant 1.000000e+00 : bf16
    %23 = vector.broadcast %cst_12 : bf16 to vector<256x1280xbf16>
    %24 = arith.addf %23, %22 : vector<256x1280xbf16>
    %25 = arith.divf %23, %24 : vector<256x1280xbf16>
    %26 = arith.mulf %20, %25 : vector<256x1280xbf16>
    %27 = arith.extf %26 : vector<256x1280xbf16> to vector<256x1280xf32>
    %28 = vector.shape_cast %27 : vector<256x1280xf32> to vector<32x8x1280xf32>
    %cst_13 = arith.constant dense<0.000000e+00> : vector<8x1280xf32>
    %29 = vector.multi_reduction <add>, %28, %cst_13 [0] : vector<32x8x1280xf32> to vector<8x1280xf32>
    %c0_14 = arith.constant 0 : index
    %c0_15 = arith.constant 0 : index
    %30 = vector.load %arg6[%c0_14, %c0_15] : memref<1x1280xf32, #tpu.memory_space<vmem>>, vector<1x1280xf32>
    %c0_16 = arith.constant 0 : index
    %c0_17 = arith.constant 0 : index
    %31 = vector.load %arg7[%c0_16, %c0_17] : memref<1x1xf32, #tpu.memory_space<vmem>>, vector<1x1xf32>
    %cst_18 = arith.constant dense<0.000000e+00> : vector<1280xf32>
    %32 = vector.multi_reduction <add>, %29, %cst_18 [0] : vector<8x1280xf32> to vector<1280xf32>
    %33 = vector.shape_cast %32 : vector<1280xf32> to vector<1x1280xf32>
    %cst_19 = arith.constant 3.906250e-03 : f32
    %34 = vector.broadcast %cst_19 : f32 to vector<1x1280xf32>
    %35 = arith.mulf %33, %34 : vector<1x1280xf32>
    %36 = arith.mulf %35, %30 : vector<1x1280xf32>
    %cst_20 = arith.constant dense<0.000000e+00> : vector<1xf32>
    %37 = vector.multi_reduction <add>, %36, %cst_20 [1] : vector<1x1280xf32> to vector<1xf32>
    %38 = vector.shape_cast %37 : vector<1xf32> to vector<1x1xf32>
    %39 = arith.addf %38, %31 : vector<1x1xf32>
    %40 = arith.negf %39 : vector<1x1xf32>
    %41 = math.exp %40 : vector<1x1xf32>
    %cst_21 = arith.constant 1.000000e+00 : f32
    %42 = vector.broadcast %cst_21 : f32 to vector<1x1xf32>
    %43 = arith.addf %42, %41 : vector<1x1xf32>
    %44 = arith.divf %42, %43 : vector<1x1xf32>
    %45 = vector.shape_cast %44 : vector<1x1xf32> to vector<1x1xf32>
    %46 = vector.broadcast %45 : vector<1x1xf32> to vector<8x128xf32>
    %c0_22 = arith.constant 0 : index
    %c0_23 = arith.constant 0 : index
    %c0_24 = arith.constant 0 : index
    %47 = vector.load %arg8[%c0_22, %c0_23, %c0_24] : memref<1x8x128xf32, #tpu.memory_space<vmem>>, vector<1x8x128xf32>
    %48 = vector.shape_cast %47 : vector<1x8x128xf32> to vector<8x128xf32>
    %49 = vector.shape_cast %46 : vector<8x128xf32> to vector<1x8x128xf32>
    tpu.vector_store %arg8[%c0_22, %c0_23, %c0_24], %49 {strides = array<i32>} : memref<1x8x128xf32, #tpu.memory_space<vmem>>, vector<1x8x128xf32>,
    return
  }
  func.func @transform_0(%arg0: i32) -> (i32, i32, i32) {
    %c0_i32 = arith.constant 0 : i32
    %c0_i32_0 = arith.constant 0 : i32
    %c0_i32_1 = arith.constant 0 : i32
    return %arg0, %c0_i32, %c0_i32_0 : i32, i32, i32
  }
  func.func @transform_1(%arg0: i32) -> (i32, i32) {
    %c0_i32 = arith.constant 0 : i32
    %c0_i32_0 = arith.constant 0 : i32
    %c0_i32_1 = arith.constant 0 : i32
    return %c0_i32, %c0_i32_0 : i32, i32
  }
  func.func @transform_2(%arg0: i32) -> (i32, i32) {
    %c0_i32 = arith.constant 0 : i32
    %c0_i32_0 = arith.constant 0 : i32
    %c0_i32_1 = arith.constant 0 : i32
    return %c0_i32, %c0_i32_0 : i32, i32
  }
  func.func @transform_3(%arg0: i32) -> (i32, i32) {
    %c0_i32 = arith.constant 0 : i32
    %c0_i32_0 = arith.constant 0 : i32
    %c0_i32_1 = arith.constant 0 : i32
    return %c0_i32, %c0_i32_0 : i32, i32
  }
  func.func @transform_4(%arg0: i32) -> (i32, i32) {
    %c0_i32 = arith.constant 0 : i32
    %c0_i32_0 = arith.constant 0 : i32
    %c0_i32_1 = arith.constant 0 : i32
    return %c0_i32, %c0_i32_0 : i32, i32
  }
  func.func @transform_5(%arg0: i32) -> (i32, i32) {
    %c0_i32 = arith.constant 0 : i32
    %c0_i32_0 = arith.constant 0 : i32
    %c0_i32_1 = arith.constant 0 : i32
    return %c0_i32, %c0_i32_0 : i32, i32
  }
  func.func @transform_6(%arg0: i32) -> (i32, i32) {
    %c0_i32 = arith.constant 0 : i32
    %c0_i32_0 = arith.constant 0 : i32
    %c0_i32_1 = arith.constant 0 : i32
    return %c0_i32, %c0_i32_0 : i32, i32
  }
  func.func @transform_7(%arg0: i32) -> (i32, i32, i32) {
    %c0_i32 = arith.constant 0 : i32
    %c0_i32_0 = arith.constant 0 : i32
    %c0_i32_1 = arith.constant 0 : i32
    return %arg0, %c0_i32, %c0_i32_0 : i32, i32, i32
  }
}

</mosaic_0001>

<bundles_post_ra>
// kernel: ai_model_forward.1
= control target key start
LH: loop header
LB: loop body
LE: loop exit
PB: predicated region body
PF: predicated region fallthrough
CT: control target
= control target key end

     0   :  { %s5867_s26 = smov 0   ;;  %s8612_s0 = inlined_call_operand.vmem [shape: bf16[2,256,32], index: 0, kind: input, shape index: {}]   ;;  %s8613_s1 = inlined_call_operand.vmem [shape: bf16[32,32], index: 1, kind: input, shape index: {}]   ;;  %s8614_s2 = inlined_call_operand.vmem [shape: f32[1,32], index: 2, kind: input, shape index: {}]   ;;  %s8615_s3 = inlined_call_operand.vmem [shape: bf16[32,1280], index: 3, kind: input, shape index: {}]   ;;  %s8616_s4 = inlined_call_operand.vmem [shape: f32[1,1280], index: 4, kind: input, shape index: {}]   ;;  %s8617_s5 = inlined_call_operand.vmem [shape: f32[1,1280], index: 5, kind: input, shape index: {}]   ;;  %s8618_s6 = inlined_call_operand.<no memory space> [shape: f32[1,1], index: 6, kind: input, shape index: {}]   ;;  %s8619_s7 = inlined_call_operand.vmem [shape: f32[2,8,128], index: 7, kind: output, shape index: {}]  }
   0x1   :  { %v12_v0 = vstv %s8618_s6 }
   0x2   :  { %13 = vst [vmem:[#allocation2] sm:$0x1] %v12_v0 }
   0x3 LB: > { %s4585_s27 = sadd.s32 4294967295, %s5821_s26   ;;  %p4589_p0 = scmp.ge.s32.totalorder %s5821_s26, 1  ;;  %s5821_s26 = sphi %s5867_s26, %s19_s26  }
   0x4   : > { %p239_p1 = scmp.lt.s32.totalorder %s5821_s26, 3 }
   0x6   : > { %p240_p2 = pnand %p4589_p0, %p239_p1 }
   0x8   : > { %243 = sbr.rel (%p240_p2) target bundleno = 1275 (0x4fb), region = 48 }
   0xf   : > { %v4993_v1 = vld [vmem:[%s8613_s1] sm:$0xff]   ;;  %p270_p3 = scmp.lt.s32.totalorder %s4585_s27, 1  ;;  %v4994_v2 = vld [vmem:[%s8613_s1 + $0x8] sm:$0xff]   ;;  %vm438_vm0 = vcmask 261120   ;;  %v5016_v21 = vld [vmem:[%s8615_s3 + $0x54] ss:$40 sps:$4 sm:$0xff]  }
  0x10   : > { %4942 = vmatprep.subr.bf16.mxu0 %v4993_v1  ;;  %v5013_v19 = vld [vmem:[%s8615_s3 + $0x4] ss:$40 sps:$4 sm:$0xff]   ;;  %v5011_v20 = vld [vmem:[%s8615_s3] ss:$40 sps:$4 sm:$0xff]   ;;  %v5014_v22 = vld [vmem:[%s8615_s3 + $0x50] ss:$40 sps:$4 sm:$0xff]  }
  0x11   : > { %s9154_s27 = smov (!%p270_p3, %s4585_s27), 1  ;;  %4943 = vmatpush3.bf16.msra.mxu0 %v4993_v1  ;;  %4978 = vmatprep.subr.bf16.mxu1 %v5013_v19  ;;  %v8624_v23 = vmov 0   ;;  %v5022_v24 = vld [vmem:[%s8615_s3 + $0xc] ss:$40 sps:$4 sm:$0xff]   ;;  %v5944_v26 = vld [vmem:[%s8614_s2] ss:$0 sm:$0xff] }
  0x12   : > { %4944 = vmatprep.subr.bf16.mxu0 %v4994_v2  ;;  %s4923_s8 = sshll.u32 %s9154_s27, 7  ;;  %4980 = vmatpush1.bf16.msra.mxu1 %v5011_v20  ;;  %v5019_v25 = vld [vmem:[%s8615_s3 + $0x14] ss:$40 sps:$4 sm:$0xff]   ;;  %vm4498_vm1 = vcmask 1040384   ;;  %s4592_s22 = sshll.u32 %s9154_s27, 3 }
  0x13   : > { %s5887_s11 = scalar_lea.vmem %s8612_s0, %s4923_s8  ;;  %4979 = vmatprep.subr.bf16.mxu1 %v5016_v21  ;;  %1108 = vmatprep.mubr.bf16.mxu1 %v8624_v23  ;;  %s278_s25 = scalar_lea.vmem %s8619_s7, %s4592_s22 }
  0x14   : > { %v4995_v3 = vld [vmem:[%s5887_s11] sm:$0xff]   ;;  %v4996_v4 = vld [vmem:[%s5887_s11 + $0x8] sm:$0xff]   ;;  %v4997_v5 = vld [vmem:[%s5887_s11 + $0x10] sm:$0xff]  }
  0x15   : > { %4945 = vmatpush3.bf16.msra.mxu0 %v4994_v2  ;;  %4946 = vmatprep.mubr.msk.bf16.mxu0 %vm438_vm0, %v4995_v3  ;;  %v4998_v6 = vld [vmem:[%s5887_s11 + $0x18] sm:$0xff]   ;;  %v4999_v7 = vld [vmem:[%s5887_s11 + $0x20] sm:$0xff]   ;;  %v5000_v8 = vld [vmem:[%s5887_s11 + $0x28] sm:$0xff]  }
  0x16   : > { %v5001_v9 = vld [vmem:[%s5887_s11 + $0x30] sm:$0xff]   ;;  %v5002_v10 = vld [vmem:[%s5887_s11 + $0x38] sm:$0xff]   ;;  %v5003_v11 = vld [vmem:[%s5887_s11 + $0x40] sm:$0xff]   ;;  %1036 = vmatprep.subr.bf16.mxu0 %v5013_v19  ;;  %4981 = vmatpush1.bf16.msra.mxu1 %v5014_v22 }
  0x17   : > { %v5004_v12 = vld [vmem:[%s5887_s11 + $0x48] sm:$0xff]   ;;  %v5005_v13 = vld [vmem:[%s5887_s11 + $0x50] sm:$0xff]   ;;  %v5006_v14 = vld [vmem:[%s5887_s11 + $0x58] sm:$0xff]   ;;  %1422 = vmatprep.subr.bf16.mxu1 %v5019_v25 }
  0x18   : > { %4947 = vmatmul.mubr.msk.bf16.vlgmr.msra.gmra.mrb[0].mxu0 %vm438_vm0, %v4996_v4  ;;  %v5007_v15 = vld [vmem:[%s5887_s11 + $0x60] sm:$0xff]   ;;  %v5008_v16 = vld [vmem:[%s5887_s11 + $0x68] sm:$0xff]   ;;  %v5009_v17 = vld [vmem:[%s5887_s11 + $0x70] sm:$0xff]  }
  0x19   : > { %4950 = vmatprep.mubr.msk.bf16.mxu0 %vm438_vm0, %v4997_v5  ;;  %v5010_v18 = vld [vmem:[%s5887_s11 + $0x78] sm:$0xff]   ;;  %1037 = vmatpush1.bf16.msra.mxu0 %v5011_v20 }
  0x1a   : > { %1038 = vmatprep.subr.bf16.mxu0 %v5016_v21 }
  0x1d   : > { %1039 = vmatpush1.bf16.msra.mxu0 %v5014_v22 }
  0x1e   : > { %1229 = vmatprep.subr.bf16.mxu0 %v5022_v24 }
  0x20   : > { %4951 = vmatmul.mubr.msk.bf16.gmra.mrb[4].mxu0 %vm438_vm0, %v4998_v6 }
  0x21   : > { %4954 = vmatprep.mubr.msk.bf16.mxu0 %vm438_vm0, %v4999_v7 }
  0x28   : > { %4955 = vmatmul.mubr.msk.bf16.gmra.mrb[8].mxu0 %vm438_vm0, %v5000_v8 }
  0x29   : > { %4958 = vmatprep.mubr.msk.bf16.mxu0 %vm438_vm0, %v5001_v9 }
  0x30   : > { %4959 = vmatmul.mubr.msk.bf16.gmra.mrb[12].mxu0 %vm438_vm0, %v5002_v10 }
  0x31   : > { %4962 = vmatprep.mubr.msk.bf16.mxu0 %vm438_vm0, %v5003_v11 }
  0x38   : > { %4963 = vmatmul.mubr.msk.bf16.gmra.mrb[16].mxu0 %vm438_vm0, %v5004_v12 }
  0x39   : > { %4966 = vmatprep.mubr.msk.bf16.mxu0 %vm438_vm0, %v5005_v13 }
  0x40   : > { %4967 = vmatmul.mubr.msk.bf16.gmra.mrb[20].mxu0 %vm438_vm0, %v5006_v14 }
  0x41   : > { %4970 = vmatprep.mubr.msk.bf16.mxu0 %vm438_vm0, %v5007_v15 }
  0x48   : > { %4971 = vmatmul.mubr.msk.bf16.gmra.mrb[24].mxu0 %vm438_vm0, %v5008_v16 }
  0x49   : > { %4974 = vmatprep.mubr.msk.bf16.mxu0 %vm438_vm0, %v5009_v17 }
  0x50   : > { %4975 = vmatmul.mubr.msk.bf16.gmra.mrb[28].mxu0 %vm438_vm0, %v5010_v18 }
  0x51   : > { %1068 = vmatprep.mubr.bf16.mxu0 %v8624_v23 }
  0xeb   : > { %v4948_v27 = vpop.f32.mrb[0].mxu0 }
  0xec   : > { %v5947_v28 = vadd.f32 %v4948_v27, %v5944_v26  ;;  %v521_v29 = vpop.f32.mrb[1].mxu0 }
  0xed   : > { %v5950_v30 = vadd.f32 %v5944_v26, %v521_v29  ;;  %v4949_v31 = vpop.f32.mrb[2].mxu0 }
  0xee   : > { %v4630_v32 = vmul.f32 -1.442695, %v5947_v28  ;;  %v5954_v33 = vadd.f32 %v4949_v31, %v5944_v26  ;;  %v524_v34 = vpop.f32.mrb[3].mxu0 }
  0xef   : > { %v4628_v35 = vmul.f32 -1.442695, %v5950_v30  ;;  %v5958_v36 = vadd.f32 %v5944_v26, %v524_v34 }
  0xf0   : > { %5041 = vpow2.f32 %v4630_v32  ;;  %v4631_v37 = vmul.f32 -1.442695, %v5954_v33 }
  0xf1   : > { %5043 = vpow2.f32 %v4628_v35  ;;  %v4629_v38 = vmul.f32 -1.442695, %v5958_v36 }
  0xf2   : > { %5045 = vpow2.f32 %v4631_v37 }
  0xf3   : > { %5047 = vpow2.f32 %v4629_v38  ;;  %v4952_v39 = vpop.f32.mrb[4].mxu0 }
  0xf4   : > { %v5963_v40 = vadd.f32 %v4952_v39, %v5944_v26  ;;  %v537_v41 = vpop.f32.mrb[5].mxu0 }
  0xf5   : > { %v5966_v42 = vadd.f32 %v5944_v26, %v537_v41  ;;  %v4953_v43 = vpop.f32.mrb[6].mxu0 }
  0xf6   : > { %v4634_v44 = vmul.f32 -1.442695, %v5963_v40  ;;  %v5970_v45 = vadd.f32 %v4953_v43, %v5944_v26  ;;  %v540_v46 = vpop.f32.mrb[7].mxu0 }
  0xf7   : > { %v4632_v47 = vmul.f32 -1.442695, %v5966_v42  ;;  %v5974_v48 = vadd.f32 %v5944_v26, %v540_v46 }
  0xf8   : > { %5049 = vpow2.f32 %v4634_v44  ;;  %v4635_v49 = vmul.f32 -1.442695, %v5970_v45 }
  0xf9   : > { %5051 = vpow2.f32 %v4632_v47  ;;  %v4633_v50 = vmul.f32 -1.442695, %v5974_v48 }
  0xfa   : > { %v5042_v51 = vpop.eup %5041  ;;  %5053 = vpow2.f32 %v4635_v49 }
  0xfb   : > { %v5044_v52 = vpop.eup %5043  ;;  %v746_v53 = vadd.f32 1.0, %v5042_v51  ;;  %5055 = vpow2.f32 %v4633_v50  ;;  %v4956_v54 = vpop.f32.mrb[8].mxu0 }
  0xfc   : > { %v5046_v55 = vpop.eup %5045  ;;  %v744_v56 = vadd.f32 1.0, %v5044_v52  ;;  %v5979_v57 = vadd.f32 %v4956_v54, %v5944_v26  ;;  %v553_v58 = vpop.f32.mrb[9].mxu0  ;;  %v5025_v54 = vld [vmem:[%s8615_s3 + $0x5c] ss:$40 sps:$4 sm:$0xff]  }
  0xfd   : > { %v5048_v59 = vpop.eup %5047  ;;  %5057 = vrcp.f32 %v746_v53  ;;  %v747_v60 = vadd.f32 1.0, %v5046_v55  ;;  %v5982_v61 = vadd.f32 %v5944_v26, %v553_v58  ;;  %v4957_v62 = vpop.f32.mrb[10].mxu0 }
  0xfe   : > { %5059 = vrcp.f32 %v744_v56  ;;  %v745_v63 = vadd.f32 1.0, %v5048_v59  ;;  %v4638_v0 = vmul.f32 -1.442695, %v5979_v57  ;;  %v5986_v1 = vadd.f32 %v4957_v62, %v5944_v26  ;;  %v556_v2 = vpop.f32.mrb[11].mxu0 }
  0xff   : > { %5061 = vrcp.f32 %v747_v60  ;;  %v4636_v3 = vmul.f32 -1.442695, %v5982_v61  ;;  %v5990_v4 = vadd.f32 %v5944_v26, %v556_v2 }
 0x100   : > { %5063 = vrcp.f32 %v745_v63  ;;  %v4639_v5 = vmul.f32 -1.442695, %v5986_v1 }
 0x101   : > { %5065 = vpow2.f32 %v4638_v0  ;;  %v4637_v6 = vmul.f32 -1.442695, %v5990_v4 }
 0x102   : > { %v5050_v7 = vpop.eup %5049  ;;  %5067 = vpow2.f32 %v4636_v3 }
 0x103   : > { %v5052_v8 = vpop.eup %5051  ;;  %v750_v9 = vadd.f32 1.0, %v5050_v7  ;;  %5069 = vpow2.f32 %v4639_v5  ;;  %v4960_v10 = vpop.f32.mrb[12].mxu0 }
 0x104   : > { %v5054_v11 = vpop.eup %5053  ;;  %v748_v12 = vadd.f32 1.0, %v5052_v8  ;;  %5071 = vpow2.f32 %v4637_v6  ;;  %v5995_v13 = vadd.f32 %v4960_v10, %v5944_v26  ;;  %v569_v14 = vpop.f32.mrb[13].mxu0  ;;  %v5023_v6 = vld [vmem:[%s8615_s3 + $0x58] ss:$40 sps:$4 sm:$0xff]  }
 0x105   : > { %v5056_v15 = vpop.eup %5055  ;;  %5073 = vrcp.f32 %v750_v9  ;;  %v751_v16 = vadd.f32 1.0, %v5054_v11  ;;  %v5998_v17 = vadd.f32 %v5944_v26, %v569_v14  ;;  %v4961_v18 = vpop.f32.mrb[14].mxu0  ;;  %v5031_v9 = vld [vmem:[%s8615_s3 + $0x1c] ss:$40 sps:$4 sm:$0xff]  }
 0x106   : > { %5075 = vrcp.f32 %v748_v12  ;;  %v749_v19 = vadd.f32 1.0, %v5056_v15  ;;  %v4642_v20 = vmul.f32 -1.442695, %v5995_v13  ;;  %v6002_v21 = vadd.f32 %v4961_v18, %v5944_v26  ;;  %v572_v22 = vpop.f32.mrb[15].mxu0 }
 0x107   : > { %v5058_v24 = vpop.eup %5057  ;;  %5077 = vrcp.f32 %v751_v16  ;;  %v4640_v25 = vmul.f32 -1.442695, %v5998_v17  ;;  %v6006_v27 = vadd.f32 %v5944_v26, %v572_v22 }
 0x108   : > { %v5060_v29 = vpop.eup %5059  ;;  %5079 = vrcp.f32 %v749_v19  ;;  %v4643_v31 = vmul.f32 -1.442695, %v6002_v21  ;;  %v842_v37 = vmul.f32 %v5058_v24, %v5947_v28  ;;  %v5020_v28 = vld [vmem:[%s8615_s3 + $0x8] ss:$40 sps:$4 sm:$0xff]  }
 0x109   : > { %v5062_v32 = vpop.eup %5061  ;;  %5081 = vpow2.f32 %v4642_v20  ;;  %v4641_v34 = vmul.f32 -1.442695, %v6006_v27  ;;  %v840_v41 = vmul.f32 %v5060_v29, %v5950_v30 }
 0x10a   : > { %v5064_v35 = vpop.eup %5063  ;;  %v843_v38 = vmul.f32 %v5062_v32, %v5954_v33  ;;  %5083 = vpow2.f32 %v4640_v25 }
 0x10b   : > { %v5066_v39 = vpop.eup %5065  ;;  %v841_v43 = vmul.f32 %v5064_v35, %v5958_v36  ;;  %5085 = vpow2.f32 %v4643_v31  ;;  %v4964_v44 = vpop.f32.mrb[16].mxu0 }
 0x10c   : > { %v5068_v46 = vpop.eup %5067  ;;  %v6014_v47 = vpack.c.bf16 %v843_v38, %v842_v37  ;;  %v754_v49 = vadd.f32 1.0, %v5066_v39  ;;  %5087 = vpow2.f32 %v4641_v34  ;;  %v6017_v50 = vadd.f32 %v4964_v44, %v5944_v26  ;;  %v585_v51 = vpop.f32.mrb[17].mxu0 }
 0x10d   : > { %v5070_v33 = vpop.eup %5069  ;;  %v6022_v52 = vpack.c.bf16 %v841_v43, %v840_v41  ;;  %v752_v30 = vadd.f32 1.0, %v5068_v46  ;;  %v6025_v36 = vadd.f32 %v5944_v26, %v585_v51  ;;  %v4965_v53 = vpop.f32.mrb[18].mxu0 }
 0x10e   : > { %v5072_v55 = vpop.eup %5071  ;;  %5089 = vrcp.f32 %v754_v49  ;;  %v755_v56 = vadd.f32 1.0, %v5070_v33  ;;  %v4646_v58 = vmul.f32 -1.442695, %v6017_v50  ;;  %v6032_v59 = vadd.f32 %v4965_v53, %v5944_v26  ;;  %v588_v60 = vpop.f32.mrb[19].mxu0 }
 0x10f   : > { %v5074_v62 = vpop.eup %5073  ;;  %5091 = vrcp.f32 %v752_v30  ;;  %v753_v63 = vadd.f32 1.0, %v5072_v55  ;;  %v4644_v0 = vmul.f32 -1.442695, %v6025_v36  ;;  %v6036_v2 = vadd.f32 %v5944_v26, %v588_v60  ;;  %4680 = vmatmul.mubr.msk.bf16.vlgmr.msra.gmra.mrb[32].mxu0 %vm438_vm0, %v6022_v52 }
 0x110   : > { %v5076_v3 = vpop.eup %5075  ;;  %5093 = vrcp.f32 %v755_v56  ;;  %v4647_v5 = vmul.f32 -1.442695, %v6032_v59  ;;  %1078 = vmatprep.mubr.bf16.mxu0 %v8624_v23  ;;  %1230 = vmatpush1.bf16.msra.mxu0 %v5020_v28  ;;  %v846_v11 = vmul.f32 %v5074_v62, %v5963_v40 }
 0x111   : > { %v5078_v7 = vpop.eup %5077  ;;  %5095 = vrcp.f32 %v753_v63  ;;  %v4645_v8 = vmul.f32 -1.442695, %v6036_v2  ;;  %1231 = vmatprep.subr.bf16.mxu0 %v5025_v54  ;;  %v844_v15 = vmul.f32 %v5076_v3, %v5966_v42 }
 0x112   : > { %v5080_v10 = vpop.eup %5079  ;;  %v847_v12 = vmul.f32 %v5078_v7, %v5970_v45  ;;  %5097 = vpow2.f32 %v4646_v58 }
 0x113   : > { %v5082_v14 = vpop.eup %5081  ;;  %v845_v16 = vmul.f32 %v5080_v10, %v5974_v48  ;;  %5099 = vpow2.f32 %v4644_v0  ;;  %v4968_v18 = vpop.f32.mrb[20].mxu0 }
 0x114   : > { %v5084_v19 = vpop.eup %5083  ;;  %v6053_v20 = vpack.c.bf16 %v847_v12, %v846_v11  ;;  %v758_v22 = vadd.f32 1.0, %v5082_v14  ;;  %5101 = vpow2.f32 %v4647_v5  ;;  %v6056_v24 = vadd.f32 %v4968_v18, %v5944_v26  ;;  %v601_v25 = vpop.f32.mrb[21].mxu0  ;;  %1232 = vmatpush1.bf16.msra.mxu0 %v5023_v6 }
 0x115   : > { %v5086_v40 = vpop.eup %5085  ;;  %v6058_v45 = vpack.c.bf16 %v845_v16, %v844_v15  ;;  %v756_v29 = vadd.f32 1.0, %v5084_v19  ;;  %5103 = vpow2.f32 %v4645_v8  ;;  %v6061_v42 = vadd.f32 %v5944_v26, %v601_v25  ;;  %v4969_v48 = vpop.f32.mrb[22].mxu0  ;;  %1615 = vmatprep.subr.bf16.mxu0 %v5031_v9  ;;  %v5028_v8 = vld [vmem:[%s8615_s3 + $0x64] ss:$40 sps:$4 sm:$0xff]  }
 0x116   : > { %v5088_v31 = vpop.eup %5087  ;;  %5105 = vrcp.f32 %v758_v22  ;;  %v759_v32 = vadd.f32 1.0, %v5086_v40  ;;  %v4650_v34 = vmul.f32 -1.442695, %v6056_v24  ;;  %v6065_v35 = vadd.f32 %v4969_v48, %v5944_v26  ;;  %v604_v37 = vpop.f32.mrb[23].mxu0  ;;  %v5026_v22 = vld [vmem:[%s8615_s3 + $0x60] ss:$40 sps:$4 sm:$0xff]  }
 0x117   : > { %5107 = vrcp.f32 %v756_v29  ;;  %v757_v38 = vadd.f32 1.0, %v5088_v31  ;;  %v4648_v39 = vmul.f32 -1.442695, %v6061_v42  ;;  %v6069_v41 = vadd.f32 %v5944_v26, %v604_v37  ;;  %4681 = vmatmul.mubr.msk.bf16.gmra.mrb[36].mxu0 %vm438_vm0, %v6014_v47  ;;  %v5034_v29 = vld [vmem:[%s8615_s3 + $0x24] ss:$40 sps:$4 sm:$0xff]  }
 0x118   : > { %v5090_v43 = vpop.eup %5089  ;;  %5109 = vrcp.f32 %v759_v32  ;;  %v4651_v44 = vmul.f32 -1.442695, %v6065_v35  ;;  %1088 = vmatprep.mubr.bf16.mxu0 %v8624_v23 }
 0x119   : > { %v5092_v46 = vpop.eup %5091  ;;  %5111 = vrcp.f32 %v757_v38  ;;  %v4649_v49 = vmul.f32 -1.442695, %v6069_v41  ;;  %v850_v33 = vmul.f32 %v5090_v43, %v5979_v57  ;;  %v5017_v57 = vld [vmem:[%s8615_s3 + $0x10] ss:$40 sps:$4 sm:$0xff]  }
 0x11a   : > { %v5094_v51 = vpop.eup %5093  ;;  %5113 = vpow2.f32 %v4650_v34  ;;  %v848_v55 = vmul.f32 %v5092_v46, %v5982_v61 }
 0x11b   : > { %v5096_v28 = vpop.eup %5095  ;;  %v851_v30 = vmul.f32 %v5094_v51, %v5986_v1  ;;  %5115 = vpow2.f32 %v4648_v39  ;;  %v4972_v53 = vpop.f32.mrb[24].mxu0 }
 0x11c   : > { %v5098_v54 = vpop.eup %5097  ;;  %v849_v56 = vmul.f32 %v5096_v28, %v5990_v4  ;;  %5117 = vpow2.f32 %v4651_v44  ;;  %v6081_v58 = vadd.f32 %v4972_v53, %v5944_v26  ;;  %v617_v60 = vpop.f32.mrb[25].mxu0 }
 0x11d   : > { %v5100_v62 = vpop.eup %5099  ;;  %v6083_v63 = vpack.c.bf16 %v851_v30, %v850_v33  ;;  %v762_v0 = vadd.f32 1.0, %v5098_v54  ;;  %5119 = vpow2.f32 %v4649_v49  ;;  %v6089_v1 = vadd.f32 %v5944_v26, %v617_v60  ;;  %v4973_v61 = vpop.f32.mrb[26].mxu0 }
 0x11e   : > { %v5102_v3 = vpop.eup %5101  ;;  %v6091_v4 = vpack.c.bf16 %v849_v56, %v848_v55  ;;  %v760_v5 = vadd.f32 1.0, %v5100_v62  ;;  %v6094_v6 = vadd.f32 %v4973_v61, %v5944_v26  ;;  %v620_v7 = vpop.f32.mrb[27].mxu0  ;;  %v4654_v11 = vmul.f32 -1.442695, %v6081_v58 }
 0x11f   : > { %v5104_v9 = vpop.eup %5103  ;;  %5121 = vrcp.f32 %v762_v0  ;;  %v763_v10 = vadd.f32 1.0, %v5102_v3  ;;  %4682 = vmatmul.mubr.msk.bf16.gmra.mrb[40].mxu0 %vm438_vm0, %v6058_v45  ;;  %v6103_v12 = vadd.f32 %v5944_v26, %v620_v7  ;;  %v4652_v16 = vmul.f32 -1.442695, %v6089_v1 }
 0x120   : > { %v5106_v14 = vpop.eup %5105  ;;  %5123 = vrcp.f32 %v760_v5  ;;  %v761_v15 = vadd.f32 1.0, %v5104_v9  ;;  %4684 = vmatmul.mubr.msk.bf16.vlgmr.msra.gmra.mrb[0].mxu1 %vm438_vm0, %v6091_v4  ;;  %1098 = vmatprep.mubr.bf16.mxu0 %v8624_v23  ;;  %v4655_v19 = vmul.f32 -1.442695, %v6094_v6 }
 0x121   : > { %v5108_v18 = vpop.eup %5107  ;;  %5125 = vrcp.f32 %v763_v10  ;;  %1423 = vmatpush1.bf16.msra.mxu1 %v5017_v57  ;;  %1118 = vmatprep.mubr.bf16.mxu1 %v8624_v23  ;;  %v4653_v40 = vmul.f32 -1.442695, %v6103_v12  ;;  %v854_v31 = vmul.f32 %v5106_v14, %v5995_v13  ;;  %v5029_v14 = vld [vmem:[%s8615_s3 + $0x18] ss:$40 sps:$4 sm:$0xff]  }
 0x122   : > { %v5110_v25 = vpop.eup %5109  ;;  %5127 = vrcp.f32 %v761_v15  ;;  %1424 = vmatprep.subr.bf16.mxu1 %v5028_v8  ;;  %v852_v38 = vmul.f32 %v5108_v18, %v5998_v17 }
 0x123   : > { %v5112_v48 = vpop.eup %5111  ;;  %v855_v32 = vmul.f32 %v5110_v25, %v6002_v21  ;;  %5129 = vpow2.f32 %v4654_v11  ;;  %v4976_v34 = vpop.f32.mrb[28].mxu0 }
 0x124   : > { %v5114_v37 = vpop.eup %5113  ;;  %v853_v39 = vmul.f32 %v5112_v48, %v6006_v27  ;;  %5131 = vpow2.f32 %v4652_v16  ;;  %v6123_v43 = vadd.f32 %v4976_v34, %v5944_v26  ;;  %v633_v44 = vpop.f32.mrb[29].mxu0 }
 0x125   : > { %v5116_v46 = vpop.eup %5115  ;;  %v6125_v49 = vpack.c.bf16 %v855_v32, %v854_v31  ;;  %v766_v51 = vadd.f32 1.0, %v5114_v37  ;;  %5133 = vpow2.f32 %v4655_v19  ;;  %v6128_v13 = vadd.f32 %v5944_v26, %v633_v44  ;;  %v4977_v21 = vpop.f32.mrb[30].mxu0  ;;  %1425 = vmatpush1.bf16.msra.mxu1 %v5026_v22 }
 0x126   : > { %v5118_v28 = vpop.eup %5117  ;;  %v6130_v33 = vpack.c.bf16 %v853_v39, %v852_v38  ;;  %v764_v17 = vadd.f32 1.0, %v5116_v46  ;;  %5135 = vpow2.f32 %v4653_v40  ;;  %v636_v27 = vpop.f32.mrb[31].mxu0  ;;  %1808 = vmatprep.subr.bf16.mxu1 %v5034_v29  ;;  %v4658_v54 = vmul.f32 -1.442695, %v6123_v43  ;;  %v5035_v29 = vld [vmem:[%s8615_s3 + $0x68] ss:$40 sps:$4 sm:$0xff]  }
 0x127   : > { %v5120_v30 = vpop.eup %5119  ;;  %5137 = vrcp.f32 %v766_v51  ;;  %v767_v53 = vadd.f32 1.0, %v5118_v28  ;;  %4683 = vmatmul.mubr.msk.bf16.gmra.mrb[44].mxu0 %vm438_vm0, %v6053_v20  ;;  %v6136_v55 = vadd.f32 %v4977_v21, %v5944_v26  ;;  %v4656_v60 = vmul.f32 -1.442695, %v6128_v13 }
 0x128   : > { %5139 = vrcp.f32 %v764_v17  ;;  %v765_v56 = vadd.f32 1.0, %v5120_v30  ;;  %4685 = vmatmul.mubr.msk.bf16.gmra.mrb[4].mxu1 %vm438_vm0, %v6083_v63  ;;  %1261 = vmatprep.mubr.bf16.mxu0 %v8624_v23  ;;  %v6143_v62 = vadd.f32 %v5944_v26, %v636_v27 }
 0x129   : > { %v5122_v0 = vpop.eup %5121  ;;  %5141 = vrcp.f32 %v767_v53  ;;  %1128 = vmatprep.mubr.bf16.mxu1 %v8624_v23  ;;  %v4659_v57 = vmul.f32 -1.442695, %v6136_v55 }
 0x12a   : > { %v5124_v61 = vpop.eup %5123  ;;  %5143 = vrcp.f32 %v765_v56  ;;  %v4657_v3 = vmul.f32 -1.442695, %v6143_v62  ;;  %v858_v8 = vmul.f32 %v5122_v0, %v6017_v50  ;;  %v5037_v50 = vld [vmem:[%s8615_s3 + $0x6c] ss:$40 sps:$4 sm:$0xff]  }
 0x12b   : > { %v5126_v5 = vpop.eup %5125  ;;  %5145 = vpow2.f32 %v4658_v54  ;;  %v856_v10 = vmul.f32 %v5124_v61, %v6025_v36 }
 0x12c   : > { %v5128_v7 = vpop.eup %5127  ;;  %v859_v9 = vmul.f32 %v5126_v5, %v6032_v59  ;;  %5147 = vpow2.f32 %v4656_v60 }
 0x12d   : > { %v5130_v26 = vpop.eup %5129  ;;  %v857_v11 = vmul.f32 %v5128_v7, %v6036_v2  ;;  %5149 = vpow2.f32 %v4659_v57 }
 0x12e   : > { %v5132_v15 = vpop.eup %5131  ;;  %v6155_v16 = vpack.c.bf16 %v859_v9, %v858_v8  ;;  %v770_v18 = vadd.f32 1.0, %v5130_v26  ;;  %5151 = vpow2.f32 %v4657_v3 }
 0x12f   : > { %v5134_v59 = vpop.eup %5133  ;;  %v6160_v19 = vpack.c.bf16 %v857_v11, %v856_v10  ;;  %v768_v36 = vadd.f32 1.0, %v5132_v15  ;;  %4696 = vmatmul.mubr.msk.bf16.vlgmr.msra.gmra.mrb[48].mxu0 %vm438_vm0, %v6022_v52  ;;  %v6332_v15 = vld [vmem:[%s8616_s4] sm:$0xff] }
 0x130   : > { %v5136_v2 = vpop.eup %5135  ;;  %5153 = vrcp.f32 %v770_v18  ;;  %v771_v22 = vadd.f32 1.0, %v5134_v59  ;;  %4686 = vmatmul.mubr.msk.bf16.gmra.mrb[8].mxu1 %vm438_vm0, %v6130_v33  ;;  %1271 = vmatprep.mubr.bf16.mxu0 %v8624_v23 }
 0x131   : > { %v5138_v25 = vpop.eup %5137  ;;  %5155 = vrcp.f32 %v768_v36  ;;  %v769_v40 = vadd.f32 1.0, %v5136_v2  ;;  %1138 = vmatprep.mubr.bf16.mxu1 %v8624_v23  ;;  %1616 = vmatpush1.bf16.msra.mxu0 %v5029_v14 }
 0x132   : > { %v5140_v48 = vpop.eup %5139  ;;  %5157 = vrcp.f32 %v771_v22  ;;  %1617 = vmatprep.subr.bf16.mxu0 %v5037_v50  ;;  %v862_v34 = vmul.f32 %v5138_v25, %v6056_v24 }
 0x133   : > { %v5142_v31 = vpop.eup %5141  ;;  %5159 = vrcp.f32 %v769_v40  ;;  %v860_v39 = vmul.f32 %v5140_v48, %v6061_v42 }
 0x134   : > { %v5144_v32 = vpop.eup %5143  ;;  %v863_v37 = vmul.f32 %v5142_v31, %v6065_v35 }
 0x135   : > { %v5146_v38 = vpop.eup %5145  ;;  %v861_v44 = vmul.f32 %v5144_v32, %v6069_v41  ;;  %1618 = vmatpush1.bf16.msra.mxu0 %v5035_v29 }
 0x136   : > { %v5148_v46 = vpop.eup %5147  ;;  %v6175_v51 = vpack.c.bf16 %v863_v37, %v862_v34  ;;  %v774_v21 = vadd.f32 1.0, %v5146_v38 }
 0x137   : > { %v5150_v28 = vpop.eup %5149  ;;  %v6177_v17 = vpack.c.bf16 %v861_v44, %v860_v39  ;;  %v772_v27 = vadd.f32 1.0, %v5148_v46  ;;  %4697 = vmatmul.mubr.msk.bf16.gmra.mrb[52].mxu0 %vm438_vm0, %v6014_v47 }
 0x138   : > { %8688 = vst [vmem:[#allocation3_spill] sm:$0xff] %v6175_v51  ;;  %v5152_v24 = vpop.eup %5151  ;;  %5161 = vrcp.f32 %v774_v21  ;;  %v775_v35 = vadd.f32 1.0, %v5150_v28  ;;  %4687 = vmatmul.mubr.msk.bf16.gmra.mrb[12].mxu1 %vm438_vm0, %v6125_v49  ;;  %1281 = vmatprep.mubr.bf16.mxu0 %v8624_v23 }
 0x139   : > { %8689 = vst [vmem:[#allocation4_spill] sm:$0xff] %v6177_v17  ;;  %5163 = vrcp.f32 %v772_v27  ;;  %v773_v42 = vadd.f32 1.0, %v5152_v24  ;;  %1148 = vmatprep.mubr.bf16.mxu1 %v8624_v23 }
 0x13a   : > { %v5154_v41 = vpop.eup %5153  ;;  %5165 = vrcp.f32 %v775_v35 }
 0x13b   : > { %v5156_v30 = vpop.eup %5155  ;;  %v866_v53 = vmul.f32 %v5154_v41, %v6081_v58  ;;  %5167 = vrcp.f32 %v773_v42 }
 0x13c   : > { %v5158_v54 = vpop.eup %5157  ;;  %v864_v56 = vmul.f32 %v5156_v30, %v6089_v1 }
 0x13d   : > { %v5160_v60 = vpop.eup %5159  ;;  %v867_v0 = vmul.f32 %v5158_v54, %v6094_v6 }
 0x13e   : > { %v865_v57 = vmul.f32 %v5160_v60, %v6103_v12 }
 0x13f   : > { %v6189_v61 = vpack.c.bf16 %v867_v0, %v866_v53  ;;  %4698 = vmatmul.mubr.msk.bf16.gmra.mrb[56].mxu0 %vm438_vm0, %v6058_v45 }
 0x140   : > { %v6193_v3 = vpack.c.bf16 %v865_v57, %v864_v56  ;;  %4688 = vmatmul.mubr.msk.bf16.gmra.mrb[16].mxu1 %vm438_vm0, %v6160_v19  ;;  %1291 = vmatprep.mubr.bf16.mxu0 %v8624_v23 }
 0x141   : > { %8690 = vst [vmem:[#allocation5_spill] sm:$0xff] %v6189_v61  ;;  %1158 = vmatprep.mubr.bf16.mxu1 %v8624_v23 }
 0x142   : > { %8691 = vst [vmem:[#allocation6_spill] sm:$0xff] %v6193_v3  ;;  %v5162_v58 = vpop.eup %5161 }
 0x143   : > { %v5164_v1 = vpop.eup %5163  ;;  %v870_v6 = vmul.f32 %v5162_v58, %v6123_v43  ;;  %v5032_v43 = vld [vmem:[%s8615_s3 + $0x20] ss:$40 sps:$4 sm:$0xff]  }
 0x144   : > { %v5166_v5 = vpop.eup %5165  ;;  %v868_v12 = vmul.f32 %v5164_v1, %v6128_v13  ;;  %v5040_v13 = vld [vmem:[%s8615_s3 + $0x74] ss:$40 sps:$4 sm:$0xff]  }
 0x145   : > { %v5168_v7 = vpop.eup %5167  ;;  %v871_v8 = vmul.f32 %v5166_v5, %v6136_v55  ;;  %v5038_v55 = vld [vmem:[%s8615_s3 + $0x70] ss:$40 sps:$4 sm:$0xff]  }
 0x146   : > { %v869_v9 = vmul.f32 %v5168_v7, %v6143_v62  ;;  %v2163_v62 = vlaneseq }
 0x147   : > { %v6203_v26 = vpack.c.bf16 %v871_v8, %v870_v6  ;;  %4699 = vmatmul.mubr.msk.bf16.gmra.mrb[60].mxu0 %vm438_vm0, %v6053_v20 }
 0x148   : > { %v6207_v10 = vpack.c.bf16 %v869_v9, %v868_v12  ;;  %4689 = vmatmul.mubr.msk.bf16.gmra.mrb[20].mxu1 %vm438_vm0, %v6155_v16  ;;  %1301 = vmatprep.mubr.bf16.mxu0 %v8624_v23  ;;  %v6320_v11 = vshrl.u32 %v2163_v62, 7 }
 0x149   : > { %8692 = vst [vmem:[#allocation7_spill] sm:$0xff] %v6203_v26  ;;  %1168 = vmatprep.mubr.bf16.mxu1 %v8624_v23 }
 0x14a   : > { %8693 = vst [vmem:[#allocation8_spill] sm:$0xff] %v6207_v10  ;;  %8694 = vst [vmem:[#allocation9_spill] sm:$0xff] %v6320_v11  ;;  %v6327_v14 = vsub.s32 0, %v6320_v11  ;;  %v6335_v18 = vsub.s32 1, %v6320_v11  ;;  %v8623_v0 = vsub.s32 2, %v6320_v11  ;;  %v8622_v1 = vsub.s32 3, %v6320_v11 }
 0x14c   : > { %8695 = vst [vmem:[#allocation10_spill] sm:$0xff] %v6327_v14  ;;  %8696 = vst [vmem:[#allocation11_spill] sm:$0xff] %v6335_v18  ;;  %v2166_v50 = vrot.slane %v6332_v15, %v6327_v14  ;;  %v2170_v59 = vrot.slane %v6332_v15, %v6335_v18  ;;  %v2174_v62 = vrot.slane %v6332_v15, %v8623_v0 }
 0x14e   : > { %v2213_v36 = vpack.c.bf16 %v2166_v50, %v2166_v50  ;;  %v2214_v2 = vpack.c.bf16 %v2170_v59, %v2170_v59 }
 0x14f   : > { %4700 = vmatmul.mubr.msk.bf16.gmra.mrb[64].mxu0 %vm438_vm0, %v6091_v4 }
 0x150   : > { %4690 = vmatmul.mubr.msk.bf16.gmra.mrb[24].mxu1 %vm438_vm0, %v6177_v17  ;;  %1311 = vmatprep.mubr.bf16.mxu0 %v8624_v23  ;;  %v2224_v22 = vpack.i.b16 %v2213_v36, %v2213_v36  ;;  %v2231_v25 = vpack.i.b16 %v2214_v2, %v2214_v2 }
 0x151   : > { %1178 = vmatprep.mubr.bf16.mxu1 %v8624_v23 }
 0x152   : > { %v6354_v48 = vrot.slane %v2224_v22, %v6327_v14  ;;  %v6357_v32 = vrot.slane %v2231_v25, %v6327_v14  ;;  %v2178_v22 = vrot.slane %v6332_v15, %v8622_v1 }
 0x157   : > { %4701 = vmatmul.mubr.msk.bf16.gmra.mrb[68].mxu0 %vm438_vm0, %v6083_v63 }
 0x158   : > { %4691 = vmatmul.mubr.msk.bf16.gmra.mrb[28].mxu1 %vm438_vm0, %v6175_v51  ;;  %1321 = vmatprep.mubr.bf16.mxu0 %v8624_v23 }
 0x159   : > { %1188 = vmatprep.mubr.bf16.mxu1 %v8624_v23 }
 0x15f   : > { %4702 = vmatmul.mubr.msk.bf16.gmra.mrb[72].mxu0 %vm438_vm0, %v6130_v33 }
 0x160   : > { %4692 = vmatmul.mubr.msk.bf16.gmra.mrb[32].mxu1 %vm438_vm0, %v6193_v3  ;;  %1331 = vmatprep.mubr.bf16.mxu0 %v8624_v23 }
 0x161   : > { %1198 = vmatprep.mubr.bf16.mxu1 %v8624_v23 }
 0x167   : > { %4703 = vmatmul.mubr.msk.bf16.gmra.mrb[76].mxu0 %vm438_vm0, %v6125_v49 }
 0x168   : > { %4693 = vmatmul.mubr.msk.bf16.gmra.mrb[36].mxu1 %vm438_vm0, %v6189_v61  ;;  %1341 = vmatprep.mubr.bf16.mxu0 %v8624_v23 }
 0x169   : > { %1208 = vmatprep.mubr.bf16.mxu1 %v8624_v23 }
 0x16f   : > { %4704 = vmatmul.mubr.msk.bf16.gmra.mrb[80].mxu0 %vm438_vm0, %v6160_v19 }
 0x170   : > { %4694 = vmatmul.mubr.msk.bf16.gmra.mrb[40].mxu1 %vm438_vm0, %v6207_v10  ;;  %1351 = vmatprep.mubr.bf16.mxu0 %v8624_v23 }
 0x171   : > { %1218 = vmatprep.mubr.bf16.mxu1 %v8624_v23 }
 0x177   : > { %4705 = vmatmul.mubr.msk.bf16.gmra.mrb[84].mxu0 %vm438_vm0, %v6155_v16 }
 0x178   : > { %4695 = vmatmul.mubr.msk.bf16.gmra.mrb[44].mxu1 %vm438_vm0, %v6203_v26  ;;  %1361 = vmatprep.mubr.bf16.mxu0 %v8624_v23 }
 0x179   : > { %1454 = vmatprep.mubr.bf16.mxu1 %v8624_v23 }
 0x17f   : > { %4706 = vmatmul.mubr.msk.bf16.gmra.mrb[88].mxu0 %vm438_vm0, %v6177_v17 }
 0x180   : > { %4712 = vmatmul.mubr.msk.bf16.vlgmr.msra.gmra.mrb[48].mxu1 %vm438_vm0, %v6022_v52  ;;  %1371 = vmatprep.mubr.bf16.mxu0 %v8624_v23 }
 0x181   : > { %1809 = vmatpush1.bf16.msra.mxu1 %v5032_v43  ;;  %1464 = vmatprep.mubr.bf16.mxu1 %v8624_v23 }
 0x182   : > { %1810 = vmatprep.subr.bf16.mxu1 %v5040_v13 }
 0x185   : > { %1811 = vmatpush1.bf16.msra.mxu1 %v5038_v55 }
 0x187   : > { %4707 = vmatmul.mubr.msk.bf16.gmra.mrb[92].mxu0 %vm438_vm0, %v6175_v51 }
 0x188   : > { %4713 = vmatmul.mubr.msk.bf16.gmra.mrb[52].mxu1 %vm438_vm0, %v6014_v47  ;;  %1381 = vmatprep.mubr.bf16.mxu0 %v8624_v23 }
 0x189   : > { %1474 = vmatprep.mubr.bf16.mxu1 %v8624_v23 }
 0x18f   : > { %4708 = vmatmul.mubr.msk.bf16.gmra.mrb[96].mxu0 %vm438_vm0, %v6193_v3 }
 0x190   : > { %4714 = vmatmul.mubr.msk.bf16.gmra.mrb[56].mxu1 %vm438_vm0, %v6058_v45  ;;  %1391 = vmatprep.mubr.bf16.mxu0 %v8624_v23 }
 0x191   : > { %1484 = vmatprep.mubr.bf16.mxu1 %v8624_v23 }
 0x197   : > { %4709 = vmatmul.mubr.msk.bf16.gmra.mrb[100].mxu0 %vm438_vm0, %v6189_v61 }
 0x198   : > { %4715 = vmatmul.mubr.msk.bf16.gmra.mrb[60].mxu1 %vm438_vm0, %v6053_v20  ;;  %1401 = vmatprep.mubr.bf16.mxu0 %v8624_v23 }
 0x199   : > { %1494 = vmatprep.mubr.bf16.mxu1 %v8624_v23 }
 0x19f   : > { %4710 = vmatmul.mubr.msk.bf16.gmra.mrb[104].mxu0 %vm438_vm0, %v6207_v10 }
 0x1a0   : > { %4716 = vmatmul.mubr.msk.bf16.gmra.mrb[64].mxu1 %vm438_vm0, %v6091_v4  ;;  %1411 = vmatprep.mubr.bf16.mxu0 %v8624_v23 }
 0x1a1   : > { %1504 = vmatprep.mubr.bf16.mxu1 %v8624_v23 }
 0x1a7   : > { %4711 = vmatmul.mubr.msk.bf16.gmra.mrb[108].mxu0 %vm438_vm0, %v6203_v26 }
 0x1a8   : > { %4717 = vmatmul.mubr.msk.bf16.gmra.mrb[68].mxu1 %vm438_vm0, %v6083_v63  ;;  %1647 = vmatprep.mubr.bf16.mxu0 %v8624_v23 }
 0x1a9   : > { %1514 = vmatprep.mubr.bf16.mxu1 %v8624_v23 }
 0x1af   : > { %4728 = vmatmul.mubr.msk.bf16.vlgmr.msra.gmra.mrb[112].mxu0 %vm438_vm0, %v6022_v52 }
 0x1b0   : > { %4718 = vmatmul.mubr.msk.bf16.gmra.mrb[72].mxu1 %vm438_vm0, %v6130_v33  ;;  %1657 = vmatprep.mubr.bf16.mxu0 %v8624_v23 }
 0x1b1   : > { %1524 = vmatprep.mubr.bf16.mxu1 %v8624_v23 }
 0x1b7   : > { %4729 = vmatmul.mubr.msk.bf16.gmra.mrb[116].mxu0 %vm438_vm0, %v6014_v47 }
 0x1b8   : > { %4719 = vmatmul.mubr.msk.bf16.gmra.mrb[76].mxu1 %vm438_vm0, %v6125_v49  ;;  %1667 = vmatprep.mubr.bf16.mxu0 %v8624_v23 }
 0x1b9   : > { %1534 = vmatprep.mubr.bf16.mxu1 %v8624_v23 }
 0x1bf   : > { %4730 = vmatmul.mubr.msk.bf16.gmra.mrb[120].mxu0 %vm438_vm0, %v6058_v45 }
 0x1c0   : > { %4720 = vmatmul.mubr.msk.bf16.gmra.mrb[80].mxu1 %vm438_vm0, %v6160_v19  ;;  %1677 = vmatprep.mubr.bf16.mxu0 %v8624_v23 }
 0x1c1   : > { %1544 = vmatprep.mubr.bf16.mxu1 %v8624_v23 }
 0x1c7   : > { %4731 = vmatmul.mubr.msk.bf16.gmra.mrb[124].mxu0 %vm438_vm0, %v6053_v20 }
 0x1c8   : > { %4721 = vmatmul.mubr.msk.bf16.gmra.mrb[84].mxu1 %vm438_vm0, %v6155_v16  ;;  %1687 = vmatprep.mubr.bf16.mxu0 %v8624_v23 }
 0x1c9   : > { %1554 = vmatprep.mubr.bf16.mxu1 %v8624_v23 }
 0x1cf   : > { %4732 = vmatmul.mubr.msk.bf16.gmra.mrb[128].mxu0 %vm438_vm0, %v6091_v4 }
 0x1d0   : > { %4722 = vmatmul.mubr.msk.bf16.gmra.mrb[88].mxu1 %vm438_vm0, %v6177_v17  ;;  %1697 = vmatprep.mubr.bf16.mxu0 %v8624_v23 }
 0x1d1   : > { %1564 = vmatprep.mubr.bf16.mxu1 %v8624_v23 }
 0x1d7   : > { %4733 = vmatmul.mubr.msk.bf16.gmra.mrb[132].mxu0 %vm438_vm0, %v6083_v63 }
 0x1d8   : > { %4723 = vmatmul.mubr.msk.bf16.gmra.mrb[92].mxu1 %vm438_vm0, %v6175_v51  ;;  %1707 = vmatprep.mubr.bf16.mxu0 %v8624_v23 }
 0x1d9   : > { %1574 = vmatprep.mubr.bf16.mxu1 %v8624_v23 }
 0x1df   : > { %4734 = vmatmul.mubr.msk.bf16.gmra.mrb[136].mxu0 %vm438_vm0, %v6130_v33 }
 0x1e0   : > { %4724 = vmatmul.mubr.msk.bf16.gmra.mrb[96].mxu1 %vm438_vm0, %v6193_v3  ;;  %1717 = vmatprep.mubr.bf16.mxu0 %v8624_v23 }
 0x1e1   : > { %1584 = vmatprep.mubr.bf16.mxu1 %v8624_v23 }
 0x1e2   : > { %v1070_v40 = vpop.f32.mrb[32].mxu0 }
 0x1e3   : > { %v1072_v29 = vpop.f32.mrb[33].mxu0 }
 0x1e4   : > { %v1074_v31 = vpop.f32.mrb[34].mxu0 }
 0x1e5   : > { %v2001_v34 = vpack.c.bf16 %v1074_v31, %v1070_v40  ;;  %v1076_v37 = vpop.f32.mrb[35].mxu0 }
 0x1e6   : > { %v2002_v38 = vpack.c.bf16 %v1076_v37, %v1072_v29 }
 0x1e7   : > { %v6360_v39 = vadd.bf16 %v6354_v48, %v2001_v34  ;;  %4735 = vmatmul.mubr.msk.bf16.gmra.mrb[140].mxu0 %vm438_vm0, %v6125_v49 }
 0x1e8   : > { %v6365_v44 = vadd.bf16 %v6357_v32, %v2002_v38  ;;  %4725 = vmatmul.mubr.msk.bf16.gmra.mrb[100].mxu1 %vm438_vm0, %v6189_v61  ;;  %1727 = vmatprep.mubr.bf16.mxu0 %v8624_v23 }
 0x1e9   : > { %v4760_v46 = vmul.bf16 3216621497, %v6360_v39  ;;  %1594 = vmatprep.mubr.bf16.mxu1 %v8624_v23 }
 0x1ea   : > { %v4761_v21 = vmul.bf16 3216621497, %v6365_v44  ;;  %v1080_v28 = vpop.f32.mrb[36].mxu0 }
 0x1eb   : > { %5169 = vpow.bf16 %v4760_v46  ;;  %v1082_v27 = vpop.f32.mrb[37].mxu0 }
 0x1ec   : > { %5171 = vpow.bf16 %v4761_v21  ;;  %v1084_v24 = vpop.f32.mrb[38].mxu0  ;;  %v2215_v21 = vpack.c.bf16 %v2174_v62, %v2174_v62 }
 0x1ed   : > { %v2011_v35 = vpack.c.bf16 %v1084_v24, %v1080_v28  ;;  %v1086_v42 = vpop.f32.mrb[39].mxu0 }
 0x1ee   : > { %v2012_v41 = vpack.c.bf16 %v1086_v42, %v1082_v27  ;;  %v8621_v42 = vsub.s32 4, %v6320_v11 }
 0x1ef   : > { %v6374_v30 = vadd.bf16 %v6354_v48, %v2011_v35  ;;  %4736 = vmatmul.mubr.msk.bf16.gmra.mrb[144].mxu0 %vm438_vm0, %v6160_v19  ;;  %v2216_v35 = vpack.c.bf16 %v2178_v22, %v2178_v22 }
 0x1f0   : > { %v6379_v53 = vadd.bf16 %v6357_v32, %v2012_v41  ;;  %4726 = vmatmul.mubr.msk.bf16.gmra.mrb[104].mxu1 %vm438_vm0, %v6207_v10  ;;  %1737 = vmatprep.mubr.bf16.mxu0 %v8624_v23 }
 0x1f1   : > { %v4770_v54 = vmul.bf16 3216621497, %v6374_v30  ;;  %1604 = vmatprep.mubr.bf16.mxu1 %v8624_v23  ;;  %v2245_v62 = vpack.i.b16 %v2216_v35, %v2216_v35 }
 0x1f2   : > { %v4771_v56 = vmul.bf16 3216621497, %v6379_v53  ;;  %v1090_v60 = vpop.f32.mrb[40].mxu0 }
 0x1f3   : > { %5173 = vpow.bf16 %v4770_v54  ;;  %v1110_v57 = vpop.f32.mrb[0].mxu1  ;;  %v1092_v58 = vpop.f32.mrb[41].mxu0 }
 0x1f4   : > { %5175 = vpow.bf16 %v4771_v56  ;;  %v1112_v6 = vpop.f32.mrb[1].mxu1  ;;  %v1094_v5 = vpop.f32.mrb[42].mxu0 }
 0x1f5   : > { %v2021_v12 = vpack.c.bf16 %v1094_v5, %v1090_v60  ;;  %v1114_v7 = vpop.f32.mrb[2].mxu1  ;;  %v1096_v8 = vpop.f32.mrb[43].mxu0 }
 0x1f6   : > { %v5170_v9 = vpop.eup %5169  ;;  %v2041_v43 = vpack.c.bf16 %v1114_v7, %v1110_v57  ;;  %v2022_v13 = vpack.c.bf16 %v1096_v8, %v1092_v58  ;;  %v1116_v55 = vpop.f32.mrb[3].mxu1  ;;  %v2182_v58 = vrot.slane %v6332_v15, %v8621_v42  ;;  %v2238_v8 = vpack.i.b16 %v2215_v21, %v2215_v21 }
 0x1f7   : > { %v5172_v50 = vpop.eup %5171  ;;  %v3093_v59 = vadd.bf16 1065369472, %v5170_v9  ;;  %v6393_v36 = vadd.bf16 %v6354_v48, %v2021_v12  ;;  %v2042_v2 = vpack.c.bf16 %v1116_v55, %v1112_v6  ;;  %4737 = vmatmul.mubr.msk.bf16.gmra.mrb[148].mxu0 %vm438_vm0, %v6155_v16 }
 0x1f8   : > { %v3094_v25 = vadd.bf16 1065369472, %v5172_v50  ;;  %v6401_v40 = vadd.bf16 %v6354_v48, %v2041_v43  ;;  %v6404_v29 = vadd.bf16 %v6357_v32, %v2022_v13  ;;  %4727 = vmatmul.mubr.msk.bf16.gmra.mrb[108].mxu1 %vm438_vm0, %v6203_v26  ;;  %1747 = vmatprep.mubr.bf16.mxu0 %v8624_v23  ;;  %v6435_v22 = vpack.c.bf16 %v2182_v58, %v2182_v58 }
 0x1f9   : > { %5177 = vrcp.bf16 %v3093_v59  ;;  %v4780_v31 = vmul.bf16 3216621497, %v6393_v36  ;;  %v6411_v34 = vadd.bf16 %v6357_v32, %v2042_v2  ;;  %1840 = vmatprep.mubr.bf16.mxu1 %v8624_v23 }
 0x1fa   : > { %5179 = vrcp.bf16 %v3094_v25  ;;  %v4800_v37 = vmul.bf16 3216621497, %v6401_v40  ;;  %v4781_v38 = vmul.bf16 3216621497, %v6404_v29  ;;  %v1100_v46 = vpop.f32.mrb[44].mxu0  ;;  %8697 = vst [vmem:[#allocation12_spill] sm:$0xff] %v6435_v22 }
 0x1fb   : > { %5181 = vpow.bf16 %v4780_v31  ;;  %v4801_v28 = vmul.bf16 3216621497, %v6411_v34  ;;  %v1120_v27 = vpop.f32.mrb[4].mxu1  ;;  %v1102_v24 = vpop.f32.mrb[45].mxu0 }
 0x1fc   : > { %5183 = vpow.bf16 %v4800_v37  ;;  %v1122_v41 = vpop.f32.mrb[5].mxu1  ;;  %v1104_v54 = vpop.f32.mrb[46].mxu0  ;;  %v8620_v37 = vsub.s32 5, %v6320_v11 }
 0x1fd   : > { %5185 = vpow.bf16 %v4781_v38  ;;  %v2031_v56 = vpack.c.bf16 %v1104_v54, %v1100_v46  ;;  %v1124_v60 = vpop.f32.mrb[6].mxu1  ;;  %v1106_v57 = vpop.f32.mrb[47].mxu0 }
 0x1fe   : > { %v5174_v6 = vpop.eup %5173  ;;  %5187 = vpow.bf16 %v4801_v28  ;;  %v2051_v5 = vpack.c.bf16 %v1124_v60, %v1120_v27  ;;  %v2032_v12 = vpack.c.bf16 %v1106_v57, %v1102_v24  ;;  %v1126_v7 = vpop.f32.mrb[7].mxu1  ;;  %v6447_v24 = vrot.slane %v2238_v8, %v6327_v14 }
 0x1ff   : > { %v5176_v9 = vpop.eup %5175  ;;  %v3103_v43 = vadd.bf16 1065369472, %v5174_v6  ;;  %v6422_v13 = vadd.bf16 %v6354_v48, %v2031_v56  ;;  %v2052_v55 = vpack.c.bf16 %v1126_v7, %v1122_v41  ;;  %4738 = vmatmul.mubr.msk.bf16.gmra.mrb[152].mxu0 %vm438_vm0, %v6177_v17  ;;  %v6450_v56 = vrot.slane %v2245_v62, %v6327_v14 }
 0x200   : > { %v3104_v50 = vadd.bf16 1065369472, %v5176_v9  ;;  %v6427_v59 = vadd.bf16 %v6354_v48, %v2051_v5  ;;  %v6430_v2 = vadd.bf16 %v6357_v32, %v2032_v12  ;;  %4744 = vmatmul.mubr.msk.bf16.vlgmr.msra.gmra.mrb[112].mxu1 %vm438_vm0, %v6022_v52  ;;  %1757 = vmatprep.mubr.bf16.mxu0 %v8624_v23  ;;  %v2186_v7 = vrot.slane %v6332_v15, %v8620_v37 }
 0x201   : > { %5189 = vrcp.bf16 %v3103_v43  ;;  %v4790_v25 = vmul.bf16 3216621497, %v6422_v13  ;;  %v6439_v31 = vadd.bf16 %v6357_v32, %v2052_v55  ;;  %1850 = vmatprep.mubr.bf16.mxu1 %v8624_v23 }
 0x202   : > { %5191 = vrcp.bf16 %v3104_v50  ;;  %v4810_v38 = vmul.bf16 3216621497, %v6427_v59  ;;  %v4791_v46 = vmul.bf16 3216621497, %v6430_v2  ;;  %v1263_v52 = vpop.f32.mrb[48].mxu0 }
 0x203   : > { %5193 = vpow.bf16 %v4790_v25  ;;  %v4811_v21 = vmul.bf16 3216621497, %v6439_v31  ;;  %v1130_v28 = vpop.f32.mrb[8].mxu1  ;;  %v1265_v27 = vpop.f32.mrb[49].mxu0 }
 0x204   : > { %v5178_v35 = vpop.eup %5177  ;;  %5195 = vpow.bf16 %v4810_v38  ;;  %v1132_v41 = vpop.f32.mrb[9].mxu1 }
 0x205   : > { %v1267_v54 = vpop.f32.mrb[50].mxu0  ;;  %v5180_v57 = vpop.eup %5179  ;;  %v3254_v58 = vmul.bf16 1065369472, %v5178_v35  ;;  %5197 = vpow.bf16 %v4791_v46 }
 0x206   : > { %v1134_v6 = vpop.f32.mrb[10].mxu1  ;;  %v2003_v5 = vpack.c.bf16 %v1267_v54, %v1263_v52  ;;  %v1269_v12 = vpop.f32.mrb[51].mxu0  ;;  %v3256_v9 = vmul.bf16 1065369472, %v5180_v57  ;;  %5199 = vpow.bf16 %v4811_v21 }
 0x207   : > { %v5182_v8 = vpop.eup %5181  ;;  %v2061_v43 = vpack.c.bf16 %v1134_v6, %v1130_v28  ;;  %v1136_v55 = vpop.f32.mrb[11].mxu1  ;;  %v2004_v62 = vpack.c.bf16 %v1269_v12, %v1265_v27  ;;  %v3573_v25 = vmul.bf16 %v3254_v58, %v6360_v39  ;;  %4739 = vmatmul.mubr.msk.bf16.gmra.mrb[156].mxu0 %vm438_vm0, %v6175_v51 }
 0x208   : > { %v5184_v50 = vpop.eup %5183  ;;  %v3113_v38 = vadd.bf16 1065369472, %v5182_v8  ;;  %v6459_v35 = vadd.bf16 %v6447_v24, %v2003_v5  ;;  %v2062_v46 = vpack.c.bf16 %v1136_v55, %v1132_v41  ;;  %v3574_v15 = vmul.bf16 %v3256_v9, %v6365_v44  ;;  %4745 = vmatmul.mubr.msk.bf16.gmra.mrb[116].mxu1 %vm438_vm0, %v6014_v47  ;;  %1767 = vmatprep.mubr.bf16.mxu0 %v8624_v23 }
 0x209   : > { %v5186_v52 = vpop.eup %5185  ;;  %v3133_v54 = vadd.bf16 1065369472, %v5184_v50  ;;  %v6465_v21 = vadd.bf16 %v6354_v48, %v2061_v43  ;;  %v6468_v28 = vadd.bf16 %v6450_v56, %v2004_v62  ;;  %v3733_v27 = vunpack.c.l.bf16 %v3573_v25  ;;  %1860 = vmatprep.mubr.bf16.mxu1 %v8624_v23 }
 0x20a   : > { %v5188_v39 = vpop.eup %5187  ;;  %v3743_v41 = vunpack.c.h.bf16 %v3573_v25  ;;  %5201 = vrcp.bf16 %v3113_v38  ;;  %v3114_v57 = vadd.bf16 1065369472, %v5186_v52  ;;  %v3734_v44 = vunpack.c.l.bf16 %v3574_v15  ;;  %v1273_v5 = vpop.f32.mrb[52].mxu0 }
 0x20b   : > { %v3744_v58 = vunpack.c.h.bf16 %v3574_v15  ;;  %5203 = vrcp.bf16 %v3133_v54  ;;  %v3134_v6 = vadd.bf16 1065369472, %v5188_v39  ;;  %v4820_v12 = vmul.bf16 3216621497, %v6465_v21  ;;  %v1140_v47 = vpop.f32.mrb[12].mxu1  ;;  %v6476_v9 = vpop.f32.mrb[53].mxu0 }
 0x20c   : > { %5205 = vrcp.bf16 %v3114_v57  ;;  %v4762_v8 = vmul.bf16 3216621497, %v6459_v35  ;;  %v6478_v43 = vpack.c.bf16 %v2186_v7, %v2186_v7  ;;  %v5190_v55 = vpop.eup %5189  ;;  %v4053_v62 = vadd.f32 %v3743_v41, %v3733_v27  ;;  %v6484_v38 = vpop.f32.mrb[13].mxu1 }
 0x20d   : > { %5207 = vrcp.bf16 %v3134_v6  ;;  %v6481_v50 = vadd.bf16 %v6357_v32, %v2062_v46  ;;  %v4763_v25 = vmul.bf16 3216621497, %v6468_v28  ;;  %v1277_v52 = vpop.f32.mrb[54].mxu0  ;;  %v5192_v15 = vpop.eup %5191  ;;  %v4084_v54 = vadd.f32 %v3744_v58, %v3734_v44 }
 0x20e   : > { %8698 = vst [vmem:[#allocation13_spill] sm:$0xff] %v6478_v43  ;;  %v3274_v39 = vmul.bf16 1065369472, %v5190_v55  ;;  %5209 = vpow.bf16 %v4820_v12  ;;  %v1144_v57 = vpop.f32.mrb[14].mxu1  ;;  %v2013_v37 = vpack.c.bf16 %v1277_v52, %v1273_v5  ;;  %v1279_v42 = vpop.f32.mrb[55].mxu0 }
 0x20f   : > { %v5194_v7 = vpop.eup %5193  ;;  %v3276_v1 = vmul.bf16 1065369472, %v5192_v15  ;;  %5211 = vpow.bf16 %v4762_v8  ;;  %v4821_v27 = vmul.bf16 3216621497, %v6481_v50  ;;  %v2071_v41 = vpack.c.bf16 %v1144_v57, %v1140_v47  ;;  %v1146_v46 = vpop.f32.mrb[15].mxu1  ;;  %4740 = vmatmul.mubr.msk.bf16.gmra.mrb[160].mxu0 %vm438_vm0, %v6193_v3 }
 0x210   : > { %v5196_v6 = vpop.eup %5195  ;;  %v3583_v0 = vmul.bf16 %v3274_v39, %v6374_v30  ;;  %v3123_v60 = vadd.bf16 1065369472, %v5194_v7  ;;  %5213 = vpow.bf16 %v4763_v25  ;;  %v6489_v23 = vadd.bf16 %v6447_v24, %v2013_v37  ;;  %4746 = vmatmul.mubr.msk.bf16.gmra.mrb[120].mxu1 %vm438_vm0, %v6058_v45 }
 0x211   : > { %v5198_v44 = vpop.eup %5197  ;;  %v3584_v58 = vmul.bf16 %v3276_v1, %v6379_v53  ;;  %v3143_v5 = vadd.bf16 1065369472, %v5196_v6  ;;  %5215 = vpow.bf16 %v4821_v27  ;;  %v6495_v12 = vadd.bf16 %v6354_v48, %v2071_v41 }
 0x212   : > { %v8699_v30 = vmov 0   ;;  %v5200_v8 = vpop.eup %5199  ;;  %v3753_v47 = vunpack.c.l.bf16 %v3583_v0  ;;  %v3763_v37 = vunpack.c.h.bf16 %v3583_v0  ;;  %5217 = vrcp.bf16 %v3123_v60  ;;  %v1283_v1 = vpop.f32.mrb[56].mxu0 }
 0x213   : > { %1777 = vmatprep.mubr.bf16.mxu0 %v8699_v30  ;;  %v3124_v55 = vadd.bf16 1065369472, %v5198_v44  ;;  %1870 = vmatprep.mubr.bf16.mxu1 %v8699_v30  ;;  %v3754_v25 = vunpack.c.l.bf16 %v3584_v58  ;;  %v3764_v52 = vunpack.c.h.bf16 %v3584_v58  ;;  %5219 = vrcp.bf16 %v3143_v5  ;;  %v6503_v57 = vpop.f32.mrb[16].mxu1  ;;  %v6505_v7 = vpop.f32.mrb[57].mxu0 }
 0x214   : > { %v3144_v53 = vadd.bf16 1065369472, %v5200_v8  ;;  %v4054_v15 = vadd.f32 %v4053_v62, %v3753_v47  ;;  %v4830_v39 = vmul.bf16 3216621497, %v6495_v12  ;;  %v4772_v45 = vmul.bf16 3216621497, %v6489_v23 }
 0x215   : > { %5221 = vrcp.bf16 %v3124_v55  ;;  %v5202_v0 = vpop.eup %5201  ;;  %v4085_v60 = vadd.f32 %v4084_v54, %v3754_v25  ;;  %v2072_v27 = vpack.c.bf16 %v1146_v46, %v6484_v38  ;;  %v2014_v41 = vpack.c.bf16 %v1279_v42, %v6476_v9  ;;  %v6509_v6 = vpop.f32.mrb[17].mxu1 }
 0x216   : > { %5223 = vrcp.bf16 %v3144_v53  ;;  %v1287_v44 = vpop.f32.mrb[58].mxu0  ;;  %v5204_v62 = vpop.eup %5203  ;;  %v4055_v58 = vadd.f32 %v4054_v15, %v3763_v37  ;;  %v3294_v5 = vmul.bf16 1065369472, %v5202_v0 }
 0x217   : > { %5225 = vpow.bf16 %v4830_v39  ;;  %v1154_v8 = vpop.f32.mrb[18].mxu1  ;;  %v2023_v47 = vpack.c.bf16 %v1287_v44, %v1283_v1  ;;  %v6511_v55 = vpop.f32.mrb[59].mxu0  ;;  %v4086_v11 = vadd.f32 %v4085_v60, %v3764_v52  ;;  %v3334_v43 = vmul.bf16 1065369472, %v5204_v62  ;;  %4741 = vmatmul.mubr.msk.bf16.gmra.mrb[164].mxu0 %vm438_vm0, %v6189_v61 }
 0x218   : > { %v5206_v18 = vpop.eup %5205  ;;  %5227 = vpow.bf16 %v4772_v45  ;;  %v6514_v54 = vadd.bf16 %v6357_v32, %v2072_v27  ;;  %v6516_v38 = vpop.f32.mrb[19].mxu1  ;;  %v3593_v9 = vmul.bf16 %v3294_v5, %v6393_v36  ;;  %v6520_v37 = vadd.bf16 %v6450_v56, %v2014_v41  ;;  %4747 = vmatmul.mubr.msk.bf16.gmra.mrb[124].mxu1 %vm438_vm0, %v6053_v20  ;;  %1787 = vmatprep.mubr.bf16.mxu0 %v8699_v30 }
 0x219   : > { %v5208_v42 = vpop.eup %5207  ;;  %v3296_v46 = vmul.bf16 1065369472, %v5206_v18  ;;  %v2081_v25 = vpack.c.bf16 %v1154_v8, %v6503_v57  ;;  %v6526_v53 = vmul.bf16 %v3334_v43, %v6401_v40  ;;  %v6530_v39 = vadd.bf16 %v6447_v24, %v2023_v47  ;;  %1880 = vmatprep.mubr.bf16.mxu1 %v8699_v30 }
 0x21a   : > { %v5210_v52 = vpop.eup %5209  ;;  %v3336_v1 = vmul.bf16 1065369472, %v5208_v42  ;;  %v4831_v15 = vmul.bf16 3216621497, %v6514_v54  ;;  %v3773_v36 = vunpack.c.l.bf16 %v3593_v9  ;;  %v3783_v45 = vunpack.c.h.bf16 %v3593_v9  ;;  %v6542_v20 = vpop.f32.mrb[60].mxu0 }
 0x21b   : > { %v5212_v18 = vpop.eup %5211  ;;  %v3594_v57 = vmul.bf16 %v3296_v46, %v6404_v29  ;;  %v3153_v0 = vadd.bf16 1065369472, %v5210_v52  ;;  %v6544_v29 = vpop.f32.mrb[20].mxu1  ;;  %v4773_v46 = vmul.bf16 3216621497, %v6520_v37 }
 0x21c   : > { %v5214_v40 = vpop.eup %5213  ;;  %v6540_v27 = vmul.bf16 %v3336_v1, %v6411_v34  ;;  %v3095_v41 = vadd.bf16 1065369472, %v5212_v18  ;;  %v4056_v62 = vadd.f32 %v4055_v58, %v3773_v36  ;;  %v6546_v47 = vpop.f32.mrb[61].mxu0 }
 0x21d   : > { %v5216_v44 = vpop.eup %5215  ;;  %v3774_v5 = vunpack.c.l.bf16 %v3594_v57  ;;  %v3784_v8 = vunpack.c.h.bf16 %v3594_v57  ;;  %5229 = vrcp.bf16 %v3153_v0  ;;  %v6550_v52 = vpop.f32.mrb[21].mxu1  ;;  %v3096_v0 = vadd.bf16 1065369472, %v5214_v40 }
 0x21e   : > { %v5218_v42 = vpop.eup %5217  ;;  %5231 = vrcp.bf16 %v3095_v41  ;;  %v3154_v34 = vadd.bf16 1065369472, %v5216_v44  ;;  %v6552_v1 = vpop.f32.mrb[62].mxu0  ;;  %v4057_v58 = vadd.f32 %v4056_v62, %v3783_v45  ;;  %v6560_v41 = vadd.bf16 %v6354_v48, %v2081_v25 }
 0x21f   : > { %v5220_v18 = vpop.eup %5219  ;;  %v4087_v36 = vadd.f32 %v4086_v11, %v3774_v5  ;;  %v3314_v57 = vmul.bf16 1065369472, %v5218_v42  ;;  %v6554_v60 = vpop.f32.mrb[22].mxu1  ;;  %4742 = vmatmul.mubr.msk.bf16.gmra.mrb[168].mxu0 %vm438_vm0, %v6207_v10 }
 0x220   : > { %v6556_v43 = vpop.f32.mrb[63].mxu0  ;;  %v5222_v22 = vpop.eup %5221  ;;  %v3354_v14 = vmul.bf16 1065369472, %v5220_v18  ;;  %5233 = vrcp.bf16 %v3154_v34  ;;  %v4840_v25 = vmul.bf16 3216621497, %v6560_v41  ;;  %4748 = vmatmul.mubr.msk.bf16.gmra.mrb[128].mxu1 %vm438_vm0, %v6091_v4  ;;  %1797 = vmatprep.mubr.bf16.mxu0 %v8699_v30 }
 0x221   : > { %v6562_v44 = vpop.f32.mrb[23].mxu1  ;;  %v5224_v9 = vpop.eup %5223  ;;  %v4088_v61 = vadd.f32 %v4087_v36, %v3784_v8  ;;  %v3603_v11 = vmul.bf16 %v3314_v57, %v6422_v13  ;;  %v3316_v45 = vmul.bf16 1065369472, %v5222_v22  ;;  %5235 = vrcp.bf16 %v3096_v0  ;;  %1890 = vmatprep.mubr.bf16.mxu1 %v8699_v30 }
 0x222   : > { %v5226_v40 = vpop.eup %5225  ;;  %v6568_v62 = vmul.bf16 %v3354_v14, %v6427_v59  ;;  %v3356_v5 = vmul.bf16 1065369472, %v5224_v9  ;;  %5237 = vpow.bf16 %v4831_v15  ;;  %v6581_v18 = vpop.f32.mrb[64].mxu0 }
 0x223   : > { %v5228_v8 = vpop.eup %5227  ;;  %v3793_v13 = vunpack.c.l.bf16 %v3603_v11  ;;  %v3803_v22 = vunpack.c.h.bf16 %v3603_v11  ;;  %v3604_v42 = vmul.bf16 %v3316_v45, %v6430_v2  ;;  %v3163_v34 = vadd.bf16 1065369472, %v5226_v40  ;;  %v6583_v0 = vpop.f32.mrb[24].mxu1 }
 0x224   : > { %v3833_v14 = vunpack.c.l.bf16 %v6568_v62  ;;  %v6579_v15 = vmul.bf16 %v3356_v5, %v6439_v31  ;;  %v3105_v9 = vadd.bf16 1065369472, %v5228_v8  ;;  %v6585_v2 = vpop.f32.mrb[65].mxu0  ;;  %v4782_v40 = vmul.bf16 3216621497, %v6530_v39  ;;  %v6590_v31 = vpop.f32.mrb[25].mxu1 }
 0x225   : > { %v4058_v4 = vadd.f32 %v4057_v58, %v3793_v13  ;;  %v3794_v36 = vunpack.c.l.bf16 %v3604_v42  ;;  %v3804_v57 = vunpack.c.h.bf16 %v3604_v42  ;;  %5239 = vrcp.bf16 %v3163_v34  ;;  %v6592_v5 = vpop.f32.mrb[66].mxu0  ;;  %v6596_v42 = vpop.f32.mrb[26].mxu1 }
 0x226   : > { %v3834_v11 = vunpack.c.l.bf16 %v6579_v15  ;;  %5241 = vrcp.bf16 %v3105_v9  ;;  %v2082_v13 = vpack.c.bf16 %v6516_v38, %v6509_v6  ;;  %v6598_v34 = vpop.f32.mrb[67].mxu0  ;;  %v2024_v9 = vpack.c.bf16 %v6511_v55, %v6505_v7 }
 0x227   : > { %v4059_v8 = vadd.f32 %v4058_v4, %v3803_v22  ;;  %v4089_v58 = vadd.f32 %v4088_v61, %v3794_v36  ;;  %5243 = vpow.bf16 %v4773_v46  ;;  %v2091_v45 = vpack.c.bf16 %v6554_v60, %v6544_v29  ;;  %v6606_v61 = vpop.f32.mrb[27].mxu1  ;;  %4743 = vmatmul.mubr.msk.bf16.gmra.mrb[172].mxu0 %vm438_vm0, %v6203_v26 }
 0x228   : > { %v5230_v59 = vpop.eup %5229  ;;  %5245 = vpow.bf16 %v4840_v25  ;;  %v2033_v22 = vpack.c.bf16 %v6552_v1, %v6542_v20  ;;  %v8700_v6 = vunpack.c.l.bf16 %v6526_v53  ;;  %v6613_v7 = vadd.bf16 %v6357_v32, %v2082_v13  ;;  %4749 = vmatmul.mubr.msk.bf16.gmra.mrb[132].mxu1 %vm438_vm0, %v6083_v63 }
 0x229   : > { %v5232_v46 = vpop.eup %5231  ;;  %v4090_v4 = vadd.f32 %v4089_v58, %v3804_v57  ;;  %v3374_v36 = vmul.bf16 1065369472, %v5230_v59  ;;  %5247 = vpow.bf16 %v4782_v40  ;;  %v6616_v55 = vadd.bf16 %v6450_v56, %v2024_v9  ;;  %1900 = vmatprep.mubr.bf16.mxu1 %v8699_v30 }
 0x22a   : > { %v4060_v38 = vadd.f32 %v4059_v8, %v8700_v6  ;;  %v3258_v25 = vmul.bf16 1065369472, %v5232_v46  ;;  %v6619_v60 = vadd.bf16 %v6354_v48, %v2091_v45  ;;  %v8702_v29 = vunpack.c.h.bf16 %v6526_v53 }
 0x22b   : > { %8701 = vst [vmem:[#allocation14_spill] sm:$0xff] %v6616_v55  ;;  %v5234_v20 = vpop.eup %5233  ;;  %v8703_v59 = vunpack.c.l.bf16 %v6540_v27  ;;  %v3633_v40 = vmul.bf16 %v3374_v36, %v6465_v21  ;;  %v6629_v8 = vadd.bf16 %v6447_v24, %v2033_v22  ;;  %v4841_v63 = vmul.bf16 3216621497, %v6613_v7  ;;  %v6637_v36 = vpop.f32.mrb[28].mxu1 }
 0x22c   : > { %v4061_v1 = vadd.f32 %v4060_v38, %v8702_v29  ;;  %v5236_v58 = vpop.eup %5235  ;;  %v3575_v45 = vmul.bf16 %v3258_v25, %v6459_v35  ;;  %v3376_v13 = vmul.bf16 1065369472, %v5234_v20  ;;  %v4783_v9 = vmul.bf16 3216621497, %v6616_v55  ;;  %v6639_v22 = vpop.f32.mrb[68].mxu0 }
 0x22d   : > { %v4091_v57 = vadd.f32 %v4090_v4, %v8703_v59  ;;  %v5238_v53 = vpop.eup %5237  ;;  %v8704_v6 = vunpack.c.h.bf16 %v6540_v27  ;;  %v3853_v4 = vunpack.c.l.bf16 %v3633_v40  ;;  %v3863_v21 = vunpack.c.h.bf16 %v3633_v40  ;;  %v6642_v20 = vpop.f32.mrb[29].mxu1 }
 0x22e   : > { %v4062_v46 = vadd.f32 %v4061_v1, %v3833_v14  ;;  %v3735_v29 = vunpack.c.l.bf16 %v3575_v45  ;;  %v3745_v59 = vunpack.c.h.bf16 %v3575_v45  ;;  %v3634_v35 = vmul.bf16 %v3376_v13, %v6481_v50  ;;  %v6644_v26 = vpop.f32.mrb[69].mxu0  ;;  %v6648_v40 = vpop.f32.mrb[30].mxu1 }
 0x22f   : > { %v4092_v38 = vadd.f32 %v4091_v57, %v8704_v6  ;;  %v3260_v25 = vmul.bf16 1065369472, %v5236_v58  ;;  %v8705_v14 = vunpack.c.h.bf16 %v6568_v62  ;;  %v3164_v57 = vadd.bf16 1065369472, %v5238_v53  ;;  %v6650_v6 = vpop.f32.mrb[70].mxu0  ;;  %v6653_v58 = vpop.f32.mrb[31].mxu1 }
 0x230   : > { %5249 = vpow.bf16 %v4841_v63  ;;  %v5240_v10 = vpop.eup %5239  ;;  %v4115_v3 = vadd.f32 %v3745_v59, %v3735_v29  ;;  %v3854_v45 = vunpack.c.l.bf16 %v3634_v35  ;;  %v3864_v51 = vunpack.c.h.bf16 %v3634_v35  ;;  %v6655_v13 = vpop.f32.mrb[71].mxu0  ;;  %4750 = vmatmul.mubr.msk.bf16.gmra.mrb[136].mxu1 %vm438_vm0, %v6130_v33 }
 0x231   : > { %v4063_v1 = vadd.f32 %v4062_v46, %v8705_v14  ;;  %v4093_v27 = vadd.f32 %v4092_v38, %v3834_v11  ;;  %v3576_v50 = vmul.bf16 %v3260_v25, %v6468_v28  ;;  %v5242_v17 = vpop.eup %5241  ;;  %v8706_v62 = vunpack.c.h.bf16 %v6579_v15  ;;  %1910 = vmatprep.mubr.bf16.mxu1 %v8699_v30 }
 0x232   : > { %v3394_v63 = vmul.bf16 1065369472, %v5240_v10  ;;  %5251 = vrcp.bf16 %v3164_v57  ;;  %v5244_v46 = vpop.eup %5243  ;;  %v3278_v55 = vmul.bf16 1065369472, %v5242_v17  ;;  %v4850_v17 = vmul.bf16 3216621497, %v6619_v60 }
 0x233   : > { %v4094_v11 = vadd.f32 %v4093_v27, %v8706_v62  ;;  %v4064_v53 = vadd.f32 %v4063_v1, %v3853_v4  ;;  %v3736_v38 = vunpack.c.l.bf16 %v3576_v50  ;;  %v3746_v14 = vunpack.c.h.bf16 %v3576_v50  ;;  %v5246_v28 = vpop.eup %5245  ;;  %v6671_v57 = vpop.f32.mrb[32].mxu1 }
 0x234   : > { %5253 = vpow.bf16 %v4783_v9  ;;  %v3643_v35 = vmul.bf16 %v3394_v63, %v6495_v12  ;;  %v3106_v25 = vadd.bf16 1065369472, %v5244_v46  ;;  %v5248_v15 = vpop.eup %5247  ;;  %v3585_v10 = vmul.bf16 %v3278_v55, %v6489_v23  ;;  %v6667_v9 = vpop.f32.mrb[72].mxu0 }
 0x235   : > { %v4065_v29 = vadd.f32 %v4064_v53, %v3863_v21  ;;  %v4095_v59 = vadd.f32 %v4094_v11, %v3854_v45  ;;  %v6663_v4 = vadd.f32 %v3746_v14, %v3736_v38  ;;  %v3173_v1 = vadd.bf16 1065369472, %v5246_v28  ;;  %v6673_v12 = vpop.f32.mrb[73].mxu0  ;;  %v6675_v11 = vpop.f32.mrb[33].mxu1 }
 0x236   : > { %v3873_v33 = vunpack.c.l.bf16 %v3643_v35  ;;  %v3883_v21 = vunpack.c.h.bf16 %v3643_v35  ;;  %5255 = vrcp.bf16 %v3106_v25  ;;  %v3755_v45 = vunpack.c.l.bf16 %v3585_v10  ;;  %v6677_v23 = vpop.f32.mrb[74].mxu0  ;;  %v6682_v63 = vpop.f32.mrb[34].mxu1 }
 0x237   : > { %v6669_v27 = vadd.f32 %v4095_v59, %v3864_v51  ;;  %v3765_v50 = vunpack.c.h.bf16 %v3585_v10  ;;  %5257 = vrcp.bf16 %v3173_v1  ;;  %v3115_v62 = vadd.bf16 1065369472, %v5248_v15  ;;  %v6684_v46 = vpop.f32.mrb[75].mxu0  ;;  %v6690_v59 = vpop.f32.mrb[35].mxu1 }
 0x238   : > { %v4066_v55 = vadd.f32 %v4065_v29, %v3873_v33  ;;  %5259 = vpow.bf16 %v4850_v17  ;;  %v4792_v51 = vmul.bf16 3216621497, %v6629_v8  ;;  %v2092_v53 = vpack.c.bf16 %v6562_v44, %v6550_v52  ;;  %4751 = vmatmul.mubr.msk.bf16.gmra.mrb[140].mxu1 %vm438_vm0, %v6125_v49 }
 0x239   : > { %v4116_v38 = vadd.f32 %v4115_v3, %v3755_v45  ;;  %5261 = vrcp.bf16 %v3115_v62  ;;  %v2034_v14 = vpack.c.bf16 %v6556_v43, %v6546_v47  ;;  %v2101_v28 = vpack.c.bf16 %v6596_v42, %v6583_v0  ;;  %1920 = vmatprep.mubr.bf16.mxu1 %v8699_v30 }
 0x23a   : > { %v6692_v29 = vadd.f32 %v4066_v55, %v3883_v21  ;;  %5263 = vpow.bf16 %v4792_v51  ;;  %v6695_v35 = vadd.bf16 %v6357_v32, %v2092_v53  ;;  %v2043_v52 = vpack.c.bf16 %v6592_v5, %v6581_v18 }
 0x23b   : > { %v5250_v44 = vpop.eup %5249  ;;  %v6699_v3 = vadd.f32 %v4116_v38, %v3765_v50  ;;  %v6702_v25 = vadd.bf16 %v6450_v56, %v2034_v14  ;;  %v6705_v43 = vadd.bf16 %v6354_v48, %v2101_v28  ;;  %v2102_v47 = vpack.c.bf16 %v6606_v61, %v6590_v31  ;;  %v6725_v61 = vpop.f32.mrb[76].mxu0 }
 0x23c   : > { %v3174_v0 = vadd.bf16 1065369472, %v5250_v44  ;;  %v4851_v42 = vmul.bf16 3216621497, %v6695_v35  ;;  %v6713_v18 = vadd.bf16 %v6447_v24, %v2043_v52  ;;  %v2044_v5 = vpack.c.bf16 %v6598_v34, %v6585_v2  ;;  %v6731_v21 = vpop.f32.mrb[36].mxu1  ;;  %v6733_v45 = vpop.f32.mrb[77].mxu0 }
 0x23d   : > { %v5252_v15 = vpop.eup %5251  ;;  %v4793_v10 = vmul.bf16 3216621497, %v6702_v25  ;;  %v4860_v1 = vmul.bf16 3216621497, %v6705_v43  ;;  %v6721_v31 = vadd.bf16 %v6357_v32, %v2102_v47  ;;  %v2111_v49 = vpack.c.bf16 %v6648_v40, %v6637_v36  ;;  %v6739_v40 = vpop.f32.mrb[37].mxu1 }
 0x23e   : > { %v3396_v33 = vmul.bf16 1065369472, %v5252_v15  ;;  %5265 = vrcp.bf16 %v3174_v0  ;;  %v4802_v2 = vmul.bf16 3216621497, %v6713_v18  ;;  %v6729_v34 = vadd.bf16 %v6450_v56, %v2044_v5  ;;  %v6741_v55 = vpop.f32.mrb[78].mxu0  ;;  %v6747_v14 = vpop.f32.mrb[38].mxu1 }
 0x23f   : > { %v5254_v17 = vpop.eup %5253  ;;  %5267 = vpow.bf16 %v4851_v42  ;;  %v4861_v62 = vmul.bf16 3216621497, %v6721_v31  ;;  %v6737_v36 = vadd.bf16 %v6354_v48, %v2111_v49  ;;  %v2053_v38 = vpack.c.bf16 %v6650_v6, %v6639_v22  ;;  %v6749_v28 = vpop.f32.mrb[79].mxu0 }
 0x240   : > { %v3116_v50 = vadd.bf16 1065369472, %v5254_v17  ;;  %v3644_v51 = vmul.bf16 %v3396_v33, %v6514_v54  ;;  %5269 = vpow.bf16 %v4793_v10  ;;  %v4803_v53 = vmul.bf16 3216621497, %v6729_v34  ;;  %v6756_v0 = vpop.f32.mrb[39].mxu1  ;;  %4752 = vmatmul.mubr.msk.bf16.gmra.mrb[144].mxu1 %vm438_vm0, %v6160_v19 }
 0x241   : > { %v5256_v52 = vpop.eup %5255  ;;  %v4870_v44 = vmul.bf16 3216621497, %v6737_v36  ;;  %v2112_v47 = vpack.c.bf16 %v6653_v58, %v6642_v20  ;;  %v2054_v54 = vpack.c.bf16 %v6655_v13, %v6644_v26  ;;  %v6759_v49 = vadd.bf16 %v6447_v24, %v2053_v38  ;;  %1930 = vmatprep.mubr.bf16.mxu1 %v8699_v30 }
 0x242   : > { %5271 = vrcp.bf16 %v3116_v50  ;;  %v5258_v42 = vpop.eup %5257  ;;  %v3874_v5 = vunpack.c.l.bf16 %v3644_v51  ;;  %v3884_v15 = vunpack.c.h.bf16 %v3644_v51  ;;  %v3280_v22 = vmul.bf16 1065369472, %v5256_v52  ;;  %v6771_v51 = vpop.f32.mrb[80].mxu0 }
 0x243   : > { %5273 = vpow.bf16 %v4860_v1  ;;  %v5260_v6 = vpop.eup %5259  ;;  %v3414_v10 = vmul.bf16 1065369472, %v5258_v42  ;;  %v6762_v17 = vadd.bf16 %v6357_v32, %v2112_v47  ;;  %v4812_v50 = vmul.bf16 3216621497, %v6759_v49 }
 0x244   : > { %5275 = vpow.bf16 %v4802_v2  ;;  %v5262_v26 = vpop.eup %5261  ;;  %v4097_v20 = vadd.f32 %v6669_v27, %v3874_v5  ;;  %v3586_v58 = vmul.bf16 %v3280_v22, %v6520_v37  ;;  %v3183_v13 = vadd.bf16 1065369472, %v5260_v6  ;;  %v6773_v27 = vpop.f32.mrb[40].mxu1 }
 0x245   : > { %5277 = vpow.bf16 %v4861_v62  ;;  %v5264_v1 = vpop.eup %5263  ;;  %v3653_v33 = vmul.bf16 %v3414_v10, %v6560_v41  ;;  %v3298_v2 = vmul.bf16 1065369472, %v5262_v26  ;;  %v6775_v37 = vpop.f32.mrb[81].mxu0  ;;  %v6785_v6 = vadd.bf16 %v6450_v56, %v2054_v54 }
 0x246   : > { %5279 = vpow.bf16 %v4803_v53  ;;  %v4098_v38 = vadd.f32 %v4097_v20, %v3884_v15  ;;  %v3756_v19 = vunpack.c.l.bf16 %v3586_v58  ;;  %v3766_v52 = vunpack.c.h.bf16 %v3586_v58  ;;  %8707 = vst [vmem:[#allocation15_spill] sm:$0xff] %v6775_v37  ;;  %v6778_v41 = vpop.f32.mrb[41].mxu1  ;;  %v6780_v53 = vpop.f32.mrb[82].mxu0 }
 0x247   : > { %5281 = vrcp.bf16 %v3183_v13  ;;  %v3893_v62 = vunpack.c.l.bf16 %v3653_v33  ;;  %v3903_v47 = vunpack.c.h.bf16 %v3653_v33  ;;  %v3595_v42 = vmul.bf16 %v3298_v2, %v6530_v39  ;;  %v6787_v10 = vpop.f32.mrb[42].mxu1  ;;  %v6789_v26 = vpop.f32.mrb[83].mxu0 }
 0x248   : > { %v3125_v5 = vadd.bf16 1065369472, %v5264_v1  ;;  %v4147_v22 = vadd.f32 %v6663_v4, %v3756_v19  ;;  %5283 = vpow.bf16 %v4870_v44  ;;  %v4871_v15 = vmul.bf16 3216621497, %v6762_v17  ;;  %8708 = vst [vmem:[#allocation16_spill] sm:$0xff] %v6789_v26  ;;  %v6792_v1 = vpop.f32.mrb[43].mxu1  ;;  %4753 = vmatmul.mubr.msk.bf16.gmra.mrb[148].mxu1 %vm438_vm0, %v6155_v16 }
 0x249   : > { %v5266_v20 = vpop.eup %5265  ;;  %v4068_v39 = vadd.f32 %v6692_v29, %v3893_v62  ;;  %v3775_v58 = vunpack.c.l.bf16 %v3595_v42  ;;  %v3785_v13 = vunpack.c.h.bf16 %v3595_v42  ;;  %v4813_v2 = vmul.bf16 3216621497, %v6785_v6  ;;  %1940 = vmatprep.mubr.bf16.mxu1 %v8699_v30 }
 0x24a   : > { %5285 = vrcp.bf16 %v3125_v5  ;;  %v5268_v33 = vpop.eup %5267  ;;  %v4148_v4 = vadd.f32 %v4147_v22, %v3766_v52  ;;  %v3416_v44 = vmul.bf16 1065369472, %v5266_v20  ;;  %v6808_v22 = vpop.f32.mrb[84].mxu0 }
 0x24b   : > { %5287 = vpow.bf16 %v4812_v50  ;;  %v5270_v54 = vpop.eup %5269  ;;  %v6795_v19 = vadd.f32 %v4068_v39, %v3903_v47  ;;  %v4118_v37 = vadd.f32 %v6699_v3, %v3775_v58  ;;  %v3184_v26 = vadd.bf16 1065369472, %v5268_v33  ;;  %v6810_v39 = vpop.f32.mrb[44].mxu1  ;;  %v8710_v58 = vld [vmem:[#allocation14_spill] sm:$0xff] }
 0x24c   : > { %5289 = vpow.bf16 %v4871_v15  ;;  %v3654_v62 = vmul.bf16 %v3416_v44, %v6613_v7  ;;  %v3126_v42 = vadd.bf16 1065369472, %v5270_v54  ;;  %v2121_v50 = vpack.c.bf16 %v6682_v63, %v6671_v57  ;;  %v6812_v57 = vpop.f32.mrb[85].mxu0 }
 0x24d   : > { %v5272_v29 = vpop.eup %5271  ;;  %5291 = vpow.bf16 %v4813_v2  ;;  %v6804_v47 = vadd.f32 %v4118_v37, %v3785_v13  ;;  %v2063_v3 = vpack.c.bf16 %v6677_v23, %v6667_v9  ;;  %8709 = vst [vmem:[#allocation17_spill] sm:$0xff] %v6812_v57  ;;  %v6821_v23 = vpop.f32.mrb[45].mxu1 }
 0x24e   : > { %v5274_v52 = vpop.eup %5273  ;;  %v3300_v5 = vmul.bf16 1065369472, %v5272_v29  ;;  %5293 = vrcp.bf16 %v3184_v26  ;;  %v3894_v15 = vunpack.c.l.bf16 %v3654_v62  ;;  %v3904_v7 = vunpack.c.h.bf16 %v3654_v62  ;;  %v6823_v33 = vpop.f32.mrb[86].mxu0 }
 0x24f   : > { %v5276_v16 = vpop.eup %5275  ;;  %5295 = vrcp.bf16 %v3126_v42  ;;  %v3193_v20 = vadd.bf16 1065369472, %v5274_v52  ;;  %v6816_v26 = vadd.bf16 %v6354_v48, %v2121_v50  ;;  %v6819_v9 = vadd.bf16 %v6447_v24, %v2063_v3  ;;  %v6827_v62 = vpop.f32.mrb[46].mxu1 }
 0x250   : > { %v5278_v63 = vpop.eup %5277  ;;  %v3596_v37 = vmul.bf16 %v3300_v5, %v8710_v58  ;;  %v3135_v13 = vadd.bf16 1065369472, %v5276_v16  ;;  %v4099_v2 = vadd.f32 %v4098_v38, %v3894_v15  ;;  %v2122_v29 = vpack.c.bf16 %v6690_v59, %v6675_v11  ;;  %v6829_v42 = vpop.f32.mrb[87].mxu0 }
 0x251   : > { %v5280_v44 = vpop.eup %5279  ;;  %5297 = vrcp.bf16 %v3193_v20  ;;  %v3194_v54 = vadd.bf16 1065369472, %v5278_v63  ;;  %v6831_v16 = vpop.f32.mrb[47].mxu1  ;;  %v4880_v38 = vmul.bf16 3216621497, %v6816_v26  ;;  %v8711_v63 = vld [vmem:[#allocation4_spill] sm:$0xff] }
 0x252   : > { %v5282_v50 = vpop.eup %5281  ;;  %v3776_v52 = vunpack.c.l.bf16 %v3596_v37  ;;  %v3786_v5 = vunpack.c.h.bf16 %v3596_v37  ;;  %5299 = vrcp.bf16 %v3135_v13  ;;  %v3136_v3 = vadd.bf16 1065369472, %v5280_v44  ;;  %4754 = vmatmul.mubr.msk.bf16.gmra.mrb[152].mxu1 %vm438_vm0, %v8711_v63 }
 0x253   : > { %v6833_v58 = vadd.f32 %v4099_v2, %v3904_v7  ;;  %v3434_v57 = vmul.bf16 1065369472, %v5282_v50  ;;  %5301 = vrcp.bf16 %v3194_v54  ;;  %v5284_v15 = vpop.eup %5283  ;;  %v4822_v11 = vmul.bf16 3216621497, %v6819_v9  ;;  %1950 = vmatprep.mubr.bf16.mxu1 %v8699_v30  ;;  %v6849_v50 = vpop.f32.mrb[88].mxu0 }
 0x254   : > { %v4149_v20 = vadd.f32 %v4148_v4, %v3776_v52  ;;  %5303 = vrcp.bf16 %v3136_v3  ;;  %v6838_v59 = vadd.bf16 %v6357_v32, %v2122_v29  ;;  %v3203_v7 = vadd.bf16 1065369472, %v5284_v15  ;;  %8712 = vst [vmem:[#allocation14_spill] sm:$0xff] %v6849_v50 }
 0x255   : > { %v5286_v37 = vpop.eup %5285  ;;  %v3663_v13 = vmul.bf16 %v3434_v57, %v6619_v60  ;;  %5305 = vpow.bf16 %v4880_v38  ;;  %v2064_v44 = vpack.c.bf16 %v6684_v46, %v6673_v12  ;;  %v6851_v57 = vpop.f32.mrb[48].mxu1 }
 0x256   : > { %v5288_v4 = vpop.eup %5287  ;;  %v6846_v2 = vadd.f32 %v4149_v20, %v3786_v5  ;;  %v3318_v54 = vmul.bf16 1065369472, %v5286_v37  ;;  %5307 = vpow.bf16 %v4822_v11  ;;  %v4881_v29 = vmul.bf16 3216621497, %v6838_v59  ;;  %8713 = vst [vmem:[#allocation4_spill] sm:$0xff] %v6851_v57  ;;  %v6853_v38 = vpop.f32.mrb[89].mxu0 }
 0x257   : > { %v5290_v52 = vpop.eup %5289  ;;  %v3913_v3 = vunpack.c.l.bf16 %v3663_v13  ;;  %v3923_v63 = vunpack.c.h.bf16 %v3663_v13  ;;  %5309 = vrcp.bf16 %v3203_v7  ;;  %v3145_v60 = vadd.bf16 1065369472, %v5288_v4  ;;  %8714 = vst [vmem:[#allocation18_spill] sm:$0xff] %v6853_v38  ;;  %v6859_v20 = vpop.f32.mrb[49].mxu1 }
 0x258   : > { %v5292_v12 = vpop.eup %5291  ;;  %v3605_v46 = vmul.bf16 %v3318_v54, %v6629_v8  ;;  %v3204_v5 = vadd.bf16 1065369472, %v5290_v52  ;;  %5311 = vpow.bf16 %v4881_v29  ;;  %v6857_v15 = vadd.bf16 %v6450_v56, %v2064_v44  ;;  %8716 = vst [vmem:[#allocation20_spill] sm:$0xff] %v6859_v20  ;;  %v6861_v11 = vpop.f32.mrb[90].mxu0 }
 0x259   : > { %8717 = vst [vmem:[#allocation21_spill] sm:$0xff] %v6861_v11  ;;  %v5294_v37 = vpop.eup %5293  ;;  %v4070_v13 = vadd.f32 %v6795_v19, %v3913_v3  ;;  %5313 = vrcp.bf16 %v3145_v60  ;;  %v3146_v7 = vadd.bf16 1065369472, %v5292_v12  ;;  %v2131_v4 = vpack.c.bf16 %v6747_v14, %v6731_v21  ;;  %v6866_v38 = vpop.f32.mrb[50].mxu1 }
 0x25a   : > { %8715 = vst [vmem:[#allocation19_spill] sm:$0xff] %v6857_v15  ;;  %8718 = vst [vmem:[#allocation22_spill] sm:$0xff] %v6866_v38  ;;  %v6868_v8 = vpop.f32.mrb[91].mxu0  ;;  %v5296_v54 = vpop.eup %5295  ;;  %v3795_v29 = vunpack.c.l.bf16 %v3605_v46  ;;  %v3805_v44 = vunpack.c.h.bf16 %v3605_v46  ;;  %v3436_v52 = vmul.bf16 1065369472, %v5294_v37  ;;  %5315 = vrcp.bf16 %v3204_v5  ;;  %v8721_v46 = vld [vmem:[#allocation3_spill] sm:$0xff] }
 0x25b   : > { %8719 = vst [vmem:[#allocation23_spill] sm:$0xff] %v6868_v8  ;;  %v6870_v20 = vpop.f32.mrb[51].mxu1  ;;  %v4071_v57 = vadd.f32 %v4070_v13, %v3923_v63  ;;  %v3320_v11 = vmul.bf16 1065369472, %v5296_v54  ;;  %5317 = vrcp.bf16 %v3146_v7  ;;  %v4823_v19 = vmul.bf16 3216621497, %v6857_v15  ;;  %4755 = vmatmul.mubr.msk.bf16.gmra.mrb[156].mxu1 %vm438_vm0, %v8721_v46 }
 0x25c   : > { %8720 = vst [vmem:[#allocation24_spill] sm:$0xff] %v6870_v20  ;;  %v5298_v3 = vpop.eup %5297  ;;  %v4120_v60 = vadd.f32 %v6804_v47, %v3795_v29  ;;  %v3664_v21 = vmul.bf16 %v3436_v52, %v6695_v35  ;;  %v6876_v14 = vadd.bf16 %v6354_v48, %v2131_v4  ;;  %1960 = vmatprep.mubr.bf16.mxu1 %v8699_v30  ;;  %v6886_v29 = vpop.f32.mrb[92].mxu0  ;;  %v8729_v15 = vld [vmem:[#allocation6_spill] sm:$0xff] }
 0x25d   : > { %v5300_v5 = vpop.eup %5299  ;;  %v3606_v63 = vmul.bf16 %v3320_v11, %v6702_v25  ;;  %v3454_v37 = vmul.bf16 1065369472, %v5298_v3  ;;  %5319 = vpow.bf16 %v4823_v19  ;;  %8722 = vst [vmem:[#allocation3_spill] sm:$0xff] %v6886_v29  ;;  %v6889_v11 = vpop.f32.mrb[52].mxu1 }
 0x25e   : > { %v5302_v35 = vpop.eup %5301  ;;  %v4121_v47 = vadd.f32 %v4120_v60, %v3805_v44  ;;  %v3914_v7 = vunpack.c.l.bf16 %v3664_v21  ;;  %v3924_v4 = vunpack.c.h.bf16 %v3664_v21  ;;  %v3338_v54 = vmul.bf16 1065369472, %v5300_v5  ;;  %8723 = vst [vmem:[#allocation25_spill] sm:$0xff] %v6889_v11  ;;  %v6891_v19 = vpop.f32.mrb[93].mxu0 }
 0x25f   : > { %v5304_v52 = vpop.eup %5303  ;;  %v3796_v12 = vunpack.c.l.bf16 %v3606_v63  ;;  %v3806_v46 = vunpack.c.h.bf16 %v3606_v63  ;;  %v3673_v20 = vmul.bf16 %v3454_v37, %v6705_v43  ;;  %v3456_v25 = vmul.bf16 1065369472, %v5302_v35  ;;  %8724 = vst [vmem:[#allocation26_spill] sm:$0xff] %v6891_v19  ;;  %v6896_v5 = vpop.f32.mrb[53].mxu1 }
 0x260   : > { %v5306_v3 = vpop.eup %5305  ;;  %v4101_v13 = vadd.f32 %v6833_v58, %v3914_v7  ;;  %v3615_v44 = vmul.bf16 %v3338_v54, %v6713_v18  ;;  %v3340_v60 = vmul.bf16 1065369472, %v5304_v52  ;;  %8725 = vst [vmem:[#allocation27_spill] sm:$0xff] %v6896_v5  ;;  %v6898_v29 = vpop.f32.mrb[94].mxu0 }
 0x261   : > { %8726 = vst [vmem:[#allocation28_spill] sm:$0xff] %v6898_v29  ;;  %v6900_v63 = vpop.eup %5307  ;;  %v4151_v43 = vadd.f32 %v6846_v2, %v3796_v12  ;;  %v3933_v37 = vunpack.c.l.bf16 %v3673_v20  ;;  %v3943_v35 = vunpack.c.h.bf16 %v3673_v20  ;;  %v3674_v19 = vmul.bf16 %v3456_v25, %v6721_v31  ;;  %v6904_v11 = vpop.f32.mrb[54].mxu1 }
 0x262   : > { %8727 = vst [vmem:[#allocation29_spill] sm:$0xff] %v6904_v11  ;;  %v6906_v58 = vpop.f32.mrb[95].mxu0  ;;  %v5310_v18 = vpop.eup %5309  ;;  %v4102_v7 = vadd.f32 %v4101_v13, %v3924_v4  ;;  %v3815_v54 = vunpack.c.l.bf16 %v3615_v44  ;;  %v3825_v52 = vunpack.c.h.bf16 %v3615_v44  ;;  %v3616_v21 = vmul.bf16 %v3340_v60, %v6729_v34 }
 0x263   : > { %8728 = vst [vmem:[#allocation30_spill] sm:$0xff] %v6906_v58  ;;  %v6909_v5 = vpop.f32.mrb[55].mxu1  ;;  %v5312_v29 = vpop.eup %5311  ;;  %v4152_v8 = vadd.f32 %v4151_v43, %v3806_v46  ;;  %v4072_v38 = vadd.f32 %v4071_v57, %v3933_v37  ;;  %v3934_v2 = vunpack.c.l.bf16 %v3674_v19  ;;  %v3944_v12 = vunpack.c.h.bf16 %v3674_v19  ;;  %4756 = vmatmul.mubr.msk.bf16.gmra.mrb[160].mxu1 %vm438_vm0, %v8729_v15 }
 0x264   : > { %v5314_v20 = vpop.eup %5313  ;;  %v4122_v50 = vadd.f32 %v4121_v47, %v3815_v54  ;;  %v3816_v31 = vunpack.c.l.bf16 %v3616_v21  ;;  %v3826_v25 = vunpack.c.h.bf16 %v3616_v21  ;;  %v3474_v11 = vmul.bf16 1065369472, %v5310_v18  ;;  %1970 = vmatprep.mubr.bf16.mxu1 %v8699_v30  ;;  %v6915_v47 = vpop.f32.mrb[96].mxu0 }
 0x265   : > { %v5316_v13 = vpop.eup %5315  ;;  %v4073_v4 = vadd.f32 %v4072_v38, %v3943_v35  ;;  %v4103_v44 = vadd.f32 %v4102_v7, %v3934_v2  ;;  %v3358_v58 = vmul.bf16 1065369472, %v5314_v20  ;;  %v3213_v34 = vadd.bf16 1065369472, %v5306_v3  ;;  %v6918_v15 = vpop.f32.mrb[56].mxu1 }
 0x266   : > { %v5318_v60 = vpop.eup %5317  ;;  %v4123_v46 = vadd.f32 %v4122_v50, %v3825_v52  ;;  %v4153_v57 = vadd.f32 %v4152_v8, %v3816_v31  ;;  %v3683_v19 = vmul.bf16 %v3474_v11, %v6737_v36  ;;  %v3476_v43 = vmul.bf16 1065369472, %v5316_v13  ;;  %v6920_v38 = vpop.f32.mrb[97].mxu0 }
 0x267   : > { %v4104_v21 = vadd.f32 %v4103_v44, %v3944_v12  ;;  %v3625_v37 = vmul.bf16 %v3358_v58, %v6759_v49  ;;  %v3360_v18 = vmul.bf16 1065369472, %v5318_v60  ;;  %5321 = vrcp.bf16 %v3213_v34  ;;  %v6923_v8 = vpop.f32.mrb[57].mxu1  ;;  %v6925_v36 = vpop.f32.mrb[98].mxu0 }
 0x268   : > { %v5320_v3 = vpop.eup %5319  ;;  %v4154_v35 = vadd.f32 %v4153_v57, %v3826_v25  ;;  %v3953_v7 = vunpack.c.l.bf16 %v3683_v19  ;;  %v3963_v54 = vunpack.c.h.bf16 %v3683_v19  ;;  %v3684_v50 = vmul.bf16 %v3476_v43, %v6762_v17  ;;  %v6929_v2 = vpop.f32.mrb[58].mxu1 }
 0x269   : > { %v3835_v11 = vunpack.c.l.bf16 %v3625_v37  ;;  %v3845_v52 = vunpack.c.h.bf16 %v3625_v37  ;;  %v3626_v49 = vmul.bf16 %v3360_v18, %v6785_v6  ;;  %v3155_v58 = vadd.bf16 1065369472, %v6900_v63  ;;  %v6931_v12 = vpop.f32.mrb[99].mxu0  ;;  %v6933_v44 = vpop.f32.mrb[59].mxu1  ;;  %v8730_v63 = vld [vmem:[#allocation5_spill] sm:$0xff] }
 0x26a   : > { %v4074_v20 = vadd.f32 %v4073_v4, %v3953_v7  ;;  %v3954_v31 = vunpack.c.l.bf16 %v3684_v50  ;;  %v3964_v25 = vunpack.c.h.bf16 %v3684_v50  ;;  %v3214_v13 = vadd.bf16 1065369472, %v5312_v29  ;;  %v6960_v7 = vpop.f32.mrb[100].mxu0 }
 0x26b   : > { %v4124_v17 = vadd.f32 %v4123_v46, %v3835_v11  ;;  %v3836_v34 = vunpack.c.l.bf16 %v3626_v49  ;;  %v3846_v60 = vunpack.c.h.bf16 %v3626_v49  ;;  %5323 = vrcp.bf16 %v3155_v58  ;;  %4757 = vmatmul.mubr.msk.bf16.gmra.mrb[164].mxu1 %vm438_vm0, %v8730_v63  ;;  %v6969_v11 = vpop.f32.mrb[60].mxu1  ;;  %v8735_v49 = vld [vmem:[#allocation16_spill] sm:$0xff] }
 0x26c   : > { %v6935_v57 = vadd.f32 %v4074_v20, %v3963_v54  ;;  %v4105_v19 = vadd.f32 %v4104_v21, %v3954_v31  ;;  %5325 = vrcp.bf16 %v3214_v13  ;;  %v3156_v6 = vadd.bf16 1065369472, %v5320_v3  ;;  %1980 = vmatprep.mubr.bf16.mxu1 %v8699_v30  ;;  %v6981_v20 = vpop.f32.mrb[61].mxu1 }
 0x26d   : > { %v6939_v43 = vadd.f32 %v4124_v17, %v3845_v52  ;;  %v4155_v4 = vadd.f32 %v4154_v35, %v3836_v34  ;;  %v8731_v37 = vmul.bf16 3216621497, %v6876_v14  ;;  %v8732_v29 = vpack.c.bf16 %v6741_v55, %v6725_v61  ;;  %v8734_v52 = vld [vmem:[#allocation15_spill] sm:$0xff]  ;;  %8736 = vst [vmem:[#allocation6_spill] sm:$0xff] %v6981_v20  ;;  %v6993_v31 = vpop.f32.mrb[62].mxu1 }
 0x26e   : > { %v6950_v21 = vadd.f32 %v4105_v19, %v3964_v25  ;;  %v8733_v18 = vpack.c.bf16 %v6756_v0, %v6739_v40  ;;  %v2074_v35 = vpack.c.bf16 %v6749_v28, %v6733_v45  ;;  %v2141_v54 = vpack.c.bf16 %v6787_v10, %v6773_v27  ;;  %v6971_v40 = vpop.f32.mrb[101].mxu0  ;;  %v7004_v34 = vpop.f32.mrb[63].mxu1 }
 0x26f   : > { %5327 = vpow.bf16 %v8731_v37  ;;  %v6947_v46 = vadd.bf16 %v6447_v24, %v8732_v29  ;;  %v6962_v61 = vadd.f32 %v4155_v4, %v3846_v60  ;;  %v2083_v50 = vpack.c.bf16 %v6780_v53, %v6771_v51  ;;  %v6983_v27 = vpop.f32.mrb[102].mxu0  ;;  %8737 = vst [vmem:[#allocation5_spill] sm:$0xff] %v7004_v34  ;;  %v8738_v4 = vld [vmem:[#allocation10_spill] sm:$0xff]  ;;  %v8739_v37 = vld [vmem:[#allocation12_spill] sm:$0xff] }
 0x270   : > { %5329 = vrcp.bf16 %v3156_v6  ;;  %v6956_v3 = vadd.bf16 %v6357_v32, %v8733_v18  ;;  %v6975_v45 = vadd.bf16 %v6450_v56, %v2074_v35  ;;  %v2142_v28 = vpack.c.bf16 %v6792_v1, %v6778_v41  ;;  %v6995_v41 = vpop.f32.mrb[103].mxu0  ;;  %v8741_v35 = vld [vmem:[#allocation8_spill] sm:$0xff] }
 0x271   : > { %v4832_v55 = vmul.bf16 3216621497, %v6947_v46  ;;  %v2084_v58 = vpack.c.bf16 %v8735_v49, %v8734_v52  ;;  %v6986_v51 = vadd.bf16 %v6354_v48, %v2141_v54  ;;  %v6989_v53 = vadd.bf16 %v6447_v24, %v2083_v50  ;;  %v8743_v49 = vld [vmem:[#allocation13_spill] sm:$0xff] }
 0x272   : > { %v4891_v0 = vmul.bf16 3216621497, %v6956_v3  ;;  %v2151_v10 = vpack.c.bf16 %v6827_v62, %v6810_v39  ;;  %v5322_v1 = vpop.eup %5321  ;;  %v4833_v25 = vmul.bf16 3216621497, %v6975_v45  ;;  %v6999_v13 = vadd.bf16 %v6357_v32, %v2142_v28  ;;  %v8742_v28 = vld [vmem:[#allocation17_spill] sm:$0xff] }
 0x273   : > { %5331 = vpow.bf16 %v4832_v55  ;;  %v7002_v17 = vadd.bf16 %v6450_v56, %v2084_v58  ;;  %v3494_v60 = vmul.bf16 1065369472, %v5322_v1  ;;  %v4900_v19 = vmul.bf16 3216621497, %v6986_v51  ;;  %4758 = vmatmul.mubr.msk.bf16.gmra.mrb[168].mxu1 %vm438_vm0, %v8741_v35 }
 0x274   : > { %5333 = vpow.bf16 %v4891_v0  ;;  %v4842_v39 = vmul.bf16 3216621497, %v6989_v53  ;;  %v7009_v62 = vadd.bf16 %v6354_v48, %v2151_v10  ;;  %v4901_v6 = vmul.bf16 3216621497, %v6999_v13  ;;  %1990 = vmatprep.mubr.bf16.mxu1 %v8699_v30 }
 0x275   : > { %5335 = vpow.bf16 %v4833_v25  ;;  %v4843_v63 = vmul.bf16 3216621497, %v7002_v17  ;;  %v8740_v29 = vpack.i.b16 %v8739_v37, %v8739_v37  ;;  %v3693_v55 = vmul.bf16 %v3494_v60, %v6816_v26  ;;  %v7032_v26 = vpop.f32.mrb[104].mxu0 }
 0x276   : > { %5337 = vpow.bf16 %v4900_v19  ;;  %v4910_v48 = vmul.bf16 3216621497, %v7009_v62  ;;  %v2093_v54 = vpack.c.bf16 %v6823_v33, %v6808_v22  ;;  %v5324_v50 = vpop.eup %5323  ;;  %v2152_v0 = vpack.c.bf16 %v6831_v16, %v6821_v23  ;;  %8744 = vst [vmem:[#allocation15_spill] sm:$0xff] %v7032_v26  ;;  %v7034_v22 = vpop.f32.mrb[64].mxu1 }
 0x277   : > { %v7017_v18 = vrot.slane %v8740_v29, %v8738_v4  ;;  %5339 = vpow.bf16 %v4842_v39  ;;  %v2094_v52 = vpack.c.bf16 %v6829_v42, %v8742_v28  ;;  %v5326_v10 = vpop.eup %5325  ;;  %v3973_v1 = vunpack.c.l.bf16 %v3693_v55  ;;  %8745 = vst [vmem:[#allocation16_spill] sm:$0xff] %v7034_v22  ;;  %v7036_v30 = vpop.f32.mrb[105].mxu0 }
 0x278   : > { %v3983_v25 = vunpack.c.h.bf16 %v3693_v55  ;;  %v3378_v60 = vmul.bf16 1065369472, %v5324_v50  ;;  %5341 = vpow.bf16 %v4901_v6  ;;  %8746 = vst [vmem:[#allocation12_spill] sm:$0xff] %v7036_v30  ;;  %v3496_v19 = vmul.bf16 1065369472, %v5326_v10  ;;  %v7044_v16 = vpop.f32.mrb[65].mxu1 }
 0x279   : > { %5343 = vpow.bf16 %v4843_v63  ;;  %v7039_v23 = vadd.bf16 %v6447_v24, %v2093_v54  ;;  %v7042_v42 = vadd.bf16 %v6357_v32, %v2152_v0  ;;  %8747 = vst [vmem:[#allocation8_spill] sm:$0xff] %v7044_v16  ;;  %v7046_v39 = vpop.f32.mrb[106].mxu0  ;;  %v4076_v6 = vadd.f32 %v6935_v57, %v3973_v1  ;;  %v7050_v55 = vpop.f32.mrb[66].mxu1  ;;  %v8753_v16 = vld [vmem:[#allocation7_spill] sm:$0xff] }
 0x27a   : > { %v5328_v33 = vpop.eup %5327  ;;  %8748 = vst [vmem:[#allocation17_spill] sm:$0xff] %v7046_v39  ;;  %v3635_v29 = vmul.bf16 %v3378_v60, %v6819_v9  ;;  %5345 = vpow.bf16 %v4910_v48  ;;  %8749 = vst [vmem:[#allocation13_spill] sm:$0xff] %v7050_v55  ;;  %v7052_v63 = vpop.f32.mrb[107].mxu0  ;;  %v3694_v54 = vmul.bf16 %v3496_v19, %v6838_v59  ;;  %v8752_v60 = vld [vmem:[#allocation19_spill] sm:$0xff] }
 0x27b   : > { %v5330_v37 = vpop.eup %5329  ;;  %v3223_v35 = vadd.bf16 1065369472, %v5328_v33  ;;  %8750 = vst [vmem:[#allocation31_spill] sm:$0xff] %v7052_v63  ;;  %v4852_v32 = vmul.bf16 3216621497, %v7039_v23  ;;  %v7057_v28 = vadd.f32 %v4076_v6, %v3983_v25  ;;  %v7059_v57 = vpop.f32.mrb[67].mxu1  ;;  %4759 = vmatmul.mubr.msk.bf16.gmra.mrb[172].mxu1 %vm438_vm0, %v8753_v16  ;;  %v7066_v25 = vadd.bf16 %v6450_v56, %v2094_v52 }
 0x27c   : > { %v3380_v50 = vmul.bf16 1065369472, %v5330_v37  ;;  %v4911_v0 = vmul.bf16 3216621497, %v7042_v42  ;;  %v3855_v10 = vunpack.c.l.bf16 %v3635_v29  ;;  %v3865_v58 = vunpack.c.h.bf16 %v3635_v29  ;;  %8751 = vst [vmem:[#allocation32_spill] sm:$0xff] %v7059_v57  ;;  %v8774_v63 = vld [vmem:[#allocation29_spill] sm:$0xff] }
 0x27d   : > { %5347 = vrcp.bf16 %v3223_v35  ;;  %v3974_v48 = vunpack.c.l.bf16 %v3694_v54  ;;  %v3984_v1 = vunpack.c.h.bf16 %v3694_v54  ;;  %v7069_v54 = vpop.f32.mrb[108].mxu0  ;;  %v4853_v16 = vmul.bf16 3216621497, %v7066_v25 }
 0x27e   : > { %v5332_v9 = vpop.eup %5331  ;;  %v3636_v33 = vmul.bf16 %v3380_v50, %v8752_v60  ;;  %5349 = vpow.bf16 %v4852_v32  ;;  %v4126_v19 = vadd.f32 %v6939_v43, %v3855_v10  ;;  %8754 = vst [vmem:[#allocation19_spill] sm:$0xff] %v7069_v54  ;;  %v8755_v60 = vld [vmem:[#allocation14_spill] sm:$0xff]  ;;  %v8756_v43 = vld [vmem:[#allocation21_spill] sm:$0xff]  ;;  %v7078_v52 = vpop.f32.mrb[109].mxu0 }
 0x27f   : > { %v5334_v59 = vpop.eup %5333  ;;  %v3165_v37 = vadd.bf16 1065369472, %v5332_v9  ;;  %5351 = vpow.bf16 %v4911_v0  ;;  %v4107_v6 = vadd.f32 %v6950_v21, %v3974_v48  ;;  %v2103_v10 = vpack.c.bf16 %v8756_v43, %v8755_v60  ;;  %v7076_v0 = vpop.f32.mrb[68].mxu1  ;;  %8758 = vst [vmem:[#allocation14_spill] sm:$0xff] %v7078_v52  ;;  %v8761_v43 = vld [vmem:[#allocation4_spill] sm:$0xff] }
 0x280   : > { %v3856_v29 = vunpack.c.l.bf16 %v3636_v33  ;;  %v3866_v35 = vunpack.c.h.bf16 %v3636_v33  ;;  %v3224_v57 = vadd.bf16 1065369472, %v5334_v59  ;;  %v5336_v50 = vpop.eup %5335  ;;  %v7071_v32 = vadd.f32 %v4126_v19, %v3865_v58  ;;  %8757 = vst [vmem:[#allocation7_spill] sm:$0xff] %v7076_v0  ;;  %v7083_v59 = vpop.f32.mrb[69].mxu1  ;;  %v8762_v0 = vld [vmem:[#allocation22_spill] sm:$0xff] }
 0x281   : > { %5353 = vrcp.bf16 %v3165_v37  ;;  %v5338_v9 = vpop.eup %5337  ;;  %v7080_v21 = vadd.f32 %v4107_v6, %v3984_v1  ;;  %v3166_v33 = vadd.bf16 1065369472, %v5336_v50  ;;  %8759 = vst [vmem:[#allocation21_spill] sm:$0xff] %v7083_v59  ;;  %v7085_v58 = vpop.f32.mrb[110].mxu0  ;;  %v7088_v60 = vadd.bf16 %v6447_v24, %v2103_v10  ;;  %v8766_v50 = vld [vmem:[#allocation23_spill] sm:$0xff] }
 0x282   : > { %v4157_v48 = vadd.f32 %v6962_v61, %v3856_v29  ;;  %5355 = vrcp.bf16 %v3224_v57  ;;  %8760 = vst [vmem:[#allocation33_spill] sm:$0xff] %v7085_v58  ;;  %v5340_v19 = vpop.eup %5339  ;;  %v3233_v37 = vadd.bf16 1065369472, %v5338_v9  ;;  %v2005_v52 = vpack.c.bf16 %v8762_v0, %v8761_v43  ;;  %v7092_v54 = vpop.f32.mrb[70].mxu1  ;;  %v8765_v29 = vld [vmem:[#allocation18_spill] sm:$0xff] }
 0x283   : > { %5357 = vpow.bf16 %v4853_v16  ;;  %8763 = vst [vmem:[#allocation4_spill] sm:$0xff] %v7092_v54  ;;  %v7094_v1 = vpop.f32.mrb[111].mxu0  ;;  %v5342_v61 = vpop.eup %5341  ;;  %v3175_v6 = vadd.bf16 1065369472, %v5340_v19  ;;  %v2104_v59 = vpack.c.bf16 %v8766_v50, %v8765_v29  ;;  %v4862_v58 = vmul.bf16 3216621497, %v7088_v60 }
 0x284   : > { %8764 = vst [vmem:[#allocation22_spill] sm:$0xff] %v7094_v1  ;;  %v7096_v57 = vadd.f32 %v4157_v48, %v3866_v35  ;;  %5359 = vrcp.bf16 %v3166_v33  ;;  %v7100_v9 = vpop.f32.mrb[71].mxu1  ;;  %v5344_v16 = vpop.eup %5343  ;;  %v3234_v10 = vadd.bf16 1065369472, %v5342_v61  ;;  %v7104_v0 = vadd.bf16 %v7017_v18, %v2005_v52  ;;  %v8768_v48 = vld [vmem:[#allocation20_spill] sm:$0xff]  ;;  %v8773_v54 = vld [vmem:[#allocation25_spill] sm:$0xff] }
 0x285   : > { %8767 = vst [vmem:[#allocation18_spill] sm:$0xff] %v7100_v9  ;;  %5361 = vrcp.bf16 %v3233_v37  ;;  %v5346_v43 = vpop.eup %5345  ;;  %v3176_v1 = vadd.bf16 1065369472, %v5344_v16  ;;  %v7107_v35 = vadd.bf16 %v6450_v56, %v2104_v59  ;;  %v8769_v33 = vld [vmem:[#allocation24_spill] sm:$0xff]  ;;  %v8770_v37 = vpack.i.b16 %v8743_v49, %v8743_v49  ;;  %v8771_v16 = vld [vmem:[#allocation3_spill] sm:$0xff]  ;;  %v8776_v49 = vld [vmem:[#allocation26_spill] sm:$0xff] }
 0x286   : > { %5363 = vrcp.bf16 %v3175_v6  ;;  %v2006_v19 = vpack.c.bf16 %v8769_v33, %v8768_v48  ;;  %v3243_v29 = vadd.bf16 1065369472, %v5346_v43  ;;  %v4764_v50 = vmul.bf16 3216621497, %v7104_v0  ;;  %v8772_v59 = vld [vmem:[#allocation28_spill] sm:$0xff] }
 0x287   : > { %5365 = vrcp.bf16 %v3234_v10  ;;  %v7116_v61 = vrot.slane %v8770_v37, %v8738_v4  ;;  %v4863_v6 = vmul.bf16 3216621497, %v7107_v35  ;;  %v2113_v9 = vpack.c.bf16 %v8772_v59, %v8771_v16  ;;  %v7123_v10 = vpop.f32.mrb[112].mxu0  ;;  %v8777_v37 = vld [vmem:[#allocation30_spill] sm:$0xff] }
 0x288   : > { %v5348_v52 = vpop.eup %5347  ;;  %5367 = vrcp.bf16 %v3176_v1  ;;  %v2015_v48 = vpack.c.bf16 %v8774_v63, %v8773_v54  ;;  %8775 = vst [vmem:[#allocation23_spill] sm:$0xff] %v7123_v10  ;;  %v2114_v4 = vpack.c.bf16 %v8777_v37, %v8776_v49  ;;  %v7130_v1 = vpop.f32.mrb[72].mxu1 }
 0x289   : > { %v5350_v43 = vpop.eup %5349  ;;  %v3514_v33 = vmul.bf16 1065369472, %v5348_v52  ;;  %5369 = vrcp.bf16 %v3243_v29  ;;  %v7126_v30 = vadd.bf16 %v7116_v61, %v2006_v19  ;;  %8778 = vst [vmem:[#allocation20_spill] sm:$0xff] %v7130_v1  ;;  %v7132_v55 = vpop.f32.mrb[113].mxu0  ;;  %v7135_v63 = vadd.bf16 %v6447_v24, %v2113_v9 }
 0x28a   : > { %8779 = vst [vmem:[#allocation24_spill] sm:$0xff] %v7132_v55  ;;  %v5352_v22 = vpop.eup %5351  ;;  %v3185_v16 = vadd.bf16 1065369472, %v5350_v43  ;;  %5371 = vpow.bf16 %v4862_v58  ;;  %v7138_v54 = vadd.bf16 %v7017_v18, %v2015_v48  ;;  %v7140_v29 = vpop.f32.mrb[73].mxu1  ;;  %v7153_v55 = vadd.bf16 %v6450_v56, %v2114_v4 }
 0x28b   : > { %8780 = vst [vmem:[#allocation3_spill] sm:$0xff] %v7140_v29  ;;  %v7142_v19 = vpop.f32.mrb[114].mxu0  ;;  %v3703_v52 = vmul.bf16 %v3514_v33, %v6876_v14  ;;  %v3244_v59 = vadd.bf16 1065369472, %v5352_v22  ;;  %5373 = vpow.bf16 %v4764_v50  ;;  %v4765_v49 = vmul.bf16 3216621497, %v7126_v30 }
 0x28c   : > { %8781 = vst [vmem:[#allocation28_spill] sm:$0xff] %v7142_v19  ;;  %v7146_v37 = vpop.f32.mrb[74].mxu1  ;;  %v7148_v43 = vpop.f32.mrb[115].mxu0  ;;  %5375 = vrcp.bf16 %v3185_v16  ;;  %v4872_v9 = vmul.bf16 3216621497, %v7135_v63  ;;  %v8785_v16 = vld [vmem:[#allocation27_spill] sm:$0xff] }
 0x28d   : > { %8782 = vst [vmem:[#allocation25_spill] sm:$0xff] %v7146_v37  ;;  %8783 = vst [vmem:[#allocation29_spill] sm:$0xff] %v7148_v43  ;;  %v5354_v58 = vpop.eup %5353  ;;  %v7155_v29 = vpop.f32.mrb[75].mxu1  ;;  %v3993_v22 = vunpack.c.l.bf16 %v3703_v52  ;;  %v4003_v50 = vunpack.c.h.bf16 %v3703_v52  ;;  %5377 = vrcp.bf16 %v3244_v59  ;;  %v2016_v37 = vpack.c.bf16 %v6909_v5, %v8785_v16 }
 0x28e   : > { %8784 = vst [vmem:[#allocation26_spill] sm:$0xff] %v7155_v29  ;;  %v5356_v14 = vpop.eup %5355  ;;  %v3398_v33 = vmul.bf16 1065369472, %v5354_v58  ;;  %5379 = vpow.bf16 %v4863_v6  ;;  %v7166_v6 = vpop.f32.mrb[116].mxu0 }
 0x28f   : > { %v5358_v19 = vpop.eup %5357  ;;  %v3516_v10 = vmul.bf16 1065369472, %v5356_v14  ;;  %v4078_v48 = vadd.f32 %v7057_v28, %v3993_v22  ;;  %5381 = vpow.bf16 %v4765_v49  ;;  %v7164_v59 = vadd.bf16 %v7116_v61, %v2016_v37  ;;  %8786 = vst [vmem:[#allocation30_spill] sm:$0xff] %v7166_v6  ;;  %v7168_v28 = vpop.f32.mrb[76].mxu1 }
 0x290   : > { %v5360_v1 = vpop.eup %5359  ;;  %v3645_v4 = vmul.bf16 %v3398_v33, %v6947_v46  ;;  %v3186_v39 = vadd.bf16 1065369472, %v5358_v19  ;;  %5383 = vpow.bf16 %v4872_v9  ;;  %8787 = vst [vmem:[#allocation27_spill] sm:$0xff] %v7168_v28  ;;  %v7170_v46 = vpop.f32.mrb[117].mxu0 }
 0x291   : > { %v5362_v29 = vpop.eup %5361  ;;  %v3704_v52 = vmul.bf16 %v3516_v10, %v6956_v3  ;;  %v3400_v58 = vmul.bf16 1065369472, %v5360_v1  ;;  %v4079_v43 = vadd.f32 %v4078_v48, %v4003_v50  ;;  %8788 = vst [vmem:[#allocation34_spill] sm:$0xff] %v7170_v46  ;;  %v7173_v1 = vpop.f32.mrb[77].mxu1 }
 0x292   : > { %v5364_v14 = vpop.eup %5363  ;;  %v3875_v5 = vunpack.c.l.bf16 %v3645_v4  ;;  %v3885_v16 = vunpack.c.h.bf16 %v3645_v4  ;;  %v3534_v26 = vmul.bf16 1065369472, %v5362_v29  ;;  %8789 = vst [vmem:[#allocation35_spill] sm:$0xff] %v7173_v1  ;;  %v7175_v37 = vpop.f32.mrb[118].mxu0  ;;  %5385 = vrcp.bf16 %v3186_v39 }
 0x293   : > { %v5366_v19 = vpop.eup %5365  ;;  %v3994_v49 = vunpack.c.l.bf16 %v3704_v52  ;;  %v4004_v22 = vunpack.c.h.bf16 %v3704_v52  ;;  %v3646_v3 = vmul.bf16 %v3400_v58, %v6975_v45  ;;  %v3418_v10 = vmul.bf16 1065369472, %v5364_v14  ;;  %8790 = vst [vmem:[#allocation36_spill] sm:$0xff] %v7175_v37  ;;  %v7179_v33 = vpop.f32.mrb[78].mxu1 }
 0x294   : > { %v5368_v9 = vpop.eup %5367  ;;  %v4128_v48 = vadd.f32 %v7071_v32, %v3875_v5  ;;  %v3713_v50 = vmul.bf16 %v3534_v26, %v6986_v51  ;;  %v3536_v29 = vmul.bf16 1065369472, %v5366_v19  ;;  %8791 = vst [vmem:[#allocation37_spill] sm:$0xff] %v7179_v33  ;;  %v7181_v4 = vpop.f32.mrb[119].mxu0 }
 0x295   : > { %8792 = vst [vmem:[#allocation38_spill] sm:$0xff] %v7181_v4  ;;  %v5370_v46 = vpop.eup %5369  ;;  %v4109_v52 = vadd.f32 %v7080_v21, %v3994_v49  ;;  %v3876_v45 = vunpack.c.l.bf16 %v3646_v3  ;;  %v3886_v58 = vunpack.c.h.bf16 %v3646_v3  ;;  %v3655_v14 = vmul.bf16 %v3418_v10, %v6989_v53  ;;  %v7185_v1 = vpop.f32.mrb[79].mxu1 }
 0x296   : > { %8793 = vst [vmem:[#allocation39_spill] sm:$0xff] %v7185_v1  ;;  %v5372_v37 = vpop.eup %5371  ;;  %v4129_v6 = vadd.f32 %v4128_v48, %v3885_v16  ;;  %v4013_v32 = vunpack.c.l.bf16 %v3713_v50  ;;  %v4023_v5 = vunpack.c.h.bf16 %v3713_v50  ;;  %v3714_v51 = vmul.bf16 %v3536_v29, %v6999_v13  ;;  %v7189_v48 = vpop.f32.mrb[120].mxu0 }
 0x297   : > { %v5374_v26 = vpop.eup %5373  ;;  %v4110_v39 = vadd.f32 %v4109_v52, %v4004_v22  ;;  %v4159_v19 = vadd.f32 %v7096_v57, %v3876_v45  ;;  %v3895_v4 = vunpack.c.l.bf16 %v3655_v14  ;;  %v3905_v33 = vunpack.c.h.bf16 %v3655_v14  ;;  %v7192_v52 = vpop.f32.mrb[80].mxu1 }
 0x298   : > { %v5376_v28 = vpop.eup %5375  ;;  %v4080_v21 = vadd.f32 %v4079_v43, %v4013_v32  ;;  %v4014_v49 = vunpack.c.l.bf16 %v3714_v51  ;;  %v4024_v3 = vunpack.c.h.bf16 %v3714_v51  ;;  %v3420_v34 = vmul.bf16 1065369472, %v5368_v9  ;;  %v7194_v45 = vpop.f32.mrb[121].mxu0 }
 0x299   : > { %v5378_v53 = vpop.eup %5377  ;;  %v4160_v10 = vadd.f32 %v4159_v19, %v3886_v58  ;;  %v4130_v1 = vadd.f32 %v4129_v6, %v3895_v4  ;;  %v3554_v20 = vmul.bf16 1065369472, %v5370_v46  ;;  %v3438_v16 = vmul.bf16 1065369472, %v5376_v28  ;;  %8794 = vst [vmem:[#allocation40_spill] sm:$0xff] %v7194_v45  ;;  %v7198_v28 = vpop.f32.mrb[81].mxu1 }
 0x29a   : > { %v5380_v50 = vpop.eup %5379  ;;  %v4081_v13 = vadd.f32 %v4080_v21, %v4023_v5  ;;  %v4111_v29 = vadd.f32 %v4110_v39, %v4014_v49  ;;  %v3656_v22 = vmul.bf16 %v3420_v34, %v7002_v17  ;;  %v3556_v57 = vmul.bf16 1065369472, %v5378_v53  ;;  %8795 = vst [vmem:[#allocation41_spill] sm:$0xff] %v7198_v28  ;;  %v7200_v4 = vpop.f32.mrb[122].mxu0 }
 0x29b   : > { %v5382_v43 = vpop.eup %5381  ;;  %v4131_v14 = vadd.f32 %v4130_v1, %v3905_v33  ;;  %v3723_v9 = vmul.bf16 %v3554_v20, %v7009_v62  ;;  %v3665_v6 = vmul.bf16 %v3438_v16, %v7039_v23  ;;  %v3195_v46 = vadd.bf16 1065369472, %v5372_v37  ;;  %v7203_v51 = vpop.f32.mrb[82].mxu1 }
 0x29c   : > { %v5384_v58 = vpop.eup %5383  ;;  %v4112_v32 = vadd.f32 %v4111_v29, %v4024_v3  ;;  %v3896_v5 = vunpack.c.l.bf16 %v3656_v22  ;;  %v3906_v17 = vunpack.c.h.bf16 %v3656_v22  ;;  %v3724_v34 = vmul.bf16 %v3556_v57, %v7042_v42  ;;  %v7205_v39 = vpop.f32.mrb[123].mxu0 }
 0x29d   : > { %8796 = vst [vmem:[#allocation42_spill] sm:$0xff] %v7205_v39  ;;  %v4033_v1 = vunpack.c.l.bf16 %v3723_v9  ;;  %v4043_v33 = vunpack.c.h.bf16 %v3723_v9  ;;  %v3915_v20 = vunpack.c.l.bf16 %v3665_v6  ;;  %v3925_v62 = vunpack.c.h.bf16 %v3665_v6  ;;  %v7207_v23 = vpop.f32.mrb[83].mxu1  ;;  %v5386_v49 = vpop.eup %5385 }
 0x29e   : > { %v4161_v37 = vadd.f32 %v4160_v10, %v3896_v5  ;;  %v4034_v19 = vunpack.c.l.bf16 %v3724_v34  ;;  %v4044_v21 = vunpack.c.h.bf16 %v3724_v34  ;;  %5387 = vrcp.bf16 %v3195_v46  ;;  %v7211_v6 = vpop.f32.mrb[124].mxu0 }
 0x29f   : > { %v4082_v3 = vadd.f32 %v4081_v13, %v4033_v1  ;;  %v4132_v53 = vadd.f32 %v4131_v14, %v3915_v20  ;;  %v3097_v16 = vadd.bf16 1065369472, %v5374_v26  ;;  %v3196_v29 = vadd.bf16 1065369472, %v5380_v50  ;;  %v7215_v14 = vpop.f32.mrb[84].mxu1  ;;  %v7217_v26 = vpop.f32.mrb[125].mxu0 }
 0x2a0   : > { %v4162_v42 = vadd.f32 %v4161_v37, %v3906_v17  ;;  %v4113_v22 = vadd.f32 %v4112_v32, %v4034_v19  ;;  %v3440_v57 = vmul.bf16 1065369472, %v5386_v49  ;;  %v3098_v45 = vadd.bf16 1065369472, %v5382_v43  ;;  %8797 = vst [vmem:[#allocation43_spill] sm:$0xff] %v7217_v26  ;;  %v7225_v32 = vpop.f32.mrb[126].mxu0 }
 0x2a1   : > { %v4083_v39 = vadd.f32 %v4082_v3, %v4043_v33  ;;  %v7209_v28 = vadd.f32 %v4132_v53, %v3925_v62  ;;  %5389 = vrcp.bf16 %v3097_v16  ;;  %v3205_v9 = vadd.bf16 1065369472, %v5384_v58  ;;  %v7223_v58 = vpop.f32.mrb[85].mxu1  ;;  %v7229_v33 = vpop.f32.mrb[127].mxu0 }
 0x2a2   : > { %v4114_v10 = vadd.f32 %v4113_v22, %v4044_v21  ;;  %v3666_v5 = vmul.bf16 %v3440_v57, %v7066_v25  ;;  %5391 = vrcp.bf16 %v3196_v29  ;;  %v4775_v13 = vmul.bf16 3216621497, %v7164_v59  ;;  %v7227_v1 = vpop.f32.mrb[86].mxu1  ;;  %8798 = vst [vmem:[#allocation44_spill] sm:$0xff] %v7229_v33  ;;  %v7258_v22 = vpop.f32.mrb[128].mxu0 }
 0x2a3   : > { %v4366_v50 = vrot.slane %v4083_v39, 4  ;;  %5393 = vrcp.bf16 %v3098_v45  ;;  %v2123_v43 = vpack.c.bf16 %v6925_v36, %v6915_v47  ;;  %v2025_v46 = vpack.c.bf16 %v6929_v2, %v6918_v15  ;;  %v7239_v36 = vpop.f32.mrb[87].mxu1  ;;  %8801 = vst [vmem:[#allocation45_spill] sm:$0xff] %v7258_v22 }
 0x2a4   : > { %v4372_v25 = vrot.slane %v4114_v10, 4  ;;  %v3916_v17 = vunpack.c.l.bf16 %v3666_v5  ;;  %v3926_v34 = vunpack.c.h.bf16 %v3666_v5  ;;  %5395 = vrcp.bf16 %v3205_v9  ;;  %v7263_v5 = vpop.f32.mrb[88].mxu1 }
 0x2a5   : > { %v4367_v20 = vadd.f32 %v4366_v50, %v4083_v39  ;;  %v8799_v45 = vmul.bf16 3216621497, %v7138_v54  ;;  %v7234_v47 = vadd.bf16 %v6447_v24, %v2123_v43  ;;  %v7237_v15 = vadd.bf16 %v7017_v18, %v2025_v46  ;;  %8802 = vst [vmem:[#allocation46_spill] sm:$0xff] %v7263_v5 }
 0x2a6   : > { %v4373_v2 = vadd.f32 %v4372_v25, %v4114_v10  ;;  %v4163_v62 = vadd.f32 %v4162_v42, %v3916_v17  ;;  %v8800_v37 = vmul.bf16 3216621497, %v7153_v55  ;;  %v2124_v19 = vpack.c.bf16 %v6931_v12, %v6920_v38 }
 0x2a7   : > { %5397 = vpow.bf16 %v8799_v45  ;;  %v4368_v39 = vrot.slane %v4367_v20, 2  ;;  %v4882_v21 = vmul.bf16 3216621497, %v7234_v47  ;;  %v4784_v49 = vmul.bf16 3216621497, %v7237_v15 }
 0x2a8   : > { %5399 = vpow.bf16 %v8800_v37  ;;  %v7247_v3 = vadd.f32 %v4163_v62, %v3926_v34  ;;  %v7250_v53 = vadd.bf16 %v6450_v56, %v2124_v19  ;;  %v2026_v16 = vpack.c.bf16 %v6933_v44, %v6923_v8  ;;  %v7265_v8 = vpop.f32.mrb[129].mxu0 }
 0x2a9   : > { %5401 = vpow.bf16 %v4775_v13  ;;  %v5388_v29 = vpop.eup %5387  ;;  %v4374_v42 = vrot.slane %v4373_v2, 2  ;;  %v2133_v38 = vpack.c.bf16 %v6983_v27, %v6960_v7  ;;  %v2035_v12 = vpack.c.bf16 %v6993_v31, %v6969_v11  ;;  %8803 = vst [vmem:[#allocation47_spill] sm:$0xff] %v7265_v8  ;;  %v7270_v13 = vpop.f32.mrb[89].mxu1  ;;  %v8842_v8 = vld [vmem:[#allocation21_spill] sm:$0xff] }
 0x2aa   : > { %5403 = vpow.bf16 %v4882_v21  ;;  %v7260_v57 = vadd.f32 %v4368_v39, %v4367_v20  ;;  %v3458_v9 = vmul.bf16 1065369472, %v5388_v29  ;;  %v4883_v10 = vmul.bf16 3216621497, %v7250_v53  ;;  %8804 = vst [vmem:[#allocation48_spill] sm:$0xff] %v7270_v13  ;;  %v7272_v7 = vpop.f32.mrb[130].mxu0 }
 0x2ab   : > { %5405 = vpow.bf16 %v4784_v49  ;;  %v7268_v44 = vadd.bf16 %v7116_v61, %v2026_v16  ;;  %8805 = vst [vmem:[#allocation49_spill] sm:$0xff] %v7272_v7  ;;  %v2134_v31 = vpack.c.bf16 %v6995_v41, %v6971_v40  ;;  %v7277_v50 = vpop.f32.mrb[90].mxu1  ;;  %v7279_v43 = vpop.f32.mrb[131].mxu0  ;;  %v7281_v25 = vadd.f32 %v4374_v42, %v4373_v2  ;;  %v8853_v7 = vld [vmem:[#allocation26_spill] sm:$0xff] }
 0x2ac   : > { %v5390_v11 = vpop.eup %5389  ;;  %v3675_v27 = vmul.bf16 %v3458_v9, %v7088_v60  ;;  %5407 = vpow.bf16 %v4883_v10  ;;  %8806 = vst [vmem:[#allocation50_spill] sm:$0xff] %v7277_v50  ;;  %8807 = vst [vmem:[#allocation51_spill] sm:$0xff] %v7279_v43  ;;  %v7286_v60 = vadd.bf16 %v6447_v24, %v2133_v38  ;;  %v7288_v19 = vpop.f32.mrb[91].mxu1  ;;  %v7292_v2 = vadd.bf16 %v7017_v18, %v2035_v12 }
 0x2ad   : > { %v5392_v46 = vpop.eup %5391  ;;  %8808 = vst [vmem:[#allocation52_spill] sm:$0xff] %v7281_v25  ;;  %v3262_v17 = vmul.bf16 1065369472, %v5390_v11  ;;  %v4785_v34 = vmul.bf16 3216621497, %v7268_v44  ;;  %8809 = vst [vmem:[#allocation53_spill] sm:$0xff] %v7288_v19 }
 0x2ae   : > { %v5394_v20 = vpop.eup %5393  ;;  %v3935_v62 = vunpack.c.l.bf16 %v3675_v27  ;;  %v3460_v37 = vmul.bf16 1065369472, %v5392_v46  ;;  %v3945_v49 = vunpack.c.h.bf16 %v3675_v27  ;;  %v4892_v27 = vmul.bf16 3216621497, %v7286_v60  ;;  %v7301_v45 = vpop.f32.mrb[92].mxu1 }
 0x2af   : > { %v5396_v40 = vpop.eup %5395  ;;  %v3577_v41 = vmul.bf16 %v3262_v17, %v7104_v0  ;;  %v3264_v39 = vmul.bf16 1065369472, %v5394_v20  ;;  %5409 = vpow.bf16 %v4785_v34  ;;  %v7298_v0 = vpop.f32.mrb[132].mxu0  ;;  %8811 = vst [vmem:[#allocation55_spill] sm:$0xff] %v7301_v45 }
 0x2b0   : > { %v4134_v16 = vadd.f32 %v7209_v28, %v3935_v62  ;;  %v3676_v29 = vmul.bf16 %v3460_v37, %v7107_v35  ;;  %v3478_v42 = vmul.bf16 1065369472, %v5396_v40  ;;  %8810 = vst [vmem:[#allocation54_spill] sm:$0xff] %v7298_v0  ;;  %v7303_v28 = vpop.f32.mrb[133].mxu0 }
 0x2b1   : > { %v3737_v10 = vunpack.c.l.bf16 %v3577_v41  ;;  %v3747_v11 = vunpack.c.h.bf16 %v3577_v41  ;;  %v3578_v46 = vmul.bf16 %v3264_v39, %v7126_v30  ;;  %8812 = vst [vmem:[#allocation56_spill] sm:$0xff] %v7303_v28  ;;  %v7308_v41 = vpop.f32.mrb[93].mxu1  ;;  %v7310_v30 = vpop.f32.mrb[134].mxu0 }
 0x2b2   : > { %v5398_v21 = vpop.eup %5397  ;;  %v4135_v34 = vadd.f32 %v4134_v16, %v3945_v49  ;;  %v3936_v12 = vunpack.c.l.bf16 %v3676_v29  ;;  %v3946_v20 = vunpack.c.h.bf16 %v3676_v29  ;;  %v3685_v40 = vmul.bf16 %v3478_v42, %v7135_v63  ;;  %8813 = vst [vmem:[#allocation57_spill] sm:$0xff] %v7308_v41  ;;  %8814 = vst [vmem:[#allocation58_spill] sm:$0xff] %v7310_v30  ;;  %v7315_v43 = vpop.f32.mrb[94].mxu1 }
 0x2b3   : > { %v5400_v9 = vpop.eup %5399  ;;  %v7305_v35 = vadd.f32 %v3747_v11, %v3737_v10  ;;  %v3738_v62 = vunpack.c.l.bf16 %v3578_v46  ;;  %v3748_v37 = vunpack.c.h.bf16 %v3578_v46  ;;  %v3107_v16 = vadd.bf16 1065369472, %v5398_v21  ;;  %8815 = vst [vmem:[#allocation59_spill] sm:$0xff] %v7315_v43  ;;  %v7317_v46 = vpop.f32.mrb[135].mxu0  ;;  %v8841_v43 = vld [vmem:[#allocation22_spill] sm:$0xff] }
 0x2b4   : > { %v5402_v17 = vpop.eup %5401  ;;  %v4165_v49 = vadd.f32 %v7247_v3, %v3936_v12  ;;  %v3206_v29 = vadd.bf16 1065369472, %v5400_v9  ;;  %v3955_v28 = vunpack.c.l.bf16 %v3685_v40  ;;  %v3965_v10 = vunpack.c.h.bf16 %v3685_v40  ;;  %8816 = vst [vmem:[#allocation60_spill] sm:$0xff] %v7317_v46  ;;  %v7322_v3 = vpop.f32.mrb[95].mxu1  ;;  %v8818_v12 = vld [vmem:[#allocation6_spill] sm:$0xff] }
 0x2b5   : > { %v5404_v39 = vpop.eup %5403  ;;  %v3108_v38 = vadd.bf16 1065369472, %v5402_v17  ;;  %v7313_v45 = vadd.f32 %v3748_v37, %v3738_v62  ;;  %5411 = vrcp.bf16 %v3107_v16  ;;  %v4794_v41 = vmul.bf16 3216621497, %v7292_v2  ;;  %8817 = vst [vmem:[#allocation61_spill] sm:$0xff] %v7322_v3  ;;  %v8819_v62 = vld [vmem:[#allocation5_spill] sm:$0xff] }
 0x2b6   : > { %v5406_v0 = vpop.eup %5405  ;;  %v3215_v11 = vadd.bf16 1065369472, %v5404_v39  ;;  %v7319_v63 = vadd.f32 %v4165_v49, %v3946_v20  ;;  %v4136_v9 = vadd.f32 %v4135_v34, %v3955_v28  ;;  %5413 = vrcp.bf16 %v3206_v29  ;;  %v8820_v39 = vld [vmem:[#allocation15_spill] sm:$0xff]  ;;  %v8821_v20 = vld [vmem:[#allocation17_spill] sm:$0xff]  ;;  %v8822_v16 = vld [vmem:[#allocation16_spill] sm:$0xff] }
 0x2b7   : > { %v3117_v42 = vadd.bf16 1065369472, %v5406_v0  ;;  %v5408_v21 = vpop.eup %5407  ;;  %v7325_v17 = vadd.bf16 %v6450_v56, %v2134_v31  ;;  %v2036_v37 = vpack.c.bf16 %v8819_v62, %v8818_v12  ;;  %5415 = vrcp.bf16 %v3108_v38  ;;  %v8823_v0 = vld [vmem:[#allocation13_spill] sm:$0xff]  ;;  %v7339_v31 = vpop.f32.mrb[136].mxu0  ;;  %v8825_v12 = vld [vmem:[#allocation12_spill] sm:$0xff]  ;;  %v8826_v62 = vld [vmem:[#allocation31_spill] sm:$0xff] }
 0x2b8   : > { %v3216_v40 = vadd.bf16 1065369472, %v5408_v21  ;;  %v2143_v49 = vpack.c.bf16 %v8821_v20, %v8820_v39  ;;  %v2045_v46 = vpack.c.bf16 %v8823_v0, %v8822_v16  ;;  %v7333_v30 = vadd.f32 %v4136_v9, %v3965_v10  ;;  %8824 = vst [vmem:[#allocation6_spill] sm:$0xff] %v7339_v31  ;;  %v7349_v9 = vpop.f32.mrb[96].mxu1  ;;  %v8829_v20 = vld [vmem:[#allocation8_spill] sm:$0xff]  ;;  %v8840_v3 = vld [vmem:[#allocation14_spill] sm:$0xff] }
 0x2b9   : > { %5417 = vrcp.bf16 %v3215_v11  ;;  %v4893_v34 = vmul.bf16 3216621497, %v7325_v17  ;;  %v7337_v28 = vadd.bf16 %v7116_v61, %v2036_v37  ;;  %v2144_v10 = vpack.c.bf16 %v8826_v62, %v8825_v12  ;;  %8827 = vst [vmem:[#allocation5_spill] sm:$0xff] %v7349_v9  ;;  %v7351_v11 = vpop.f32.mrb[137].mxu0  ;;  %v8830_v16 = vld [vmem:[#allocation32_spill] sm:$0xff]  ;;  %v7356_v0 = vpop.f32.mrb[97].mxu1 }
 0x2ba   : > { %v5410_v29 = vpop.eup %5409  ;;  %5419 = vrcp.bf16 %v3117_v42  ;;  %v7342_v38 = vadd.bf16 %v6447_v24, %v2143_v49  ;;  %v7345_v21 = vadd.bf16 %v7017_v18, %v2045_v46  ;;  %8828 = vst [vmem:[#allocation15_spill] sm:$0xff] %v7351_v11  ;;  %v2046_v42 = vpack.c.bf16 %v8830_v16, %v8829_v20  ;;  %8831 = vst [vmem:[#allocation17_spill] sm:$0xff] %v7356_v0  ;;  %v7358_v49 = vpop.f32.mrb[138].mxu0  ;;  %v8835_v20 = vld [vmem:[#allocation19_spill] sm:$0xff]  ;;  %v8836_v16 = vld [vmem:[#allocation33_spill] sm:$0xff] }
 0x2bb   : > { %5421 = vrcp.bf16 %v3216_v40  ;;  %v3118_v37 = vadd.bf16 1065369472, %v5410_v29  ;;  %v4795_v39 = vmul.bf16 3216621497, %v7337_v28  ;;  %8832 = vst [vmem:[#allocation16_spill] sm:$0xff] %v7358_v49  ;;  %v7363_v62 = vadd.bf16 %v6450_v56, %v2144_v10  ;;  %v7365_v11 = vpop.f32.mrb[98].mxu1 }
 0x2bc   : > { %5423 = vpow.bf16 %v4892_v27  ;;  %v4902_v46 = vmul.bf16 3216621497, %v7342_v38  ;;  %v4804_v12 = vmul.bf16 3216621497, %v7345_v21  ;;  %8833 = vst [vmem:[#allocation13_spill] sm:$0xff] %v7365_v11  ;;  %v7367_v40 = vpop.f32.mrb[139].mxu0  ;;  %v7370_v29 = vadd.bf16 %v7116_v61, %v2046_v42 }
 0x2bd   : > { %8834 = vst [vmem:[#allocation12_spill] sm:$0xff] %v7367_v40  ;;  %5425 = vrcp.bf16 %v3118_v37  ;;  %v2153_v0 = vpack.c.bf16 %v8836_v16, %v8835_v20  ;;  %v8837_v49 = vld [vmem:[#allocation7_spill] sm:$0xff]  ;;  %v8838_v27 = vld [vmem:[#allocation4_spill] sm:$0xff]  ;;  %v7376_v9 = vpop.f32.mrb[99].mxu1  ;;  %v4903_v10 = vmul.bf16 3216621497, %v7363_v62  ;;  %v2154_v11 = vpack.c.bf16 %v8841_v43, %v8840_v3 }
 0x2be   : > { %v2055_v31 = vpack.c.bf16 %v8838_v27, %v8837_v49  ;;  %8839 = vst [vmem:[#allocation31_spill] sm:$0xff] %v7376_v9  ;;  %5427 = vpow.bf16 %v4794_v41  ;;  %v8843_v40 = vld [vmem:[#allocation18_spill] sm:$0xff]  ;;  %v4805_v42 = vmul.bf16 3216621497, %v7370_v29  ;;  %v8844_v43 = vld [vmem:[#allocation20_spill] sm:$0xff]  ;;  %v8845_v3 = vld [vmem:[#allocation25_spill] sm:$0xff] }
 0x2bf   : > { %v2056_v37 = vpack.c.bf16 %v8843_v40, %v8842_v8  ;;  %5429 = vpow.bf16 %v4893_v34  ;;  %v7385_v19 = vadd.bf16 %v6447_v24, %v2153_v0  ;;  %v7391_v41 = vadd.bf16 %v6450_v56, %v2154_v11  ;;  %v8846_v0 = vld [vmem:[#allocation23_spill] sm:$0xff]  ;;  %v8847_v40 = vld [vmem:[#allocation28_spill] sm:$0xff]  ;;  %v7402_v27 = vpop.f32.mrb[140].mxu0  ;;  %v7410_v13 = vpop.f32.mrb[100].mxu1 }
 0x2c0   : > { %v7388_v20 = vadd.bf16 %v7017_v18, %v2055_v31  ;;  %5431 = vpow.bf16 %v4795_v39  ;;  %v2065_v16 = vpack.c.bf16 %v8845_v3, %v8844_v43  ;;  %v5412_v8 = vpop.eup %5411  ;;  %8848 = vst [vmem:[#allocation8_spill] sm:$0xff] %v7402_v27  ;;  %v8849_v3 = vld [vmem:[#allocation9_spill] sm:$0xff]  ;;  %8850 = vst [vmem:[#allocation32_spill] sm:$0xff] %v7410_v13  ;;  %v7412_v31 = vpop.f32.mrb[141].mxu0  ;;  %v8852_v11 = vld [vmem:[#allocation3_spill] sm:$0xff] }
 0x2c1   : > { %v7394_v49 = vadd.bf16 %v7116_v61, %v2056_v37  ;;  %5433 = vpow.bf16 %v4902_v46  ;;  %v4912_v34 = vmul.bf16 3216621497, %v7385_v19  ;;  %v5414_v39 = vpop.eup %5413  ;;  %v3282_v56 = vmul.bf16 1065369472, %v5412_v8  ;;  %8851 = vst [vmem:[#allocation19_spill] sm:$0xff] %v7412_v31  ;;  %v7417_v22 = vpop.f32.mrb[101].mxu1 }
 0x2c2   : > { %5435 = vpow.bf16 %v4804_v12  ;;  %v5416_v9 = vpop.eup %5415  ;;  %v3480_v43 = vmul.bf16 1065369472, %v5414_v39  ;;  %v7407_v46 = vadd.bf16 %v7017_v18, %v2065_v16  ;;  %8854 = vst [vmem:[#allocation33_spill] sm:$0xff] %v7417_v22  ;;  %v7423_v31 = vpop.f32.mrb[102].mxu1 }
 0x2c3   : > { %5437 = vpow.bf16 %v4903_v10  ;;  %v3587_v8 = vmul.bf16 %v3282_v56, %v7138_v54  ;;  %v3284_v12 = vmul.bf16 1065369472, %v5416_v9  ;;  %v7419_v10 = vpop.f32.mrb[142].mxu0  ;;  %8856 = vst [vmem:[#allocation4_spill] sm:$0xff] %v7423_v31  ;;  %v7428_v22 = vpop.f32.mrb[103].mxu1 }
 0x2c4   : > { %v5418_v27 = vpop.eup %5417  ;;  %5439 = vpow.bf16 %v4805_v42  ;;  %8855 = vst [vmem:[#allocation7_spill] sm:$0xff] %v7419_v10  ;;  %v3686_v39 = vmul.bf16 %v3480_v43, %v7153_v55  ;;  %v7425_v50 = vpop.f32.mrb[143].mxu0  ;;  %8858 = vst [vmem:[#allocation22_spill] sm:$0xff] %v7428_v22 }
 0x2c5   : > { %v5420_v16 = vpop.eup %5419  ;;  %v3498_v24 = vmul.bf16 1065369472, %v5418_v27  ;;  %5441 = vpow.bf16 %v4912_v34  ;;  %8857 = vst [vmem:[#allocation14_spill] sm:$0xff] %v7425_v50  ;;  %v3757_v9 = vunpack.c.l.bf16 %v3587_v8  ;;  %v3767_v42 = vunpack.c.h.bf16 %v3587_v8  ;;  %v7435_v22 = vpop.f32.mrb[144].mxu0 }
 0x2c6   : > { %v5422_v54 = vpop.eup %5421  ;;  %v3588_v56 = vmul.bf16 %v3284_v12, %v7164_v59  ;;  %v3302_v37 = vmul.bf16 1065369472, %v5420_v16  ;;  %v3956_v5 = vunpack.c.l.bf16 %v3686_v39  ;;  %v3966_v33 = vunpack.c.h.bf16 %v3686_v39  ;;  %8859 = vst [vmem:[#allocation21_spill] sm:$0xff] %v7435_v22 }
 0x2c7   : > { %v5424_v10 = vpop.eup %5423  ;;  %v3695_v55 = vmul.bf16 %v3498_v24, %v7234_v47  ;;  %v3500_v34 = vmul.bf16 1065369472, %v5422_v54  ;;  %v4178_v43 = vadd.f32 %v7305_v35, %v3757_v9  ;;  %v7438_v35 = vpop.f32.mrb[104].mxu1 }
 0x2c8   : > { %v5426_v27 = vpop.eup %5425  ;;  %v3758_v13 = vunpack.c.l.bf16 %v3588_v56  ;;  %v3768_v31 = vunpack.c.h.bf16 %v3588_v56  ;;  %v3597_v50 = vmul.bf16 %v3302_v37, %v7237_v15  ;;  %v4167_v8 = vadd.f32 %v7319_v63, %v3956_v5  ;;  %8860 = vst [vmem:[#allocation18_spill] sm:$0xff] %v7438_v35  ;;  %v7440_v9 = vpop.f32.mrb[145].mxu0 }
 0x2c9   : > { %v5428_v26 = vpop.eup %5427  ;;  %v3975_v59 = vunpack.c.l.bf16 %v3695_v55  ;;  %v3985_v12 = vunpack.c.h.bf16 %v3695_v55  ;;  %v3696_v16 = vmul.bf16 %v3500_v34, %v7250_v53  ;;  %v4179_v25 = vadd.f32 %v4178_v43, %v3767_v42  ;;  %8861 = vst [vmem:[#allocation20_spill] sm:$0xff] %v7440_v9  ;;  %v7443_v55 = vpop.f32.mrb[105].mxu1 }
 0x2ca   : > { %v5430_v39 = vpop.eup %5429  ;;  %v4209_v47 = vadd.f32 %v7313_v45, %v3758_v13  ;;  %v3777_v24 = vunpack.c.l.bf16 %v3597_v50  ;;  %v3787_v54 = vunpack.c.h.bf16 %v3597_v50  ;;  %v4168_v37 = vadd.f32 %v4167_v8, %v3966_v33  ;;  %8862 = vst [vmem:[#allocation25_spill] sm:$0xff] %v7443_v55  ;;  %v7445_v53 = vpop.f32.mrb[146].mxu0 }
 0x2cb   : > { %v5432_v15 = vpop.eup %5431  ;;  %v4138_v5 = vadd.f32 %v7333_v30, %v3975_v59  ;;  %v3976_v63 = vunpack.c.l.bf16 %v3696_v16  ;;  %v3986_v56 = vunpack.c.h.bf16 %v3696_v16  ;;  %8863 = vst [vmem:[#allocation23_spill] sm:$0xff] %v7445_v53  ;;  %v3304_v13 = vmul.bf16 1065369472, %v5426_v27  ;;  %v7447_v50 = vpop.f32.mrb[106].mxu1 }
 0x2cc   : > { %v5434_v34 = vpop.eup %5433  ;;  %v4210_v42 = vadd.f32 %v4209_v47, %v3768_v31  ;;  %v4180_v43 = vadd.f32 %v4179_v25, %v3777_v24  ;;  %v3225_v45 = vadd.bf16 1065369472, %v5424_v10  ;;  %8864 = vst [vmem:[#allocation28_spill] sm:$0xff] %v7447_v50  ;;  %v7449_v22 = vpop.f32.mrb[147].mxu0  ;;  %v3127_v30 = vadd.bf16 1065369472, %v5428_v26 }
 0x2cd   : > { %8865 = vst [vmem:[#allocation3_spill] sm:$0xff] %v7449_v22  ;;  %v5436_v9 = vpop.eup %5435  ;;  %v7451_v35 = vadd.f32 %v4138_v5, %v3985_v12  ;;  %v4169_v33 = vadd.f32 %v4168_v37, %v3976_v63  ;;  %v3226_v8 = vadd.bf16 1065369472, %v5430_v39  ;;  %v7453_v59 = vpop.f32.mrb[107].mxu1  ;;  %v3598_v31 = vmul.bf16 %v3304_v13, %v7268_v44  ;;  %v5813_v44 = vld [vmem:[%s8616_s4] sm:$0xff]  ;;  %v8870_v13 = vld [vmem:[#allocation24_spill] sm:$0xff] }
 0x2ce   : > { %8866 = vst [vmem:[#allocation26_spill] sm:$0xff] %v7453_v59  ;;  %v5438_v16 = vpop.eup %5437  ;;  %v7455_v55 = vadd.f32 %v4180_v43, %v3787_v54  ;;  %5443 = vrcp.bf16 %v3225_v45  ;;  %v3128_v25 = vadd.bf16 1065369472, %v5432_v15  ;;  %v3235_v47 = vadd.bf16 1065369472, %v5434_v34  ;;  %v8871_v45 = vld [vmem:[#allocation29_spill] sm:$0xff] }
 0x2cf   : > { %v5440_v10 = vpop.eup %5439  ;;  %v7458_v27 = vadd.f32 %v4169_v33, %v3986_v56  ;;  %5445 = vrcp.bf16 %v3127_v30  ;;  %v3137_v24 = vadd.bf16 1065369472, %v5436_v9  ;;  %v3778_v5 = vunpack.c.l.bf16 %v3598_v31  ;;  %v7465_v56 = vpop.f32.mrb[148].mxu0 }
 0x2d0   : > { %v5442_v12 = vpop.eup %5441  ;;  %v3788_v37 = vunpack.c.h.bf16 %v3598_v31  ;;  %5447 = vrcp.bf16 %v3226_v8  ;;  %v3236_v26 = vadd.bf16 1065369472, %v5438_v16  ;;  %v3138_v39 = vadd.bf16 1065369472, %v5440_v10  ;;  %8868 = vst [vmem:[#allocation62_spill] sm:$0xff] %v7465_v56  ;;  %v7475_v30 = vpop.f32.mrb[108].mxu1 }
 0x2d1   : > { %5449 = vrcp.bf16 %v3128_v25  ;;  %v3245_v63 = vadd.bf16 1065369472, %v5442_v12  ;;  %v8867_v54 = vsub.s32 6, %v8849_v3  ;;  %v4211_v43 = vadd.f32 %v4210_v42, %v3778_v5  ;;  %8872 = vst [vmem:[#allocation24_spill] sm:$0xff] %v7475_v30  ;;  %v7477_v8 = vpop.f32.mrb[149].mxu0  ;;  %v8874_v25 = vld [vmem:[#allocation27_spill] sm:$0xff] }
 0x2d2   : > { %5451 = vrcp.bf16 %v3235_v47  ;;  %v8869_v9 = vpack.c.bf16 %v8853_v7, %v8852_v11  ;;  %v2008_v33 = vpack.c.bf16 %v8871_v45, %v8870_v13  ;;  %8873 = vst [vmem:[#allocation29_spill] sm:$0xff] %v7477_v8  ;;  %v8657_v31 = vsub.s32 7, %v8849_v3  ;;  %v8875_v42 = vld [vmem:[#allocation37_spill] sm:$0xff]  ;;  %v7482_v47 = vpop.f32.mrb[109].mxu1  ;;  %v7484_v7 = vpop.f32.mrb[150].mxu0  ;;  %v8878_v5 = vld [vmem:[#allocation30_spill] sm:$0xff] }
 0x2d3   : > { %v2190_v15 = vrot.slane %v5813_v44, %v8867_v54  ;;  %5453 = vrcp.bf16 %v3137_v24  ;;  %v2075_v10 = vpack.c.bf16 %v8875_v42, %v8874_v25  ;;  %8876 = vst [vmem:[#allocation27_spill] sm:$0xff] %v7482_v47  ;;  %8877 = vst [vmem:[#allocation37_spill] sm:$0xff] %v7484_v7  ;;  %v7486_v11 = vadd.f32 %v4211_v43, %v3788_v37  ;;  %v8879_v54 = vld [vmem:[#allocation36_spill] sm:$0xff]  ;;  %v7491_v13 = vpop.f32.mrb[110].mxu1  ;;  %v7493_v24 = vpop.f32.mrb[151].mxu0  ;;  %v8885_v43 = vld [vmem:[#allocation39_spill] sm:$0xff] }
 0x2d4   : > { %v7471_v34 = vadd.bf16 %v7116_v61, %v8869_v9  ;;  %5455 = vrcp.bf16 %v3236_v26  ;;  %v2017_v9 = vpack.c.bf16 %v8879_v54, %v8878_v5  ;;  %8880 = vst [vmem:[#allocation30_spill] sm:$0xff] %v7491_v13  ;;  %8881 = vst [vmem:[#allocation36_spill] sm:$0xff] %v7493_v24  ;;  %v2194_v45 = vrot.slane %v5813_v44, %v8657_v31  ;;  %v7500_v37 = vpop.f32.mrb[111].mxu1  ;;  %v8884_v26 = vld [vmem:[#allocation35_spill] sm:$0xff]  ;;  %v8886_v8 = vld [vmem:[#allocation34_spill] sm:$0xff]  ;;  %v7535_v54 = vpop.f32.mrb[152].mxu0 }
 0x2d5   : > { %v2219_v16 = vpack.c.bf16 %v2190_v15, %v2190_v15  ;;  %5457 = vrcp.bf16 %v3138_v39  ;;  %v7498_v25 = vadd.bf16 %v7017_v18, %v2075_v10  ;;  %8883 = vst [vmem:[#allocation64_spill] sm:$0xff] %v7500_v37  ;;  %v2076_v42 = vpack.c.bf16 %v8885_v43, %v8884_v26  ;;  %v8887_v5 = vld [vmem:[#allocation38_spill] sm:$0xff]  ;;  %8893 = vst [vmem:[#allocation35_spill] sm:$0xff] %v7535_v54 }
 0x2d6   : > { %v4825_v12 = vmul.bf16 3216621497, %v7471_v34  ;;  %5459 = vrcp.bf16 %v3245_v63  ;;  %v2085_v24 = vpack.c.bf16 %v7203_v51, %v7192_v52  ;;  %v8888_v39 = vmul.bf16 3216621497, %v7388_v20 }
 0x2d7   : > { %v2266_v15 = vpack.i.b16 %v2219_v16, %v2219_v16  ;;  %8882 = vst [vmem:[#allocation63_spill] sm:$0xff] %v7498_v25  ;;  %v8889_v16 = vld [vmem:[#allocation10_spill] sm:$0xff]  ;;  %v2220_v10 = vpack.c.bf16 %v2194_v45, %v2194_v45  ;;  %v4834_v31 = vmul.bf16 3216621497, %v7498_v25  ;;  %v8890_v63 = vmul.bf16 3216621497, %v7391_v41 }
 0x2d8   : > { %5461 = vpow.bf16 %v8888_v39  ;;  %v7517_v26 = vadd.bf16 %v7116_v61, %v2076_v42  ;;  %v7520_v43 = vadd.bf16 %v7017_v18, %v2085_v24  ;;  %v8891_v39 = vmul.bf16 3216621497, %v7394_v49 }
 0x2d9   : > { %v7511_v44 = vrot.slane %v2266_v15, %v8889_v16  ;;  %5463 = vpow.bf16 %v8890_v63  ;;  %v5444_v51 = vpop.eup %5443  ;;  %v8892_v15 = vpack.c.bf16 %v8847_v40, %v8846_v0  ;;  %v2273_v63 = vpack.i.b16 %v2220_v10, %v2220_v10 }
 0x2da   : > { %5465 = vpow.bf16 %v8891_v39  ;;  %v5446_v24 = vpop.eup %5445  ;;  %v3518_v3 = vmul.bf16 1065369472, %v5444_v51  ;;  %v8894_v52 = vmul.bf16 3216621497, %v7407_v46 }
 0x2db   : > { %v7530_v45 = vadd.bf16 %v7511_v44, %v8892_v15  ;;  %v7533_v42 = vadd.bf16 %v7511_v44, %v2017_v9  ;;  %v5448_v47 = vpop.eup %5447  ;;  %v3322_v0 = vmul.bf16 1065369472, %v5446_v24  ;;  %v7543_v10 = vrot.slane %v2273_v63, %v8889_v16  ;;  %v7545_v9 = vpop.f32.mrb[112].mxu1 }
 0x2dc   : > { %5467 = vpow.bf16 %v8894_v52  ;;  %8895 = vst [vmem:[#allocation39_spill] sm:$0xff] %v7545_v9  ;;  %v7547_v15 = vpop.f32.mrb[153].mxu0  ;;  %v5450_v51 = vpop.eup %5449  ;;  %v3705_v54 = vmul.bf16 %v3518_v3, %v7286_v60  ;;  %v3520_v52 = vmul.bf16 1065369472, %v5448_v47 }
 0x2dd   : > { %v4766_v40 = vmul.bf16 3216621497, %v7530_v45  ;;  %5469 = vpow.bf16 %v4825_v12  ;;  %8896 = vst [vmem:[#allocation34_spill] sm:$0xff] %v7547_v15  ;;  %v7551_v39 = vpop.f32.mrb[113].mxu1  ;;  %v7553_v24 = vpop.f32.mrb[154].mxu0  ;;  %v3607_v12 = vmul.bf16 %v3322_v0, %v7292_v2  ;;  %v7557_v9 = vadd.bf16 %v7543_v10, %v2008_v33 }
 0x2de   : > { %5471 = vpow.bf16 %v4834_v31  ;;  %8897 = vst [vmem:[#allocation38_spill] sm:$0xff] %v7551_v39  ;;  %8898 = vst [vmem:[#allocation65_spill] sm:$0xff] %v7553_v24  ;;  %v5452_v7 = vpop.eup %5451  ;;  %v3324_v63 = vmul.bf16 1065369472, %v5450_v51  ;;  %v7559_v15 = vpop.f32.mrb[114].mxu1  ;;  %v3995_v3 = vunpack.c.l.bf16 %v3705_v54  ;;  %v4005_v31 = vunpack.c.h.bf16 %v3705_v54 }
 0x2df   : > { %5473 = vpow.bf16 %v4766_v40  ;;  %8899 = vst [vmem:[#allocation66_spill] sm:$0xff] %v7559_v15  ;;  %v7561_v56 = vpop.f32.mrb[155].mxu0  ;;  %v5454_v60 = vpop.eup %5453  ;;  %v3706_v47 = vmul.bf16 %v3520_v52, %v7325_v17  ;;  %v3538_v37 = vmul.bf16 1065369472, %v5452_v7  ;;  %v3797_v13 = vunpack.c.l.bf16 %v3607_v12 }
 0x2e0   : > { %8900 = vst [vmem:[#allocation67_spill] sm:$0xff] %v7561_v56  ;;  %v7564_v39 = vpop.f32.mrb[115].mxu1  ;;  %v5456_v24 = vpop.eup %5455  ;;  %v3807_v2 = vunpack.c.h.bf16 %v3607_v12  ;;  %v3608_v0 = vmul.bf16 %v3324_v63, %v7337_v28  ;;  %v3342_v40 = vmul.bf16 1065369472, %v5454_v60  ;;  %v4140_v51 = vadd.f32 %v7451_v35, %v3995_v3 }
 0x2e1   : > { %8901 = vst [vmem:[#allocation68_spill] sm:$0xff] %v7564_v39  ;;  %v5458_v33 = vpop.eup %5457  ;;  %v3996_v15 = vunpack.c.l.bf16 %v3706_v47  ;;  %v4006_v30 = vunpack.c.h.bf16 %v3706_v47  ;;  %v3715_v56 = vmul.bf16 %v3538_v37, %v7342_v38  ;;  %v4182_v54 = vadd.f32 %v7455_v55, %v3797_v13 }
 0x2e2   : > { %v5460_v22 = vpop.eup %5459  ;;  %v3798_v17 = vunpack.c.l.bf16 %v3608_v0  ;;  %v3808_v7 = vunpack.c.h.bf16 %v3608_v0  ;;  %v3617_v52 = vmul.bf16 %v3342_v40, %v7345_v21  ;;  %v4141_v59 = vadd.f32 %v4140_v51, %v4005_v31 }
 0x2e3   : > { %v5462_v39 = vpop.eup %5461  ;;  %v4171_v12 = vadd.f32 %v7458_v27, %v3996_v15  ;;  %v4015_v28 = vunpack.c.l.bf16 %v3715_v56  ;;  %v4025_v63 = vunpack.c.h.bf16 %v3715_v56  ;;  %v4183_v53 = vadd.f32 %v4182_v54, %v3807_v2 }
 0x2e4   : > { %v5464_v60 = vpop.eup %5463  ;;  %v4213_v35 = vadd.f32 %v7486_v11, %v3798_v17  ;;  %v3817_v3 = vunpack.c.l.bf16 %v3617_v52  ;;  %v3827_v47 = vunpack.c.h.bf16 %v3617_v52  ;;  %v3540_v55 = vmul.bf16 1065369472, %v5456_v24 }
 0x2e5   : > { %v5466_v38 = vpop.eup %5465  ;;  %v4172_v37 = vadd.f32 %v4171_v12, %v4006_v30  ;;  %v4142_v50 = vadd.f32 %v4141_v59, %v4015_v28  ;;  %v3344_v13 = vmul.bf16 1065369472, %v5458_v33  ;;  %v3558_v40 = vmul.bf16 1065369472, %v5460_v22 }
 0x2e6   : > { %v4214_v25 = vadd.f32 %v4213_v35, %v3808_v7  ;;  %v4184_v21 = vadd.f32 %v4183_v53, %v3817_v3  ;;  %v3147_v31 = vadd.bf16 1065369472, %v5462_v39  ;;  %v3716_v56 = vmul.bf16 %v3540_v55, %v7363_v62  ;;  %v7583_v3 = vpop.f32.mrb[156].mxu0 }
 0x2e7   : > { %v5468_v0 = vpop.eup %5467  ;;  %v4143_v27 = vadd.f32 %v4142_v50, %v4025_v63  ;;  %v3618_v15 = vmul.bf16 %v3344_v13, %v7370_v29  ;;  %v3246_v2 = vadd.bf16 1065369472, %v5464_v60  ;;  %v3725_v30 = vmul.bf16 %v3558_v40, %v7385_v19  ;;  %v8904_v40 = vld [vmem:[#allocation41_spill] sm:$0xff] }
 0x2e8   : > { %v5470_v51 = vpop.eup %5469  ;;  %v7575_v54 = vadd.f32 %v4184_v21, %v3827_v47  ;;  %5475 = vrcp.bf16 %v3147_v31  ;;  %v3148_v59 = vadd.bf16 1065369472, %v5466_v38  ;;  %v4016_v33 = vunpack.c.l.bf16 %v3716_v56  ;;  %v7585_v47 = vpop.f32.mrb[116].mxu1 }
 0x2e9   : > { %v5472_v11 = vpop.eup %5471  ;;  %v4026_v17 = vunpack.c.h.bf16 %v3716_v56  ;;  %v3818_v53 = vunpack.c.l.bf16 %v3618_v15  ;;  %v3828_v22 = vunpack.c.h.bf16 %v3618_v15  ;;  %v4035_v39 = vunpack.c.l.bf16 %v3725_v30  ;;  %v7601_v21 = vpop.f32.mrb[117].mxu1 }
 0x2ea   : > { %v5474_v24 = vpop.eup %5473  ;;  %v4045_v7 = vunpack.c.h.bf16 %v3725_v30  ;;  %5477 = vrcp.bf16 %v3246_v2  ;;  %v3157_v50 = vadd.bf16 1065369472, %v5468_v0  ;;  %v4173_v62 = vadd.f32 %v4172_v37, %v4016_v33  ;;  %v7599_v0 = vpop.f32.mrb[157].mxu0 }
 0x2eb   : > { %v4215_v52 = vadd.f32 %v4214_v25, %v3818_v53  ;;  %5479 = vrcp.bf16 %v3148_v59  ;;  %v3099_v29 = vadd.bf16 1065369472, %v5474_v24  ;;  %v4144_v12 = vadd.f32 %v4143_v27, %v4035_v39  ;;  %v8906_v27 = vld [vmem:[#allocation42_spill] sm:$0xff]  ;;  %v7609_v56 = vpop.f32.mrb[158].mxu0 }
 0x2ec   : > { %5481 = vrcp.bf16 %v3157_v50  ;;  %v3158_v28 = vadd.bf16 1065369472, %v5470_v51  ;;  %v4767_v19 = vmul.bf16 3216621497, %v7557_v9  ;;  %v7579_v63 = vadd.f32 %v4173_v62, %v4026_v17  ;;  %v8905_v51 = vld [vmem:[#allocation40_spill] sm:$0xff] }
 0x2ed   : > { %v7581_v60 = vadd.f32 %v4215_v52, %v3828_v22  ;;  %5483 = vrcp.bf16 %v3099_v29  ;;  %v3167_v35 = vadd.bf16 1065369472, %v5472_v11  ;;  %v4145_v38 = vadd.f32 %v4144_v12, %v4045_v7  ;;  %v7615_v11 = vpop.f32.mrb[159].mxu0  ;;  %v7639_v22 = vld [vmem:[%s8617_s5] sm:$0xff]  ;;  %v8910_v52 = vld [vmem:[#allocation52_spill] sm:$0xff] }
 0x2ee   : > { %5485 = vrcp.bf16 %v3158_v28  ;;  %v8902_v25 = vpack.c.bf16 %v8887_v5, %v8886_v8  ;;  %v8903_v55 = vpack.c.bf16 %v7200_v4, %v7189_v48  ;;  %v2086_v31 = vpack.c.bf16 %v7207_v23, %v8904_v40  ;;  %v7611_v48 = vpop.f32.mrb[118].mxu1 }
 0x2ef   : > { %5487 = vpow.bf16 %v4767_v19  ;;  %v2028_v8 = vpack.c.bf16 %v8906_v27, %v8905_v51  ;;  %v2095_v5 = vpack.c.bf16 %v7227_v1, %v7215_v14  ;;  %v4378_v4 = vrot.slane %v4145_v38, 4  ;;  %v7628_v59 = vpop.f32.mrb[119].mxu1  ;;  %v8913_v19 = vld [vmem:[#allocation43_spill] sm:$0xff] }
 0x2f0   : > { %v7591_v37 = vadd.bf16 %v7543_v10, %v8902_v25  ;;  %v7597_v13 = vadd.bf16 %v7511_v44, %v8903_v55  ;;  %5489 = vrcp.bf16 %v3167_v35  ;;  %v8907_v23 = vmul.bf16 3216621497, %v7533_v42  ;;  %v8915_v25 = vld [vmem:[#allocation46_spill] sm:$0xff]  ;;  %v7658_v51 = vpop.f32.mrb[120].mxu1 }
 0x2f1   : > { %v7620_v30 = vadd.bf16 %v7116_v61, %v2086_v31  ;;  %v7623_v14 = vadd.bf16 %v7543_v10, %v2028_v8  ;;  %v7626_v1 = vadd.bf16 %v7017_v18, %v2095_v5  ;;  %v8908_v24 = vmul.bf16 3216621497, %v7517_v26  ;;  %v8916_v55 = vld [vmem:[#allocation50_spill] sm:$0xff]  ;;  %v7656_v31 = vpop.f32.mrb[160].mxu0  ;;  %8918 = vst [vmem:[#allocation40_spill] sm:$0xff] %v7658_v51 }
 0x2f2   : > { %v4777_v15 = vmul.bf16 3216621497, %v7591_v37  ;;  %v4786_v2 = vmul.bf16 3216621497, %v7597_v13  ;;  %5491 = vpow.bf16 %v8907_v23  ;;  %v2037_v33 = vpack.c.bf16 %v7225_v32, %v7211_v6  ;;  %8917 = vst [vmem:[#allocation41_spill] sm:$0xff] %v7656_v31 }
 0x2f3   : > { %5493 = vpow.bf16 %v8908_v24  ;;  %v2096_v17 = vpack.c.bf16 %v7239_v36, %v7223_v58  ;;  %v5476_v53 = vpop.eup %5475  ;;  %v8909_v39 = vrot.slane %v7260_v57, 1  ;;  %v4845_v50 = vmul.bf16 3216621497, %v7620_v30  ;;  %v8921_v24 = vld [vmem:[#allocation11_spill] sm:$0xff] }
 0x2f4   : > { %5495 = vpow.bf16 %v4777_v15  ;;  %v4787_v62 = vmul.bf16 3216621497, %v7623_v14  ;;  %v8911_v6 = vrot.slane %v8910_v52, 1  ;;  %v4379_v58 = vadd.f32 %v4378_v4, %v4145_v38  ;;  %v7663_v4 = vpop.f32.mrb[161].mxu0  ;;  %v7665_v15 = vpop.f32.mrb[121].mxu1 }
 0x2f5   : > { %v4371_v7 = vadd.f32 %v8909_v39, %v7260_v57  ;;  %v3362_v36 = vmul.bf16 1065369472, %v5476_v53  ;;  %v8912_v29 = vmul.bf16 3216621497, %v7520_v43  ;;  %v5478_v12 = vpop.eup %5477  ;;  %v4854_v28 = vmul.bf16 3216621497, %v7626_v1 }
 0x2f6   : > { %v4377_v32 = vadd.f32 %v8911_v6, %v8910_v52  ;;  %v8914_v57 = vld [vmem:[#allocation44_spill] sm:$0xff]  ;;  %v5480_v27 = vpop.eup %5479  ;;  %v3560_v5 = vmul.bf16 1065369472, %v5478_v12  ;;  %8919 = vst [vmem:[#allocation42_spill] sm:$0xff] %v7663_v4  ;;  %8920 = vst [vmem:[#allocation52_spill] sm:$0xff] %v7665_v15 }
 0x2f7   : > { %5497 = vpow.bf16 %v8912_v29  ;;  %v3627_v8 = vmul.bf16 %v3362_v36, %v7388_v20  ;;  %v7667_v23 = vmul.f32 0.00390625, %v4371_v7  ;;  %v3364_v39 = vmul.bf16 1065369472, %v5480_v27  ;;  %v7676_v36 = vpop.f32.mrb[122].mxu1 }
 0x2f8   : > { %5499 = vpow.bf16 %v4786_v2  ;;  %v5482_v2 = vpop.eup %5481  ;;  %v7671_v6 = vmul.f32 0.00390625, %v4377_v32  ;;  %v4380_v29 = vrot.slane %v4379_v58, 2  ;;  %v3726_v20 = vmul.bf16 %v3560_v5, %v7391_v41  ;;  %8924 = vst [vmem:[#allocation46_spill] sm:$0xff] %v7676_v36 }
 0x2f9   : > { %5501 = vpow.bf16 %v4845_v50  ;;  %v5484_v52 = vpop.eup %5483  ;;  %v3837_v38 = vunpack.c.l.bf16 %v3627_v8  ;;  %v7674_v50 = vpop.f32.mrb[162].mxu0  ;;  %v3628_v7 = vmul.bf16 %v3364_v39, %v7394_v49  ;;  %v3382_v40 = vmul.bf16 1065369472, %v5482_v2 }
 0x2fa   : > { %5503 = vpow.bf16 %v4787_v62  ;;  %8922 = vst [vmem:[#allocation43_spill] sm:$0xff] %v7671_v6  ;;  %8923 = vst [vmem:[#allocation44_spill] sm:$0xff] %v7674_v50  ;;  %v5486_v12 = vpop.eup %5485  ;;  %v3266_v35 = vmul.bf16 1065369472, %v5484_v52  ;;  %v7679_v53 = vpop.f32.mrb[163].mxu0  ;;  %v3847_v27 = vunpack.c.h.bf16 %v3627_v8  ;;  %v4036_v15 = vunpack.c.l.bf16 %v3726_v20 }
 0x2fb   : > { %5505 = vpow.bf16 %v4854_v28  ;;  %8925 = vst [vmem:[#allocation50_spill] sm:$0xff] %v7679_v53  ;;  %v7681_v62 = vpop.f32.mrb[123].mxu1  ;;  %v5488_v32 = vpop.eup %5487  ;;  %v4186_v6 = vadd.f32 %v7575_v54, %v3837_v38  ;;  %v7685_v41 = vadd.bf16 %v7511_v44, %v2037_v33  ;;  %v4046_v4 = vunpack.c.h.bf16 %v3726_v20 }
 0x2fc   : > { %8926 = vst [vmem:[#allocation69_spill] sm:$0xff] %v7681_v62  ;;  %v5490_v5 = vpop.eup %5489  ;;  %v3838_v36 = vunpack.c.l.bf16 %v3628_v7  ;;  %v3637_v49 = vmul.bf16 %v3382_v40, %v7407_v46  ;;  %v7689_v2 = vadd.bf16 %v7116_v61, %v2096_v17  ;;  %v4175_v52 = vadd.f32 %v7579_v63, %v4036_v15  ;;  %v7698_v51 = vpop.f32.mrb[164].mxu0 }
 0x2fd   : > { %v5492_v28 = vpop.eup %5491  ;;  %v4187_v39 = vadd.f32 %v4186_v6, %v3847_v27  ;;  %v7693_v8 = vmul.bf16 %v3266_v35, %v7530_v45  ;;  %v3384_v54 = vmul.bf16 1065369472, %v5486_v12  ;;  %v7695_v62 = vadd.f32 %v4380_v29, %v4379_v58  ;;  %8928 = vst [vmem:[#allocation71_spill] sm:$0xff] %v7698_v51  ;;  %v7700_v46 = vpop.f32.mrb[124].mxu1 }
 0x2fe   : > { %v5494_v38 = vpop.eup %5493  ;;  %v3848_v33 = vunpack.c.h.bf16 %v3628_v7  ;;  %v4217_v20 = vadd.f32 %v7581_v60, %v3838_v36  ;;  %v3857_v53 = vunpack.c.l.bf16 %v3637_v49  ;;  %8929 = vst [vmem:[#allocation72_spill] sm:$0xff] %v7700_v46  ;;  %v4176_v40 = vadd.f32 %v4175_v52, %v4046_v4  ;;  %v7703_v45 = vpop.f32.mrb[165].mxu0  ;;  %v8933_v52 = vld [vmem:[#allocation63_spill] sm:$0xff] }
 0x2ff   : > { %8927 = vst [vmem:[#allocation70_spill] sm:$0xff] %v7695_v62  ;;  %v5496_v17 = vpop.eup %5495  ;;  %v3867_v6 = vunpack.c.h.bf16 %v3637_v49  ;;  %v3638_v63 = vmul.bf16 %v3384_v54, %v7471_v34  ;;  %v3100_v15 = vadd.bf16 1065369472, %v5488_v32  ;;  %8930 = vst [vmem:[#allocation73_spill] sm:$0xff] %v7703_v45  ;;  %v7705_v35 = vpop.f32.mrb[125].mxu1  ;;  %v3739_v46 = vunpack.c.l.bf16 %v7693_v8 }
 0x300   : > { %8931 = vst [vmem:[#allocation74_spill] sm:$0xff] %v7705_v35  ;;  %v4218_v29 = vadd.f32 %v4217_v20, %v3848_v33  ;;  %v4188_v12 = vadd.f32 %v4187_v39, %v3857_v53  ;;  %v3402_v7 = vmul.bf16 1065369472, %v5490_v5  ;;  %v3109_v60 = vadd.bf16 1065369472, %v5492_v28  ;;  %v7707_v36 = vpop.f32.mrb[166].mxu0 }
 0x301   : > { %8932 = vst [vmem:[#allocation75_spill] sm:$0xff] %v7707_v36  ;;  %v3858_v51 = vunpack.c.l.bf16 %v3638_v63  ;;  %v4796_v4 = vmul.bf16 3216621497, %v7685_v41  ;;  %v4855_v34 = vmul.bf16 3216621497, %v7689_v2  ;;  %5507 = vrcp.bf16 %v3100_v15  ;;  %v7713_v36 = vpop.f32.mrb[126].mxu1 }
 0x302   : > { %v5498_v58 = vpop.eup %5497  ;;  %v4189_v49 = vadd.f32 %v4188_v12, %v3867_v6  ;;  %v3647_v54 = vmul.bf16 %v3402_v7, %v8933_v52  ;;  %v3168_v35 = vadd.bf16 1065369472, %v5494_v38  ;;  %v3868_v53 = vunpack.c.h.bf16 %v3638_v63  ;;  %8934 = vst [vmem:[#allocation63_spill] sm:$0xff] %v7713_v36  ;;  %v7717_v63 = vpop.f32.mrb[167].mxu0 }
 0x303   : > { %v5500_v27 = vpop.eup %5499  ;;  %v4219_v5 = vadd.f32 %v4218_v29, %v3858_v51  ;;  %5509 = vrcp.bf16 %v3109_v60  ;;  %v3110_v28 = vadd.bf16 1065369472, %v5496_v17  ;;  %v4384_v39 = vrot.slane %v4176_v40, 4  ;;  %8935 = vst [vmem:[#allocation76_spill] sm:$0xff] %v7717_v63  ;;  %v7719_v51 = vpop.f32.mrb[127].mxu1 }
 0x304   : > { %v5502_v32 = vpop.eup %5501  ;;  %v3877_v20 = vunpack.c.l.bf16 %v3647_v54  ;;  %5511 = vrcp.bf16 %v3168_v35  ;;  %v3177_v45 = vadd.bf16 1065369472, %v5498_v58  ;;  %v3887_v31 = vunpack.c.h.bf16 %v3647_v54  ;;  %8936 = vst [vmem:[#allocation77_spill] sm:$0xff] %v7719_v51 }
 0x305   : > { %v5504_v33 = vpop.eup %5503  ;;  %v7715_v50 = vadd.f32 %v4219_v5, %v3868_v53  ;;  %5513 = vrcp.bf16 %v3110_v28  ;;  %v3119_v6 = vadd.bf16 1065369472, %v5500_v27  ;;  %v3178_v38 = vadd.bf16 1065369472, %v5502_v32  ;;  %v8939_v27 = vld [vmem:[#allocation45_spill] sm:$0xff]  ;;  %v8945_v5 = vld [vmem:[#allocation55_spill] sm:$0xff] }
 0x306   : > { %v5506_v62 = vpop.eup %5505  ;;  %v4190_v15 = vadd.f32 %v4189_v49, %v3877_v20  ;;  %5515 = vrcp.bf16 %v3177_v45  ;;  %v3120_v12 = vadd.bf16 1065369472, %v5504_v33  ;;  %v3749_v17 = vunpack.c.h.bf16 %v7693_v8  ;;  %v8940_v32 = vld [vmem:[#allocation49_spill] sm:$0xff]  ;;  %v8946_v28 = vld [vmem:[#allocation59_spill] sm:$0xff] }
 0x307   : > { %5517 = vrcp.bf16 %v3119_v6  ;;  %v3187_v35 = vadd.bf16 1065369472, %v5506_v62  ;;  %v8937_v58 = vpack.c.bf16 %v8914_v57, %v8913_v19  ;;  %v8938_v45 = vpack.c.bf16 %v8916_v55, %v8915_v25  ;;  %v8941_v57 = vld [vmem:[#allocation48_spill] sm:$0xff]  ;;  %v8942_v62 = vld [vmem:[#allocation53_spill] sm:$0xff]  ;;  %v8943_v25 = vld [vmem:[#allocation47_spill] sm:$0xff] }
 0x308   : > { %v7728_v7 = vadd.f32 %v4190_v15, %v3887_v31  ;;  %5519 = vrcp.bf16 %v3178_v38  ;;  %v2047_v8 = vpack.c.bf16 %v8940_v32, %v8939_v27  ;;  %v7738_v49 = vadd.f32 %v4384_v39, %v4176_v40  ;;  %v8944_v55 = vld [vmem:[#allocation51_spill] sm:$0xff]  ;;  %v8947_v15 = vld [vmem:[#allocation54_spill] sm:$0xff] }
 0x309   : > { %v7726_v29 = vadd.bf16 %v7543_v10, %v8937_v58  ;;  %v7734_v60 = vadd.bf16 %v7017_v18, %v8938_v45  ;;  %5521 = vrcp.bf16 %v3120_v12  ;;  %v2106_v52 = vpack.c.bf16 %v8942_v62, %v8941_v57  ;;  %v8948_v38 = vld [vmem:[#allocation58_spill] sm:$0xff] }
 0x30a   : > { %5523 = vrcp.bf16 %v3187_v35  ;;  %v7745_v54 = vadd.bf16 %v7511_v44, %v2047_v8  ;;  %v2048_v33 = vpack.c.bf16 %v8944_v55, %v8943_v25  ;;  %v4239_v53 = vadd.f32 %v3749_v17, %v3739_v46  ;;  %v7765_v17 = vpop.f32.mrb[168].mxu0  ;;  %v8953_v55 = vld [vmem:[#allocation57_spill] sm:$0xff] }
 0x30b   : > { %v4797_v19 = vmul.bf16 3216621497, %v7726_v29  ;;  %v4864_v31 = vmul.bf16 3216621497, %v7734_v60  ;;  %5525 = vpow.bf16 %v4796_v4  ;;  %v7750_v40 = vadd.bf16 %v7116_v61, %v2106_v52  ;;  %8949 = vst [vmem:[#allocation45_spill] sm:$0xff] %v7765_v17  ;;  %v7773_v57 = vpop.f32.mrb[169].mxu0 }
 0x30c   : > { %v2115_v39 = vpack.c.bf16 %v8946_v28, %v8945_v5  ;;  %5527 = vpow.bf16 %v4855_v34  ;;  %v4806_v20 = vmul.bf16 3216621497, %v7745_v54  ;;  %v7756_v6 = vadd.bf16 %v7543_v10, %v2048_v33  ;;  %v5508_v35 = vpop.eup %5507  ;;  %v7767_v34 = vpop.f32.mrb[128].mxu1  ;;  %8951 = vst [vmem:[#allocation48_spill] sm:$0xff] %v7773_v57  ;;  %v8954_v33 = vld [vmem:[#allocation61_spill] sm:$0xff] }
 0x30d   : > { %v2057_v12 = vpack.c.bf16 %v8948_v38, %v8947_v15  ;;  %5529 = vpow.bf16 %v4797_v19  ;;  %v4865_v46 = vmul.bf16 3216621497, %v7750_v40  ;;  %8950 = vst [vmem:[#allocation49_spill] sm:$0xff] %v7767_v34  ;;  %v3268_v27 = vmul.bf16 1065369472, %v5508_v35  ;;  %v7775_v19 = vpop.f32.mrb[129].mxu1 }
 0x30e   : > { %v7763_v4 = vadd.bf16 %v7017_v18, %v2115_v39  ;;  %v5510_v45 = vpop.eup %5509  ;;  %5531 = vpow.bf16 %v4864_v31  ;;  %v4807_v32 = vmul.bf16 3216621497, %v7756_v6  ;;  %8952 = vst [vmem:[#allocation53_spill] sm:$0xff] %v7775_v19  ;;  %v2116_v5 = vpack.c.bf16 %v8954_v33, %v8953_v55  ;;  %v7780_v28 = vpop.f32.mrb[170].mxu0 }
 0x30f   : > { %v7771_v8 = vadd.bf16 %v7511_v44, %v2057_v12  ;;  %v5512_v62 = vpop.eup %5511  ;;  %v3286_v52 = vmul.bf16 1065369472, %v5510_v45  ;;  %5533 = vpow.bf16 %v4806_v20  ;;  %8955 = vst [vmem:[#allocation47_spill] sm:$0xff] %v7780_v28  ;;  %v7782_v31 = vpop.f32.mrb[130].mxu1  ;;  %v3580_v15 = vmul.bf16 %v3268_v27, %v7557_v9 }
 0x310   : > { %8956 = vst [vmem:[#allocation51_spill] sm:$0xff] %v7782_v31  ;;  %v5514_v39 = vpop.eup %5513  ;;  %v3404_v38 = vmul.bf16 1065369472, %v5512_v62  ;;  %5535 = vpow.bf16 %v4865_v46  ;;  %v7786_v35 = vpop.f32.mrb[171].mxu0  ;;  %v7792_v55 = vadd.bf16 %v7116_v61, %v2116_v5 }
 0x311   : > { %8957 = vst [vmem:[#allocation55_spill] sm:$0xff] %v7786_v35  ;;  %v7788_v45 = vpop.f32.mrb[131].mxu1  ;;  %v5516_v20 = vpop.eup %5515  ;;  %v3589_v58 = vmul.bf16 %v3286_v52, %v7533_v42  ;;  %v3288_v25 = vmul.bf16 1065369472, %v5514_v39  ;;  %5537 = vpow.bf16 %v4807_v32  ;;  %v3740_v19 = vunpack.c.l.bf16 %v3580_v15 }
 0x312   : > { %8958 = vst [vmem:[#allocation59_spill] sm:$0xff] %v7788_v45  ;;  %v5518_v33 = vpop.eup %5517  ;;  %v3750_v57 = vunpack.c.h.bf16 %v3580_v15  ;;  %v3648_v9 = vmul.bf16 %v3404_v38, %v7517_v26  ;;  %v3422_v46 = vmul.bf16 1065369472, %v5516_v20  ;;  %v7798_v26 = vpop.f32.mrb[172].mxu0 }
 0x313   : > { %v5520_v27 = vpop.eup %5519  ;;  %v3759_v62 = vunpack.c.l.bf16 %v3589_v58  ;;  %v3769_v12 = vunpack.c.h.bf16 %v3589_v58  ;;  %v3590_v35 = vmul.bf16 %v3288_v25, %v7591_v37  ;;  %v3306_v45 = vmul.bf16 1065369472, %v5518_v33  ;;  %8959 = vst [vmem:[#allocation54_spill] sm:$0xff] %v7798_v26  ;;  %v7800_v38 = vpop.f32.mrb[132].mxu1 }
 0x314   : > { %v5522_v31 = vpop.eup %5521  ;;  %v4270_v34 = vadd.f32 %v3750_v57, %v3740_v19  ;;  %v3878_v42 = vunpack.c.l.bf16 %v3648_v9  ;;  %v3888_v52 = vunpack.c.h.bf16 %v3648_v9  ;;  %v3657_v32 = vmul.bf16 %v3422_v46, %v7520_v43  ;;  %8960 = vst [vmem:[#allocation58_spill] sm:$0xff] %v7800_v38  ;;  %v7803_v19 = vpop.f32.mrb[173].mxu0 }
 0x315   : > { %v5524_v5 = vpop.eup %5523  ;;  %v4240_v39 = vadd.f32 %v4239_v53, %v3759_v62  ;;  %v3760_v28 = vunpack.c.l.bf16 %v3590_v35  ;;  %v3770_v17 = vunpack.c.h.bf16 %v3590_v35  ;;  %v3599_v15 = vmul.bf16 %v3306_v45, %v7597_v13  ;;  %8961 = vst [vmem:[#allocation57_spill] sm:$0xff] %v7803_v19  ;;  %v7805_v33 = vpop.f32.mrb[133].mxu1 }
 0x316   : > { %v5526_v58 = vpop.eup %5525  ;;  %v4221_v37 = vadd.f32 %v7715_v50, %v3878_v42  ;;  %v3897_v25 = vunpack.c.l.bf16 %v3657_v32  ;;  %v3907_v20 = vunpack.c.h.bf16 %v3657_v32  ;;  %v3424_v57 = vmul.bf16 1065369472, %v5520_v27  ;;  %8962 = vst [vmem:[#allocation61_spill] sm:$0xff] %v7805_v33  ;;  %v7807_v13 = vpop.f32.mrb[174].mxu0 }
 0x317   : > { %v5528_v43 = vpop.eup %5527  ;;  %v4241_v53 = vadd.f32 %v4240_v39, %v3769_v12  ;;  %v4271_v9 = vadd.f32 %v4270_v34, %v3760_v28  ;;  %v3779_v35 = vunpack.c.l.bf16 %v3599_v15  ;;  %v3789_v46 = vunpack.c.h.bf16 %v3599_v15  ;;  %8963 = vst [vmem:[#allocation78_spill] sm:$0xff] %v7807_v13  ;;  %v7809_v45 = vpop.f32.mrb[134].mxu1 }
 0x318   : > { %8964 = vst [vmem:[#allocation79_spill] sm:$0xff] %v7809_v45  ;;  %v5530_v62 = vpop.eup %5529  ;;  %v4222_v38 = vadd.f32 %v4221_v37, %v3888_v52  ;;  %v4192_v50 = vadd.f32 %v7728_v7, %v3897_v25  ;;  %v3658_v42 = vmul.bf16 %v3424_v57, %v7620_v30  ;;  %v3308_v27 = vmul.bf16 1065369472, %v5522_v31  ;;  %v7813_v32 = vpop.f32.mrb[175].mxu0 }
 0x319   : > { %8965 = vst [vmem:[#allocation80_spill] sm:$0xff] %v7813_v32  ;;  %v7815_v19 = vpop.f32.mrb[135].mxu1  ;;  %v5532_v33 = vpop.eup %5531  ;;  %v4272_v12 = vadd.f32 %v4271_v9, %v3770_v17  ;;  %v4242_v34 = vadd.f32 %v4241_v53, %v3779_v35  ;;  %v3442_v28 = vmul.bf16 1065369472, %v5524_v5  ;;  %v3129_v39 = vadd.bf16 1065369472, %v5526_v58 }
 0x31a   : > { %8966 = vst [vmem:[#allocation81_spill] sm:$0xff] %v7815_v19  ;;  %v5534_v15 = vpop.eup %5533  ;;  %v4193_v13 = vadd.f32 %v4192_v50, %v3907_v20  ;;  %v3898_v26 = vunpack.c.l.bf16 %v3658_v42  ;;  %v3908_v45 = vunpack.c.h.bf16 %v3658_v42  ;;  %v3600_v52 = vmul.bf16 %v3308_v27, %v7623_v14 }
 0x31b   : > { %v5536_v37 = vpop.eup %5535  ;;  %v7818_v7 = vadd.f32 %v4242_v34, %v3789_v46  ;;  %v3667_v30 = vmul.bf16 %v3442_v28, %v7626_v1  ;;  %5539 = vrcp.bf16 %v3129_v39  ;;  %v3188_v31 = vadd.bf16 1065369472, %v5528_v43  ;;  %v8968_v43 = vld [vmem:[#allocation60_spill] sm:$0xff]  ;;  %v8973_v39 = vld [vmem:[#allocation17_spill] sm:$0xff] }
 0x31c   : > { %v5538_v25 = vpop.eup %5537  ;;  %v4223_v57 = vadd.f32 %v4222_v38, %v3898_v26  ;;  %v3780_v19 = vunpack.c.l.bf16 %v3600_v52  ;;  %v3790_v17 = vunpack.c.h.bf16 %v3600_v52  ;;  %v3130_v53 = vadd.bf16 1065369472, %v5530_v62  ;;  %v8967_v38 = vld [vmem:[#allocation56_spill] sm:$0xff] }
 0x31d   : > { %v3917_v5 = vunpack.c.l.bf16 %v3667_v30  ;;  %v3927_v58 = vunpack.c.h.bf16 %v3667_v30  ;;  %5541 = vrcp.bf16 %v3188_v31  ;;  %v3197_v20 = vadd.bf16 1065369472, %v5532_v33  ;;  %v8969_v33 = vld [vmem:[#allocation5_spill] sm:$0xff]  ;;  %v8972_v34 = vld [vmem:[#allocation16_spill] sm:$0xff] }
 0x31e   : > { %v7821_v9 = vadd.f32 %v4223_v57, %v3908_v45  ;;  %v4273_v35 = vadd.f32 %v4272_v12, %v3780_v19  ;;  %5543 = vrcp.bf16 %v3130_v53  ;;  %v3139_v14 = vadd.bf16 1065369472, %v5534_v15  ;;  %v8970_v45 = vld [vmem:[#allocation13_spill] sm:$0xff]  ;;  %v8971_v12 = vld [vmem:[#allocation6_spill] sm:$0xff]  ;;  %v8974_v15 = vld [vmem:[#allocation31_spill] sm:$0xff] }
 0x31f   : > { %v4194_v46 = vadd.f32 %v4193_v13, %v3917_v5  ;;  %5545 = vrcp.bf16 %v3197_v20  ;;  %v3198_v50 = vadd.bf16 1065369472, %v5536_v37  ;;  %v3140_v1 = vadd.bf16 1065369472, %v5538_v25  ;;  %v8975_v37 = vld [vmem:[#allocation15_spill] sm:$0xff]  ;;  %v8976_v30 = vld [vmem:[#allocation12_spill] sm:$0xff] }
 0x320   : > { %v7823_v42 = vadd.f32 %v4273_v35, %v3790_v17  ;;  %5547 = vrcp.bf16 %v3139_v14  ;;  %v4875_v26 = vmul.bf16 3216621497, %v7792_v55  ;;  %v2058_v62 = vpack.c.bf16 %v8968_v43, %v8967_v38  ;;  %v8978_v53 = vld [vmem:[#allocation32_spill] sm:$0xff] }
 0x321   : > { %v7828_v27 = vadd.f32 %v4194_v46, %v3927_v58  ;;  %5549 = vrcp.bf16 %v3198_v50  ;;  %v2125_v19 = vpack.c.bf16 %v8970_v45, %v8969_v33  ;;  %v2067_v13 = vpack.c.bf16 %v8972_v34, %v8971_v12  ;;  %v8979_v5 = vld [vmem:[#allocation4_spill] sm:$0xff] }
 0x322   : > { %5551 = vrcp.bf16 %v3140_v1  ;;  %v7835_v28 = vadd.bf16 %v7543_v10, %v2058_v62  ;;  %v2126_v52 = vpack.c.bf16 %v8974_v15, %v8973_v39  ;;  %v2068_v31 = vpack.c.bf16 %v8976_v30, %v8975_v37  ;;  %v8981_v45 = vld [vmem:[#allocation8_spill] sm:$0xff]  ;;  %v8984_v39 = vld [vmem:[#allocation22_spill] sm:$0xff] }
 0x323   : > { %v8977_v25 = vmul.bf16 3216621497, %v7763_v4  ;;  %v7844_v57 = vadd.bf16 %v7017_v18, %v2125_v19  ;;  %v7847_v17 = vadd.bf16 %v7511_v44, %v2067_v13  ;;  %v2135_v58 = vpack.c.bf16 %v8979_v5, %v8978_v53  ;;  %v8982_v19 = vld [vmem:[#allocation7_spill] sm:$0xff]  ;;  %v8983_v13 = vld [vmem:[#allocation33_spill] sm:$0xff]  ;;  %v8988_v5 = vld [vmem:[#allocation18_spill] sm:$0xff] }
 0x324   : > { %v8980_v20 = vmul.bf16 3216621497, %v7771_v8  ;;  %v4817_v35 = vmul.bf16 3216621497, %v7835_v28  ;;  %v7855_v14 = vadd.bf16 %v7116_v61, %v2126_v52  ;;  %v7858_v46 = vadd.bf16 %v7543_v10, %v2068_v31  ;;  %v7872_v52 = vpop.f32.mrb[136].mxu1  ;;  %v8986_v31 = vld [vmem:[#allocation19_spill] sm:$0xff] }
 0x325   : > { %5553 = vpow.bf16 %v8977_v25  ;;  %v4884_v50 = vmul.bf16 3216621497, %v7844_v57  ;;  %v4826_v1 = vmul.bf16 3216621497, %v7847_v17  ;;  %v7863_v38 = vadd.bf16 %v7017_v18, %v2135_v58  ;;  %8985 = vst [vmem:[#allocation56_spill] sm:$0xff] %v7872_v52  ;;  %v8987_v25 = vld [vmem:[#allocation14_spill] sm:$0xff] }
 0x326   : > { %5555 = vpow.bf16 %v8980_v20  ;;  %v5540_v43 = vpop.eup %5539  ;;  %v4885_v62 = vmul.bf16 3216621497, %v7855_v14  ;;  %v4827_v33 = vmul.bf16 3216621497, %v7858_v46  ;;  %v2077_v12 = vpack.c.bf16 %v8982_v19, %v8981_v45  ;;  %v8989_v58 = vld [vmem:[#allocation28_spill] sm:$0xff] }
 0x327   : > { %5557 = vpow.bf16 %v4875_v26  ;;  %v3326_v34 = vmul.bf16 1065369472, %v5540_v43  ;;  %v4894_v26 = vmul.bf16 3216621497, %v7863_v38  ;;  %v2136_v15 = vpack.c.bf16 %v8984_v39, %v8983_v13 }
 0x328   : > { %5559 = vpow.bf16 %v4817_v35  ;;  %v5542_v37 = vpop.eup %5541  ;;  %v7875_v30 = vadd.bf16 %v7511_v44, %v2077_v12  ;;  %v2078_v53 = vpack.c.bf16 %v8987_v25, %v8986_v31  ;;  %v7881_v35 = vpop.f32.mrb[137].mxu1 }
 0x329   : > { %5561 = vpow.bf16 %v4884_v50  ;;  %8990 = vst [vmem:[#allocation60_spill] sm:$0xff] %v7881_v35  ;;  %v5544_v50 = vpop.eup %5543  ;;  %v3609_v43 = vmul.bf16 %v3326_v34, %v7685_v41  ;;  %v3444_v45 = vmul.bf16 1065369472, %v5542_v37  ;;  %v7885_v19 = vadd.bf16 %v7116_v61, %v2136_v15 }
 0x32a   : > { %5563 = vpow.bf16 %v4826_v1  ;;  %v7887_v1 = vpop.f32.mrb[138].mxu1  ;;  %v5546_v12 = vpop.eup %5545  ;;  %v3328_v13 = vmul.bf16 1065369472, %v5544_v50  ;;  %v7891_v31 = vadd.bf16 %v7543_v10, %v2078_v53 }
 0x32b   : > { %5565 = vpow.bf16 %v4885_v62  ;;  %8991 = vst [vmem:[#allocation5_spill] sm:$0xff] %v7887_v1  ;;  %v7893_v25 = vpop.f32.mrb[139].mxu1  ;;  %v5548_v20 = vpop.eup %5547  ;;  %v3799_v35 = vunpack.c.l.bf16 %v3609_v43  ;;  %v3809_v41 = vunpack.c.h.bf16 %v3609_v43  ;;  %v3668_v62 = vmul.bf16 %v3444_v45, %v7689_v2 }
 0x32c   : > { %5567 = vpow.bf16 %v4827_v33  ;;  %8992 = vst [vmem:[#allocation13_spill] sm:$0xff] %v7893_v25  ;;  %v3462_v34 = vmul.bf16 1065369472, %v5546_v12  ;;  %v5550_v15 = vpop.eup %5549  ;;  %v3610_v37 = vmul.bf16 %v3328_v13, %v7726_v29  ;;  %v3346_v1 = vmul.bf16 1065369472, %v5548_v20  ;;  %v7902_v13 = vpop.f32.mrb[140].mxu1 }
 0x32d   : > { %5569 = vpow.bf16 %v4894_v26  ;;  %v5552_v50 = vpop.eup %5551  ;;  %v4244_v39 = vadd.f32 %v7818_v7, %v3799_v35  ;;  %v3918_v53 = vunpack.c.l.bf16 %v3668_v62  ;;  %v3928_v52 = vunpack.c.h.bf16 %v3668_v62  ;;  %8993 = vst [vmem:[#allocation6_spill] sm:$0xff] %v7902_v13 }
 0x32e   : > { %v3677_v25 = vmul.bf16 %v3462_v34, %v7734_v60  ;;  %v3800_v51 = vunpack.c.l.bf16 %v3610_v37  ;;  %v3810_v43 = vunpack.c.h.bf16 %v3610_v37  ;;  %v3619_v2 = vmul.bf16 %v3346_v1, %v7745_v54  ;;  %v7906_v34 = vpop.f32.mrb[141].mxu1 }
 0x32f   : > { %v3464_v45 = vmul.bf16 1065369472, %v5550_v15  ;;  %v4245_v63 = vadd.f32 %v4244_v39, %v3809_v41  ;;  %v4225_v29 = vadd.f32 %v7821_v9, %v3918_v53  ;;  %8994 = vst [vmem:[#allocation16_spill] sm:$0xff] %v7906_v34  ;;  %v3348_v39 = vmul.bf16 1065369472, %v5552_v50  ;;  %v7909_v9 = vpop.f32.mrb[142].mxu1 }
 0x330   : > { %v5554_v32 = vpop.eup %5553  ;;  %v3937_v26 = vunpack.c.l.bf16 %v3677_v25  ;;  %v3947_v20 = vunpack.c.h.bf16 %v3677_v25  ;;  %v4275_v7 = vadd.f32 %v7823_v42, %v3800_v51  ;;  %v3819_v35 = vunpack.c.l.bf16 %v3619_v2  ;;  %8995 = vst [vmem:[#allocation17_spill] sm:$0xff] %v7909_v9  ;;  %v7911_v51 = vpop.f32.mrb[143].mxu1 }
 0x331   : > { %v5556_v12 = vpop.eup %5555  ;;  %v3829_v62 = vunpack.c.h.bf16 %v3619_v2  ;;  %v3678_v60 = vmul.bf16 %v3464_v45, %v7750_v40  ;;  %v4226_v54 = vadd.f32 %v4225_v29, %v3928_v52  ;;  %v3207_v41 = vadd.bf16 1065369472, %v5554_v32  ;;  %8996 = vst [vmem:[#allocation31_spill] sm:$0xff] %v7911_v51 }
 0x332   : > { %v5558_v33 = vpop.eup %5557  ;;  %v4196_v1 = vadd.f32 %v7828_v27, %v3937_v26  ;;  %v4276_v15 = vadd.f32 %v4275_v7, %v3810_v43  ;;  %v4246_v53 = vadd.f32 %v4245_v63, %v3819_v35  ;;  %v3620_v40 = vmul.bf16 %v3348_v39, %v7756_v6  ;;  %v7921_v39 = vpop.f32.mrb[144].mxu1 }
 0x333   : > { %v5560_v37 = vpop.eup %5559  ;;  %v3938_v13 = vunpack.c.l.bf16 %v3678_v60  ;;  %v3948_v36 = vunpack.c.h.bf16 %v3678_v60  ;;  %5571 = vrcp.bf16 %v3207_v41  ;;  %v3149_v52 = vadd.bf16 1065369472, %v5556_v12  ;;  %8997 = vst [vmem:[#allocation15_spill] sm:$0xff] %v7921_v39 }
 0x334   : > { %v5562_v25 = vpop.eup %5561  ;;  %v7913_v2 = vadd.f32 %v4196_v1, %v3947_v20  ;;  %v7916_v27 = vadd.f32 %v4246_v53, %v3829_v62  ;;  %v3208_v50 = vadd.bf16 1065369472, %v5558_v33  ;;  %v3150_v29 = vadd.bf16 1065369472, %v5560_v37  ;;  %v9002_v53 = vld [vmem:[#allocation25_spill] sm:$0xff] }
 0x335   : > { %v5564_v42 = vpop.eup %5563  ;;  %v4227_v32 = vadd.f32 %v4226_v54, %v3938_v13  ;;  %v3820_v43 = vunpack.c.l.bf16 %v3620_v40  ;;  %v3830_v63 = vunpack.c.h.bf16 %v3620_v40  ;;  %5573 = vrcp.bf16 %v3149_v52  ;;  %v9000_v54 = vld [vmem:[#allocation23_spill] sm:$0xff]  ;;  %v9004_v52 = vld [vmem:[#allocation20_spill] sm:$0xff] }
 0x336   : > { %v5566_v45 = vpop.eup %5565  ;;  %v3217_v7 = vadd.bf16 1065369472, %v5562_v25  ;;  %5575 = vrcp.bf16 %v3208_v50  ;;  %v3159_v20 = vadd.bf16 1065369472, %v5564_v42  ;;  %v4837_v62 = vmul.bf16 3216621497, %v7891_v31 }
 0x337   : > { %v5568_v26 = vpop.eup %5567  ;;  %v7918_v35 = vadd.f32 %v4227_v32, %v3948_v36  ;;  %v3218_v60 = vadd.bf16 1065369472, %v5566_v45  ;;  %v4277_v6 = vadd.f32 %v4276_v15, %v3820_v43  ;;  %5577 = vrcp.bf16 %v3150_v29  ;;  %v8999_v36 = vld [vmem:[#allocation21_spill] sm:$0xff]  ;;  %v7931_v25 = vpop.f32.mrb[145].mxu1  ;;  %v9003_v42 = vld [vmem:[#allocation26_spill] sm:$0xff]  ;;  %v9005_v45 = vld [vmem:[#allocation3_spill] sm:$0xff] }
 0x338   : > { %v5570_v1 = vpop.eup %5569  ;;  %v3160_v12 = vadd.bf16 1065369472, %v5568_v26  ;;  %5579 = vrcp.bf16 %v3217_v7  ;;  %v8998_v13 = vpack.c.bf16 %v8989_v58, %v8988_v5  ;;  %v2087_v41 = vpack.c.bf16 %v9000_v54, %v8999_v36  ;;  %9001 = vst [vmem:[#allocation12_spill] sm:$0xff] %v7931_v25  ;;  %v7939_v50 = vpop.f32.mrb[146].mxu1  ;;  %v9007_v29 = vld [vmem:[#allocation24_spill] sm:$0xff]  ;;  %v9008_v26 = vld [vmem:[#allocation30_spill] sm:$0xff] }
 0x339   : > { %v3227_v33 = vadd.bf16 1065369472, %v5570_v1  ;;  %v7933_v15 = vadd.f32 %v4277_v6, %v3830_v63  ;;  %5581 = vrcp.bf16 %v3159_v20  ;;  %v2146_v40 = vpack.c.bf16 %v9003_v42, %v9002_v53  ;;  %9006 = vst [vmem:[#allocation32_spill] sm:$0xff] %v7939_v50  ;;  %v7947_v63 = vpop.f32.mrb[147].mxu1  ;;  %v9012_v1 = vld [vmem:[#allocation62_spill] sm:$0xff]  ;;  %v9013_v6 = vld [vmem:[#allocation37_spill] sm:$0xff] }
 0x33a   : > { %v7927_v37 = vadd.bf16 %v7017_v18, %v8998_v13  ;;  %v2088_v32 = vpack.c.bf16 %v9005_v45, %v9004_v52  ;;  %5583 = vrcp.bf16 %v3218_v60  ;;  %v7943_v58 = vadd.bf16 %v7511_v44, %v2087_v41  ;;  %9009 = vst [vmem:[#allocation4_spill] sm:$0xff] %v7947_v63  ;;  %v9014_v54 = vld [vmem:[#allocation27_spill] sm:$0xff]  ;;  %v9015_v41 = vld [vmem:[#allocation64_spill] sm:$0xff] }
 0x33b   : > { %v2155_v43 = vpack.c.bf16 %v9008_v26, %v9007_v29  ;;  %5585 = vrcp.bf16 %v3160_v12  ;;  %v7950_v7 = vadd.bf16 %v7116_v61, %v2146_v40  ;;  %v2097_v60 = vpack.c.bf16 %v9013_v6, %v9012_v1  ;;  %v9018_v29 = vld [vmem:[#allocation29_spill] sm:$0xff]  ;;  %v9019_v26 = vld [vmem:[#allocation36_spill] sm:$0xff] }
 0x33c   : > { %v4904_v5 = vmul.bf16 3216621497, %v7927_v37  ;;  %v7953_v20 = vadd.bf16 %v7543_v10, %v2088_v32  ;;  %5587 = vrcp.bf16 %v3227_v33  ;;  %v4846_v13 = vmul.bf16 3216621497, %v7943_v58  ;;  %v7981_v1 = vld [vmem:[%s8616_s4 + $0x8] sm:$0x3] }
 0x33d   : > { %9010 = vst [vmem:[#allocation8_spill] sm:$0xff] %v7950_v7  ;;  %v7959_v36 = vadd.bf16 %v7017_v18, %v2155_v43  ;;  %v2156_v53 = vpack.c.bf16 %v9015_v41, %v9014_v54  ;;  %v9016_v12 = vmul.bf16 3216621497, %v7875_v30  ;;  %v4905_v42 = vmul.bf16 3216621497, %v7950_v7  ;;  %v9020_v54 = vld [vmem:[#allocation35_spill] sm:$0xff] }
 0x33e   : > { %9011 = vst [vmem:[#allocation7_spill] sm:$0xff] %v7953_v20  ;;  %v4847_v40 = vmul.bf16 3216621497, %v7953_v20  ;;  %v7968_v52 = vadd.bf16 %v7511_v44, %v2097_v60  ;;  %v5572_v45 = vpop.eup %5571  ;;  %v9017_v33 = vmul.bf16 3216621497, %v7885_v19  ;;  %v2098_v43 = vpack.c.bf16 %v9019_v26, %v9018_v29  ;;  %v9021_v41 = vld [vmem:[#allocation65_spill] sm:$0xff] }
 0x33f   : > { %5589 = vpow.bf16 %v9016_v12  ;;  %v7974_v32 = vadd.bf16 %v7116_v61, %v2156_v53  ;;  %v3482_v6 = vmul.bf16 1065369472, %v5572_v45  ;;  %v2107_v12 = vpack.c.bf16 %v9021_v41, %v9020_v54  ;;  %v9023_v29 = vld [vmem:[#allocation39_spill] sm:$0xff]  ;;  %v9024_v26 = vld [vmem:[#allocation66_spill] sm:$0xff] }
 0x340   : > { %5591 = vpow.bf16 %v9017_v33  ;;  %v7986_v33 = vpop.f32.mrb[148].mxu1  ;;  %v5574_v18 = vpop.eup %5573  ;;  %v7990_v53 = vadd.bf16 %v7543_v10, %v2098_v43  ;;  %v8005_v63 = vrot.slane %v7981_v1, %v8889_v16 }
 0x341   : > { %5593 = vpow.bf16 %v4837_v62  ;;  %9022 = vst [vmem:[#allocation33_spill] sm:$0xff] %v7986_v33  ;;  %v7994_v25 = vpop.f32.mrb[149].mxu1  ;;  %v5576_v62 = vpop.eup %5575  ;;  %v3687_v45 = vmul.bf16 %v3482_v6, %v7763_v4  ;;  %v3366_v60 = vmul.bf16 1065369472, %v5574_v18  ;;  %v7998_v54 = vadd.bf16 %v7511_v44, %v2107_v12 }
 0x342   : > { %5595 = vpow.bf16 %v4904_v5  ;;  %9025 = vst [vmem:[#allocation22_spill] sm:$0xff] %v7994_v25  ;;  %v8000_v41 = vpop.f32.mrb[150].mxu1  ;;  %v5578_v5 = vpop.eup %5577  ;;  %v3484_v61 = vmul.bf16 1065369472, %v5576_v62 }
 0x343   : > { %5597 = vpow.bf16 %v4846_v13  ;;  %9026 = vst [vmem:[#allocation19_spill] sm:$0xff] %v8000_v41  ;;  %v8007_v25 = vpop.f32.mrb[151].mxu1  ;;  %v5580_v33 = vpop.eup %5579  ;;  %v3957_v4 = vunpack.c.l.bf16 %v3687_v45  ;;  %v3967_v18 = vunpack.c.h.bf16 %v3687_v45  ;;  %v3629_v13 = vmul.bf16 %v3366_v60, %v7771_v8 }
 0x344   : > { %5599 = vpow.bf16 %v4905_v42  ;;  %9027 = vst [vmem:[#allocation14_spill] sm:$0xff] %v8007_v25  ;;  %v3368_v6 = vmul.bf16 1065369472, %v5578_v5  ;;  %v5582_v12 = vpop.eup %5581  ;;  %v3688_v41 = vmul.bf16 %v3484_v61, %v7792_v55  ;;  %v3502_v50 = vmul.bf16 1065369472, %v5580_v33  ;;  %v8016_v61 = vpop.f32.mrb[152].mxu1 }
 0x345   : > { %5601 = vpow.bf16 %v4847_v40  ;;  %v5584_v62 = vpop.eup %5583  ;;  %v4198_v43 = vadd.f32 %v7913_v2, %v3957_v4  ;;  %v3839_v39 = vunpack.c.l.bf16 %v3629_v13  ;;  %v3849_v51 = vunpack.c.h.bf16 %v3629_v13  ;;  %9028 = vst [vmem:[#allocation18_spill] sm:$0xff] %v8016_v61 }
 0x346   : > { %v3630_v25 = vmul.bf16 %v3368_v6, %v7835_v28  ;;  %v5586_v34 = vpop.eup %5585  ;;  %v3958_v9 = vunpack.c.l.bf16 %v3688_v41  ;;  %v3968_v45 = vunpack.c.h.bf16 %v3688_v41  ;;  %v3697_v8 = vmul.bf16 %v3502_v50, %v7844_v57  ;;  %v8020_v6 = vpop.f32.mrb[153].mxu1 }
 0x347   : > { %v3386_v60 = vmul.bf16 1065369472, %v5582_v12  ;;  %v5588_v5 = vpop.eup %5587  ;;  %v4199_v20 = vadd.f32 %v4198_v43, %v3967_v18  ;;  %v4248_v55 = vadd.f32 %v7916_v27, %v3839_v39  ;;  %9029 = vst [vmem:[#allocation28_spill] sm:$0xff] %v8020_v6  ;;  %v3504_v43 = vmul.bf16 1065369472, %v5584_v62  ;;  %v8023_v27 = vpop.f32.mrb[154].mxu1 }
 0x348   : > { %v3840_v40 = vunpack.c.l.bf16 %v3630_v25  ;;  %v3850_v33 = vunpack.c.h.bf16 %v3630_v25  ;;  %v4229_v2 = vadd.f32 %v7918_v35, %v3958_v9  ;;  %v3977_v4 = vunpack.c.l.bf16 %v3697_v8  ;;  %9030 = vst [vmem:[#allocation21_spill] sm:$0xff] %v8023_v27  ;;  %v8025_v9 = vpop.f32.mrb[155].mxu1 }
 0x349   : > { %v3987_v13 = vunpack.c.h.bf16 %v3697_v8  ;;  %v3639_v28 = vmul.bf16 %v3386_v60, %v7847_v17  ;;  %v4249_v57 = vadd.f32 %v4248_v55, %v3849_v51  ;;  %v3388_v18 = vmul.bf16 1065369472, %v5586_v34 }
 0x34a   : > { %v5590_v42 = vpop.eup %5589  ;;  %v4279_v50 = vadd.f32 %v7933_v15, %v3840_v40  ;;  %v4230_v25 = vadd.f32 %v4229_v2, %v3968_v45  ;;  %v4200_v12 = vadd.f32 %v4199_v20, %v3977_v4  ;;  %v3698_v17 = vmul.bf16 %v3504_v43, %v7855_v14 }
 0x34b   : > { %v5592_v41 = vpop.eup %5591  ;;  %v3859_v61 = vunpack.c.l.bf16 %v3639_v28  ;;  %v3869_v7 = vunpack.c.h.bf16 %v3639_v28  ;;  %v3640_v60 = vmul.bf16 %v3388_v18, %v7858_v46  ;;  %v3522_v51 = vmul.bf16 1065369472, %v5588_v5 }
 0x34c   : > { %v5594_v39 = vpop.eup %5593  ;;  %v4280_v8 = vadd.f32 %v4279_v50, %v3850_v33  ;;  %v4201_v15 = vadd.f32 %v4200_v12, %v3987_v13  ;;  %v3169_v34 = vadd.bf16 1065369472, %v5590_v42  ;;  %v3228_v40 = vadd.bf16 1065369472, %v5592_v41  ;;  %v8032_v13 = vpop.f32.mrb[156].mxu1 }
 0x34d   : > { %v5596_v35 = vpop.eup %5595  ;;  %v4250_v62 = vadd.f32 %v4249_v57, %v3859_v61  ;;  %v3978_v27 = vunpack.c.l.bf16 %v3698_v17  ;;  %v3988_v45 = vunpack.c.h.bf16 %v3698_v17  ;;  %v3860_v20 = vunpack.c.l.bf16 %v3640_v60  ;;  %v8034_v57 = vpop.f32.mrb[157].mxu1 }
 0x34e   : > { %v5598_v55 = vpop.eup %5597  ;;  %v3870_v2 = vunpack.c.h.bf16 %v3640_v60  ;;  %v3707_v28 = vmul.bf16 %v3522_v51, %v7863_v38  ;;  %5603 = vrcp.bf16 %v3169_v34  ;;  %v3170_v33 = vadd.bf16 1065369472, %v5594_v39  ;;  %v8040_v18 = vpop.f32.mrb[158].mxu1  ;;  %v9033_v60 = vld [vmem:[#allocation38_spill] sm:$0xff]  ;;  %v9034_v51 = vld [vmem:[#allocation68_spill] sm:$0xff] }
 0x34f   : > { %v5600_v6 = vpop.eup %5599  ;;  %v8029_v4 = vadd.f32 %v4250_v62, %v3869_v7  ;;  %v4231_v50 = vadd.f32 %v4230_v25, %v3978_v27  ;;  %v4281_v46 = vadd.f32 %v4280_v8, %v3860_v20  ;;  %5605 = vrcp.bf16 %v3228_v40  ;;  %v8044_v12 = vpop.f32.mrb[159].mxu1  ;;  %v9032_v8 = vld [vmem:[#allocation67_spill] sm:$0xff] }
 0x350   : > { %v5602_v14 = vpop.eup %5601  ;;  %v3237_v5 = vadd.bf16 1065369472, %v5596_v35  ;;  %v3997_v42 = vunpack.c.l.bf16 %v3707_v28  ;;  %v4007_v61 = vunpack.c.h.bf16 %v3707_v28  ;;  %5607 = vrcp.bf16 %v3170_v33  ;;  %v9031_v35 = vld [vmem:[#allocation34_spill] sm:$0xff] }
 0x351   : > { %v3179_v41 = vadd.bf16 1065369472, %v5598_v55  ;;  %v8036_v43 = vadd.f32 %v4231_v50, %v3988_v45  ;;  %v8038_v7 = vadd.f32 %v4281_v46, %v3870_v2  ;;  %v3238_v38 = vadd.bf16 1065369472, %v5600_v6 }
 0x352   : > { %5609 = vrcp.bf16 %v3237_v5  ;;  %v4202_v27 = vadd.f32 %v4201_v15, %v3997_v42  ;;  %v3180_v39 = vadd.bf16 1065369472, %v5602_v14  ;;  %v2221_v25 = vpack.c.bf16 %v8005_v63, %v8005_v63 }
 0x353   : > { %5611 = vrcp.bf16 %v3179_v41  ;;  %v2108_v17 = vpack.c.bf16 %v9032_v8, %v9031_v35  ;;  %v2010_v55 = vpack.c.bf16 %v9034_v51, %v9033_v60  ;;  %v2202_v6 = vrot.slane %v7981_v1, %v8921_v24 }
 0x354   : > { %5613 = vrcp.bf16 %v3238_v38  ;;  %v8052_v62 = vadd.f32 %v4202_v27, %v4007_v61  ;;  %v2280_v15 = vpack.i.b16 %v2221_v25, %v2221_v25  ;;  %v2117_v34 = vpack.c.bf16 %v7609_v56, %v7583_v3 }
 0x355   : > { %5615 = vrcp.bf16 %v3180_v39  ;;  %v9035_v63 = vmul.bf16 3216621497, %v7959_v36  ;;  %v8059_v40 = vadd.bf16 %v7543_v10, %v2108_v17  ;;  %v2222_v45 = vpack.c.bf16 %v2202_v6, %v2202_v6  ;;  %v9045_v39 = vld [vmem:[#allocation44_spill] sm:$0xff]  ;;  %v9047_v6 = vld [vmem:[#allocation70_spill] sm:$0xff] }
 0x356   : > { %v2019_v20 = vpack.c.bf16 %v7611_v48, %v7585_v47  ;;  %v9036_v2 = vmul.bf16 3216621497, %v7968_v52  ;;  %v8066_v1 = vrot.slane %v2280_v15, %v8889_v16  ;;  %v8069_v28 = vadd.bf16 %v7511_v44, %v2117_v34  ;;  %v8078_v48 = vpop.f32.mrb[160].mxu1 }
 0x357   : > { %5617 = vpow.bf16 %v9035_v63  ;;  %v2118_v3 = vpack.c.bf16 %v7615_v11, %v7599_v0  ;;  %v9037_v56 = vmul.bf16 3216621497, %v7974_v32  ;;  %v4867_v33 = vmul.bf16 3216621497, %v8059_v40  ;;  %v8092_v42 = vpop.f32.mrb[161].mxu1 }
 0x358   : > { %5619 = vpow.bf16 %v9036_v2  ;;  %v2287_v14 = vpack.i.b16 %v2222_v45, %v2222_v45  ;;  %v9038_v50 = vmul.bf16 3216621497, %v7990_v53  ;;  %v9039_v46 = vpack.c.bf16 %v9024_v26, %v9023_v29  ;;  %9040 = vst [vmem:[#allocation23_spill] sm:$0xff] %v8092_v42  ;;  %v9044_v26 = vld [vmem:[#allocation41_spill] sm:$0xff]  ;;  %v8107_v35 = vpop.f32.mrb[162].mxu1 }
 0x359   : > { %5621 = vpow.bf16 %v9037_v56  ;;  %v4876_v0 = vmul.bf16 3216621497, %v8069_v28  ;;  %v8090_v11 = vadd.bf16 %v8066_v1, %v2019_v20  ;;  %v5604_v61 = vpop.eup %5603  ;;  %v9041_v41 = vrot.slane %v7639_v22, %v8889_v16  ;;  %9046 = vst [vmem:[#allocation26_spill] sm:$0xff] %v8107_v35  ;;  %v8117_v20 = vpop.f32.mrb[163].mxu1 }
 0x35a   : > { %5623 = vpow.bf16 %v9038_v50  ;;  %v8086_v5 = vadd.bf16 %v8066_v1, %v9039_v46  ;;  %v9043_v27 = vmul.bf16 3216621497, %v7998_v54  ;;  %v8103_v29 = vrot.slane %v2287_v14, %v8889_v16  ;;  %v5606_v8 = vpop.eup %5605  ;;  %9049 = vst [vmem:[#allocation20_spill] sm:$0xff] %v8117_v20  ;;  %v8129_v15 = vpop.f32.mrb[164].mxu1 }
 0x35b   : > { %v8098_v38 = vmul.f32 %v9041_v41, %v7667_v23  ;;  %v3406_v17 = vmul.bf16 1065369472, %v5604_v61  ;;  %v4778_v51 = vmul.bf16 3216621497, %v8090_v11  ;;  %v5608_v23 = vpop.eup %5607  ;;  %v9048_v34 = vrot.slane %v7738_v49, 2  ;;  %9050 = vst [vmem:[#allocation3_spill] sm:$0xff] %v8129_v15 }
 0x35c   : > { %5625 = vpow.bf16 %v9043_v27  ;;  %v4768_v60 = vmul.bf16 3216621497, %v8086_v5  ;;  %v3524_v45 = vmul.bf16 1065369472, %v5606_v8  ;;  %v3408_v14 = vmul.bf16 1065369472, %v5608_v23 }
 0x35d   : > { %9042 = vst [vmem:[#allocation25_spill] sm:$0xff] %v8098_v38  ;;  %5627 = vpow.bf16 %v4867_v33  ;;  %v8115_v63 = vadd.f32 %v9048_v34, %v7738_v49  ;;  %v5610_v2 = vpop.eup %5609  ;;  %v3649_v56 = vmul.bf16 %v3406_v17, %v7875_v30  ;;  %v8121_v33 = vadd.bf16 %v7543_v10, %v2118_v3  ;;  %v8133_v25 = vpop.f32.mrb[165].mxu1 }
 0x35e   : > { %5629 = vpow.bf16 %v4876_v0  ;;  %v5612_v50 = vpop.eup %5611  ;;  %v3708_v46 = vmul.bf16 %v3524_v45, %v7885_v19  ;;  %v3542_v61 = vmul.bf16 1065369472, %v5610_v2  ;;  %v8125_v41 = vadd.bf16 %v8103_v29, %v2010_v55  ;;  %9051 = vst [vmem:[#allocation24_spill] sm:$0xff] %v8133_v25 }
 0x35f   : > { %5631 = vpow.bf16 %v4768_v60  ;;  %v5614_v49 = vpop.eup %5613  ;;  %v3879_v0 = vunpack.c.l.bf16 %v3649_v56  ;;  %v3889_v27 = vunpack.c.h.bf16 %v3649_v56  ;;  %v3650_v8 = vmul.bf16 %v3408_v14, %v7891_v31 }
 0x360   : > { %5633 = vpow.bf16 %v4778_v51  ;;  %v3426_v34 = vmul.bf16 1065369472, %v5612_v50  ;;  %v5616_v30 = vpop.eup %5615  ;;  %v3998_v17 = vunpack.c.l.bf16 %v3708_v46  ;;  %v4008_v60 = vunpack.c.h.bf16 %v3708_v46  ;;  %v9052_v46 = vld [vmem:[#allocation8_spill] sm:$0xff] }
 0x361   : > { %v3717_v3 = vmul.bf16 %v3542_v61, %v7927_v37  ;;  %v3544_v23 = vmul.bf16 1065369472, %v5614_v49  ;;  %v4252_v45 = vadd.f32 %v8029_v4, %v3879_v0  ;;  %v3880_v55 = vunpack.c.l.bf16 %v3650_v8  ;;  %v8137_v37 = vpop.f32.mrb[166].mxu1 }
 0x362   : > { %v5618_v19 = vpop.eup %5617  ;;  %v3890_v2 = vunpack.c.h.bf16 %v3650_v8  ;;  %v3659_v51 = vmul.bf16 %v3426_v34, %v7943_v58  ;;  %v4233_v31 = vadd.f32 %v8036_v43, %v3998_v17  ;;  %9053 = vst [vmem:[#allocation30_spill] sm:$0xff] %v8137_v37  ;;  %v8140_v8 = vpop.f32.mrb[167].mxu1 }
 0x363   : > { %v5620_v56 = vpop.eup %5619  ;;  %v4017_v14 = vunpack.c.l.bf16 %v3717_v3  ;;  %v4027_v50 = vunpack.c.h.bf16 %v3717_v3  ;;  %v3718_v47 = vmul.bf16 %v3544_v23, %v9052_v46  ;;  %v4253_v49 = vadd.f32 %v4252_v45, %v3889_v27  ;;  %9054 = vst [vmem:[#allocation62_spill] sm:$0xff] %v8140_v8  ;;  %v9055_v8 = vld [vmem:[#allocation7_spill] sm:$0xff] }
 0x364   : > { %v5622_v61 = vpop.eup %5621  ;;  %v4283_v16 = vadd.f32 %v8038_v7, %v3880_v55  ;;  %v3899_v4 = vunpack.c.l.bf16 %v3659_v51  ;;  %v3909_v0 = vunpack.c.h.bf16 %v3659_v51  ;;  %v4234_v34 = vadd.f32 %v4233_v31, %v4008_v60 }
 0x365   : > { %v5624_v58 = vpop.eup %5623  ;;  %v4204_v38 = vadd.f32 %v8052_v62, %v4017_v14  ;;  %v4018_v25 = vunpack.c.l.bf16 %v3718_v47  ;;  %v4028_v43 = vunpack.c.h.bf16 %v3718_v47  ;;  %v3428_v23 = vmul.bf16 1065369472, %v5616_v30 }
 0x366   : > { %v4284_v3 = vadd.f32 %v4283_v16, %v3890_v2  ;;  %v4254_v15 = vadd.f32 %v4253_v49, %v3899_v4  ;;  %v3247_v46 = vadd.bf16 1065369472, %v5618_v19  ;;  %v3189_v7 = vadd.bf16 1065369472, %v5620_v56 }
 0x367   : > { %v5626_v17 = vpop.eup %5625  ;;  %v8143_v20 = vadd.f32 %v4204_v38, %v4027_v50  ;;  %v4235_v27 = vadd.f32 %v4234_v34, %v4018_v25  ;;  %v3248_v45 = vadd.bf16 1065369472, %v5622_v61  ;;  %v3660_v60 = vmul.bf16 %v3428_v23, %v9055_v8  ;;  %v8156_v25 = vpop.f32.mrb[168].mxu1  ;;  %v9061_v8 = vld [vmem:[#allocation46_spill] sm:$0xff] }
 0x368   : > { %v5628_v37 = vpop.eup %5627  ;;  %v8145_v51 = vadd.f32 %v4254_v15, %v3909_v0  ;;  %5635 = vrcp.bf16 %v3247_v46  ;;  %v3190_v62 = vadd.bf16 1065369472, %v5624_v58  ;;  %v3199_v16 = vadd.bf16 1065369472, %v5626_v17  ;;  %9057 = vst [vmem:[#allocation37_spill] sm:$0xff] %v8156_v25  ;;  %v8159_v14 = vpop.f32.mrb[169].mxu1 }
 0x369   : > { %v5630_v55 = vpop.eup %5629  ;;  %v8148_v47 = vadd.f32 %v4235_v27, %v4028_v43  ;;  %5637 = vrcp.bf16 %v3189_v7  ;;  %v9056_v30 = vpack.c.bf16 %v7628_v59, %v7601_v21  ;;  %v3900_v15 = vunpack.c.l.bf16 %v3660_v60  ;;  %9058 = vst [vmem:[#allocation27_spill] sm:$0xff] %v8159_v14  ;;  %v9060_v0 = vld [vmem:[#allocation40_spill] sm:$0xff]  ;;  %v8169_v34 = vpop.f32.mrb[170].mxu1  ;;  %v9063_v43 = vld [vmem:[#allocation42_spill] sm:$0xff]  ;;  %v9068_v7 = vld [vmem:[#allocation75_spill] sm:$0xff] }
 0x36a   : > { %v5632_v31 = vpop.eup %5631  ;;  %5639 = vrcp.bf16 %v3248_v45  ;;  %v4769_v56 = vmul.bf16 3216621497, %v8125_v41  ;;  %v3910_v50 = vunpack.c.h.bf16 %v3660_v60  ;;  %v3200_v61 = vadd.bf16 1065369472, %v5628_v37  ;;  %9062 = vst [vmem:[#allocation64_spill] sm:$0xff] %v8169_v34  ;;  %v9064_v17 = vld [vmem:[#allocation50_spill] sm:$0xff] }
 0x36b   : > { %v8154_v38 = vadd.bf16 %v8103_v29, %v9056_v30  ;;  %v5634_v19 = vpop.eup %5633  ;;  %v3101_v2 = vadd.bf16 1065369472, %v5632_v31  ;;  %5641 = vrcp.bf16 %v3190_v62  ;;  %v3209_v49 = vadd.bf16 1065369472, %v5630_v55  ;;  %v9065_v46 = vld [vmem:[#allocation52_spill] sm:$0xff]  ;;  %v9066_v37 = vld [vmem:[#allocation69_spill] sm:$0xff] }
 0x36c   : > { %v4285_v4 = vadd.f32 %v4284_v3, %v3900_v15  ;;  %5643 = vrcp.bf16 %v3199_v16  ;;  %v9059_v21 = vpack.c.bf16 %v9045_v39, %v9044_v26  ;;  %v2029_v58 = vpack.c.bf16 %v9061_v8, %v9060_v0  ;;  %v9067_v3 = vld [vmem:[#allocation71_spill] sm:$0xff]  ;;  %v8177_v55 = vpop.f32.mrb[171].mxu1 }
 0x36d   : > { %5645 = vrcp.bf16 %v3101_v2  ;;  %v2128_v23 = vpack.c.bf16 %v9064_v17, %v9063_v43  ;;  %v2030_v27 = vpack.c.bf16 %v9066_v37, %v9065_v46  ;;  %v2137_v45 = vpack.c.bf16 %v9068_v7, %v9067_v3  ;;  %9069 = vst [vmem:[#allocation29_spill] sm:$0xff] %v8177_v55  ;;  %v9075_v8 = vld [vmem:[#allocation43_spill] sm:$0xff]  ;;  %v9078_v46 = vld [vmem:[#allocation74_spill] sm:$0xff]  ;;  %v9079_v37 = vld [vmem:[#allocation77_spill] sm:$0xff]  ;;  %v8211_v3 = vpop.f32.mrb[172].mxu1 }
 0x36e   : > { %v8165_v59 = vadd.bf16 %v7511_v44, %v9059_v21  ;;  %v9070_v26 = vrot.slane %v9047_v6, 1  ;;  %v8182_v60 = vadd.f32 %v4285_v4, %v3910_v50  ;;  %v3111_v62 = vadd.bf16 1065369472, %v5634_v19  ;;  %v9071_v21 = vld [vmem:[#allocation72_spill] sm:$0xff]  ;;  %v9073_v4 = vld [vmem:[#allocation73_spill] sm:$0xff]  ;;  %9080 = vst [vmem:[#allocation35_spill] sm:$0xff] %v8211_v3 }
 0x36f   : > { %v8185_v31 = vadd.bf16 %v8066_v1, %v2029_v58  ;;  %5647 = vrcp.bf16 %v3200_v61  ;;  %v4877_v16 = vmul.bf16 3216621497, %v8121_v33  ;;  %v4779_v30 = vmul.bf16 3216621497, %v8154_v38  ;;  %v9074_v19 = vld [vmem:[#allocation76_spill] sm:$0xff] }
 0x370   : > { %v4383_v39 = vadd.f32 %v9070_v26, %v9047_v6  ;;  %v8190_v15 = vadd.bf16 %v7543_v10, %v2128_v23  ;;  %5649 = vpow.bf16 %v4769_v56  ;;  %v8193_v2 = vadd.bf16 %v8103_v29, %v2030_v27  ;;  %v9072_v6 = vld [vmem:[#allocation63_spill] sm:$0xff] }
 0x371   : > { %v2039_v50 = vpack.c.bf16 %v9072_v6, %v9071_v21  ;;  %v2138_v0 = vpack.c.bf16 %v9074_v19, %v9073_v4  ;;  %v9076_v61 = vrot.slane %v7639_v22, %v8921_v24  ;;  %v4388_v43 = vrot.slane %v8115_v63, 1  ;;  %v9081_v22 = vld [vmem:[#allocation45_spill] sm:$0xff]  ;;  %v9082_v26 = vld [vmem:[#allocation47_spill] sm:$0xff]  ;;  %v9085_v19 = vld [vmem:[#allocation48_spill] sm:$0xff] }
 0x372   : > { %5651 = vrcp.bf16 %v3209_v49  ;;  %v4886_v56 = vmul.bf16 3216621497, %v8165_v59  ;;  %v4788_v17 = vmul.bf16 3216621497, %v8185_v31  ;;  %v4887_v23 = vmul.bf16 3216621497, %v8190_v15 }
 0x373   : > { %v8203_v58 = vmul.f32 %v9076_v61, %v9075_v8  ;;  %5653 = vrcp.bf16 %v3111_v62  ;;  %v5636_v7 = vpop.eup %5635  ;;  %v9083_v6 = vld [vmem:[#allocation49_spill] sm:$0xff]  ;;  %v9084_v4 = vld [vmem:[#allocation51_spill] sm:$0xff]  ;;  %v8219_v61 = vpop.f32.mrb[173].mxu1  ;;  %v4789_v27 = vmul.bf16 3216621497, %v8193_v2  ;;  %v8228_v49 = vadd.bf16 %v7511_v44, %v2137_v45 }
 0x374   : > { %5655 = vpow.bf16 %v4877_v16  ;;  %v9086_v8 = vld [vmem:[#allocation55_spill] sm:$0xff]  ;;  %9087 = vst [vmem:[#allocation65_spill] sm:$0xff] %v8219_v61  ;;  %v5638_v24 = vpop.eup %5637  ;;  %v3562_v55 = vmul.bf16 1065369472, %v5636_v7  ;;  %v8225_v16 = vadd.f32 %v4388_v43, %v8115_v63  ;;  %v8230_v14 = vpop.f32.mrb[174].mxu1  ;;  %v8240_v45 = vadd.bf16 %v7543_v10, %v2138_v0 }
 0x375   : > { %9077 = vst [vmem:[#allocation36_spill] sm:$0xff] %v8203_v58  ;;  %v8221_v58 = vmul.f32 0.00390625, %v4383_v39  ;;  %5657 = vpow.bf16 %v4779_v30  ;;  %v5640_v3 = vpop.eup %5639  ;;  %v3446_v21 = vmul.bf16 1065369472, %v5638_v24  ;;  %9090 = vst [vmem:[#allocation34_spill] sm:$0xff] %v8230_v14  ;;  %v8234_v30 = vadd.bf16 %v8066_v1, %v2039_v50  ;;  %v8236_v7 = vpop.f32.mrb[175].mxu1 }
 0x376   : > { %9089 = vst [vmem:[#allocation66_spill] sm:$0xff] %v8225_v16  ;;  %5659 = vpow.bf16 %v4886_v56  ;;  %v5642_v62 = vpop.eup %5641  ;;  %v3727_v61 = vmul.bf16 %v3562_v55, %v7959_v36  ;;  %v3564_v39 = vmul.bf16 1065369472, %v5640_v3  ;;  %9091 = vst [vmem:[#allocation67_spill] sm:$0xff] %v8236_v7 }
 0x377   : > { %9088 = vst [vmem:[#allocation39_spill] sm:$0xff] %v8221_v58  ;;  %5661 = vpow.bf16 %v4788_v17  ;;  %v5644_v58 = vpop.eup %5643  ;;  %v3669_v63 = vmul.bf16 %v3446_v21, %v7968_v52  ;;  %v3448_v24 = vmul.bf16 1065369472, %v5642_v62 }
 0x378   : > { %5663 = vpow.bf16 %v4887_v23  ;;  %v5646_v43 = vpop.eup %5645  ;;  %v4037_v56 = vunpack.c.l.bf16 %v3727_v61  ;;  %v3728_v16 = vmul.bf16 %v3564_v39, %v7974_v32  ;;  %v3466_v36 = vmul.bf16 1065369472, %v5644_v58 }
 0x379   : > { %5665 = vpow.bf16 %v4789_v27  ;;  %v4047_v55 = vunpack.c.h.bf16 %v3727_v61  ;;  %v3919_v17 = vunpack.c.l.bf16 %v3669_v63  ;;  %v3670_v50 = vmul.bf16 %v3448_v24, %v7990_v53 }
 0x37a   : > { %v3270_v3 = vmul.bf16 1065369472, %v5646_v43  ;;  %v5648_v7 = vpop.eup %5647  ;;  %v4206_v14 = vadd.f32 %v8143_v20, %v4037_v56  ;;  %v3929_v52 = vunpack.c.h.bf16 %v3669_v63  ;;  %v4038_v21 = vunpack.c.l.bf16 %v3728_v16 }
 0x37b   : > { %v3679_v23 = vmul.bf16 %v3466_v36, %v7998_v54  ;;  %v5650_v0 = vpop.eup %5649  ;;  %v4256_v62 = vadd.f32 %v8145_v51, %v3919_v17  ;;  %v4048_v34 = vunpack.c.h.bf16 %v3728_v16  ;;  %v3920_v25 = vunpack.c.l.bf16 %v3670_v50 }
 0x37c   : > { %v3581_v32 = vmul.bf16 %v3270_v3, %v8086_v5  ;;  %v4207_v27 = vadd.f32 %v4206_v14, %v4047_v55  ;;  %v4237_v61 = vadd.f32 %v8148_v47, %v4038_v21  ;;  %v3930_v53 = vunpack.c.h.bf16 %v3670_v50 }
 0x37d   : > { %v5652_v58 = vpop.eup %5651  ;;  %v3939_v39 = vunpack.c.l.bf16 %v3679_v23  ;;  %v4257_v43 = vadd.f32 %v4256_v62, %v3929_v52  ;;  %v4287_v20 = vadd.f32 %v8182_v60, %v3920_v25  ;;  %v3949_v63 = vunpack.c.h.bf16 %v3679_v23 }
 0x37e   : > { %v5654_v24 = vpop.eup %5653  ;;  %v3741_v56 = vunpack.c.l.bf16 %v3581_v32  ;;  %v4238_v36 = vadd.f32 %v4237_v61, %v4048_v34  ;;  %v3751_v42 = vunpack.c.h.bf16 %v3581_v32  ;;  %v3468_v51 = vmul.bf16 1065369472, %v5648_v7 }
 0x37f   : > { %v5656_v54 = vpop.eup %5655  ;;  %v3102_v16 = vadd.bf16 1065369472, %v5650_v0  ;;  %v4390_v35 = vrot.slane %v4207_v27, 4  ;;  %v4288_v5 = vadd.f32 %v4287_v20, %v3930_v53  ;;  %v4258_v3 = vadd.f32 %v4257_v43, %v3939_v39 }
 0x380   : > { %v5658_v17 = vpop.eup %5657  ;;  %v3486_v14 = vmul.bf16 1065369472, %v5652_v58  ;;  %v3680_v47 = vmul.bf16 %v3468_v51, %v8059_v40  ;;  %v4896_v50 = vmul.bf16 3216621497, %v8228_v49  ;;  %v4798_v25 = vmul.bf16 3216621497, %v8234_v30 }
 0x381   : > { %v5660_v55 = vpop.eup %5659  ;;  %5667 = vrcp.bf16 %v3102_v16  ;;  %v4259_v52 = vadd.f32 %v4258_v3, %v3949_v63  ;;  %v3290_v21 = vmul.bf16 1065369472, %v5654_v24  ;;  %v3210_v7 = vadd.bf16 1065369472, %v5656_v54 }
 0x382   : > { %v5662_v60 = vpop.eup %5661  ;;  %v3689_v34 = vmul.bf16 %v3486_v14, %v8069_v28  ;;  %v4301_v0 = vadd.f32 %v3751_v42, %v3741_v56  ;;  %v3940_v62 = vunpack.c.l.bf16 %v3680_v47  ;;  %v4897_v32 = vmul.bf16 3216621497, %v8240_v45 }
 0x383   : > { %v5664_v23 = vpop.eup %5663  ;;  %v9092_v58 = vpack.c.bf16 %v9079_v37, %v9078_v46  ;;  %v8261_v53 = vadd.f32 %v4390_v35, %v4207_v27  ;;  %v3591_v43 = vmul.bf16 %v3290_v21, %v8090_v11  ;;  %5669 = vrcp.bf16 %v3210_v7  ;;  %v9096_v21 = vld [vmem:[#allocation53_spill] sm:$0xff]  ;;  %v9097_v7 = vld [vmem:[#allocation59_spill] sm:$0xff] }
 0x384   : > { %v5666_v61 = vpop.eup %5665  ;;  %v3959_v39 = vunpack.c.l.bf16 %v3689_v34  ;;  %v4396_v28 = vrot.slane %v4238_v36, 4  ;;  %v3950_v24 = vunpack.c.h.bf16 %v3680_v47  ;;  %v4289_v20 = vadd.f32 %v4288_v5, %v3940_v62 }
 0x385   : > { %v8259_v40 = vadd.bf16 %v8103_v29, %v9092_v58  ;;  %v3112_v42 = vadd.bf16 1065369472, %v5658_v17  ;;  %v3969_v63 = vunpack.c.h.bf16 %v3689_v34  ;;  %v3761_v54 = vunpack.c.l.bf16 %v3591_v43  ;;  %v9101_v58 = vld [vmem:[#allocation79_spill] sm:$0xff] }
 0x386   : > { %v4260_v56 = vadd.f32 %v4259_v52, %v3959_v39  ;;  %v3219_v51 = vadd.bf16 1065369472, %v5660_v55  ;;  %v8264_v16 = vadd.f32 %v4289_v20, %v3950_v24  ;;  %v3771_v46 = vunpack.c.h.bf16 %v3591_v43  ;;  %v9102_v39 = vld [vmem:[#allocation57_spill] sm:$0xff]  ;;  %v9103_v43 = vld [vmem:[#allocation80_spill] sm:$0xff] }
 0x387   : > { %5671 = vrcp.bf16 %v3112_v42  ;;  %v9093_v35 = vpack.c.bf16 %v9082_v26, %v9081_v22  ;;  %v4302_v27 = vadd.f32 %v4301_v0, %v3761_v54  ;;  %v3121_v5 = vadd.bf16 1065369472, %v5662_v60  ;;  %v9104_v24 = vld [vmem:[#allocation61_spill] sm:$0xff] }
 0x388   : > { %v8272_v11 = vadd.f32 %v4260_v56, %v3969_v63  ;;  %5673 = vrcp.bf16 %v3219_v51  ;;  %v3220_v17 = vadd.bf16 1065369472, %v5664_v23  ;;  %v3122_v3 = vadd.bf16 1065369472, %v5666_v61  ;;  %v9099_v23 = vld [vmem:[#allocation78_spill] sm:$0xff]  ;;  %v9105_v20 = vld [vmem:[#allocation81_spill] sm:$0xff] }
 0x389   : > { %v8270_v37 = vadd.bf16 %v7511_v44, %v9093_v35  ;;  %v4799_v14 = vmul.bf16 3216621497, %v8259_v40  ;;  %v9094_v55 = vpack.c.bf16 %v9084_v4, %v9083_v6  ;;  %v4392_v22 = vrot.slane %v8261_v53, 2  ;;  %v9098_v4 = vld [vmem:[#allocation54_spill] sm:$0xff] }
 0x38a   : > { %v8282_v26 = vadd.f32 %v4396_v28, %v4238_v36  ;;  %v8284_v52 = vadd.f32 %v4302_v27, %v3771_v46  ;;  %5675 = vrcp.bf16 %v3121_v5  ;;  %v9095_v60 = vpack.c.bf16 %v9086_v8, %v9085_v19  ;;  %v9100_v36 = vld [vmem:[#allocation58_spill] sm:$0xff] }
 0x38b   : > { %v8279_v47 = vadd.bf16 %v8066_v1, %v9094_v55  ;;  %5677 = vrcp.bf16 %v3220_v17  ;;  %v2050_v6 = vpack.c.bf16 %v9097_v7, %v9096_v21  ;;  %v2157_v0 = vpack.c.bf16 %v9099_v23, %v9098_v4  ;;  %v9107_v21 = vld [vmem:[#allocation5_spill] sm:$0xff]  ;;  %v9108_v23 = vld [vmem:[#allocation60_spill] sm:$0xff] }
 0x38c   : > { %v8290_v34 = vadd.bf16 %v7543_v10, %v9095_v60  ;;  %v5668_v62 = vpop.eup %5667  ;;  %5679 = vrcp.bf16 %v3122_v3  ;;  %v2059_v61 = vpack.c.bf16 %v9101_v58, %v9100_v36  ;;  %v2158_v28 = vpack.c.bf16 %v9103_v43, %v9102_v39 }
 0x38d   : > { %v2060_v19 = vpack.c.bf16 %v9105_v20, %v9104_v24  ;;  %v3272_v8 = vmul.bf16 1065369472, %v5668_v62  ;;  %5681 = vpow.bf16 %v4896_v50  ;;  %v4906_v42 = vmul.bf16 3216621497, %v8270_v37 }
 0x38e   : > { %v8304_v63 = vadd.bf16 %v8103_v29, %v2050_v6  ;;  %5683 = vpow.bf16 %v4798_v25  ;;  %v4808_v56 = vmul.bf16 3216621497, %v8279_v47  ;;  %v8308_v54 = vadd.bf16 %v7511_v44, %v2157_v0  ;;  %v5670_v46 = vpop.eup %5669  ;;  %v9109_v0 = vld [vmem:[#allocation13_spill] sm:$0xff] }
 0x38f   : > { %v8311_v51 = vadd.bf16 %v8066_v1, %v2059_v61  ;;  %v3582_v35 = vmul.bf16 %v3272_v8, %v8125_v41  ;;  %5685 = vpow.bf16 %v4897_v32  ;;  %v4907_v50 = vmul.bf16 3216621497, %v8290_v34 }
 0x390   : > { %v8316_v27 = vadd.bf16 %v7543_v10, %v2158_v28  ;;  %v3488_v5 = vmul.bf16 1065369472, %v5670_v46  ;;  %5687 = vpow.bf16 %v4799_v14  ;;  %v4809_v25 = vmul.bf16 3216621497, %v8304_v63  ;;  %v9106_v10 = vld [vmem:[#allocation56_spill] sm:$0xff] }
 0x391   : > { %v8320_v17 = vadd.bf16 %v8103_v29, %v2060_v19  ;;  %v3742_v44 = vunpack.c.l.bf16 %v3582_v35  ;;  %v3752_v3 = vunpack.c.h.bf16 %v3582_v35  ;;  %5689 = vpow.bf16 %v4906_v42 }
 0x392   : > { %v4916_v55 = vmul.bf16 3216621497, %v8308_v54  ;;  %v5672_v60 = vpop.eup %5671  ;;  %v3690_v41 = vmul.bf16 %v3488_v5, %v8121_v33  ;;  %5691 = vpow.bf16 %v4808_v56  ;;  %v4818_v32 = vmul.bf16 3216621497, %v8311_v51 }
 0x393   : > { %v2069_v7 = vpack.c.bf16 %v9107_v21, %v9106_v10  ;;  %v5674_v14 = vpop.eup %5673  ;;  %v3292_v6 = vmul.bf16 1065369472, %v5672_v60  ;;  %5693 = vpow.bf16 %v4907_v50  ;;  %v4917_v4 = vmul.bf16 3216621497, %v8316_v27  ;;  %v9112_v21 = vld [vmem:[#allocation16_spill] sm:$0xff] }
 0x394   : > { %v2070_v62 = vpack.c.bf16 %v9109_v0, %v9108_v23  ;;  %v3960_v36 = vunpack.c.l.bf16 %v3690_v41  ;;  %v3506_v58 = vmul.bf16 1065369472, %v5674_v14  ;;  %5695 = vpow.bf16 %v4809_v25 }
 0x395   : > { %v4819_v61 = vmul.bf16 3216621497, %v8320_v17  ;;  %v5676_v33 = vpop.eup %5675  ;;  %v4332_v39 = vadd.f32 %v3752_v3, %v3742_v44  ;;  %v3970_v43 = vunpack.c.h.bf16 %v3690_v41  ;;  %v3592_v28 = vmul.bf16 %v3292_v6, %v8154_v38 }
 0x396   : > { %5697 = vpow.bf16 %v4916_v55  ;;  %v5678_v24 = vpop.eup %5677  ;;  %v4291_v20 = vadd.f32 %v8264_v16, %v3960_v36  ;;  %v3699_v19 = vmul.bf16 %v3506_v58, %v8165_v59  ;;  %v3310_v8 = vmul.bf16 1065369472, %v5676_v33 }
 0x397   : > { %5699 = vpow.bf16 %v4818_v32  ;;  %v5680_v42 = vpop.eup %5679  ;;  %v3762_v56 = vunpack.c.l.bf16 %v3592_v28  ;;  %v3772_v46 = vunpack.c.h.bf16 %v3592_v28  ;;  %v3508_v35 = vmul.bf16 1065369472, %v5678_v24 }
 0x398   : > { %5701 = vpow.bf16 %v4917_v4  ;;  %v5682_v50 = vpop.eup %5681  ;;  %v4292_v5 = vadd.f32 %v4291_v20, %v3970_v43  ;;  %v3979_v25 = vunpack.c.l.bf16 %v3699_v19  ;;  %v3989_v44 = vunpack.c.h.bf16 %v3699_v19 }
 0x399   : > { %v3601_v3 = vmul.bf16 %v3310_v8, %v8185_v31  ;;  %v5684_v38 = vpop.eup %5683  ;;  %v4333_v55 = vadd.f32 %v4332_v39, %v3762_v56  ;;  %v3700_v60 = vmul.bf16 %v3508_v35, %v8190_v15  ;;  %v3312_v16 = vmul.bf16 1065369472, %v5680_v42 }
 0x39a   : > { %v3229_v41 = vadd.bf16 1065369472, %v5682_v50  ;;  %v5686_v59 = vpop.eup %5685  ;;  %v4262_v32 = vadd.f32 %v8272_v11, %v3979_v25  ;;  %v3131_v36 = vadd.bf16 1065369472, %v5684_v38 }
 0x39b   : > { %v3781_v14 = vunpack.c.l.bf16 %v3601_v3  ;;  %v3791_v6 = vunpack.c.h.bf16 %v3601_v3  ;;  %v5688_v58 = vpop.eup %5687  ;;  %v4334_v4 = vadd.f32 %v4333_v55, %v3772_v46  ;;  %v3980_v33 = vunpack.c.l.bf16 %v3700_v60 }
 0x39c   : > { %v3990_v43 = vunpack.c.h.bf16 %v3700_v60  ;;  %v3602_v28 = vmul.bf16 %v3312_v16, %v8193_v2  ;;  %v5690_v24 = vpop.eup %5689  ;;  %v8338_v31 = vadd.f32 %v4262_v32, %v3989_v44  ;;  %5703 = vrcp.bf16 %v3229_v41  ;;  %v9111_v32 = vld [vmem:[#allocation17_spill] sm:$0xff] }
 0x39d   : > { %v4304_v39 = vadd.f32 %v8284_v52, %v3781_v14  ;;  %v3230_v15 = vadd.bf16 1065369472, %v5686_v59  ;;  %v5692_v20 = vpop.eup %5691  ;;  %v4293_v19 = vadd.f32 %v4292_v5, %v3980_v33  ;;  %5705 = vrcp.bf16 %v3131_v36  ;;  %v9110_v59 = vld [vmem:[#allocation6_spill] sm:$0xff]  ;;  %v9116_v33 = vld [vmem:[#allocation12_spill] sm:$0xff] }
 0x39e   : > { %v3782_v8 = vunpack.c.l.bf16 %v3602_v28  ;;  %v3792_v11 = vunpack.c.h.bf16 %v3602_v28  ;;  %v5694_v42 = vpop.eup %5693  ;;  %v3132_v46 = vadd.bf16 1065369472, %v5688_v58  ;;  %v3239_v35 = vadd.bf16 1065369472, %v5690_v24  ;;  %v9114_v58 = vld [vmem:[#allocation15_spill] sm:$0xff] }
 0x39f   : > { %v8341_v56 = vadd.f32 %v4304_v39, %v3791_v6  ;;  %5707 = vrcp.bf16 %v3230_v15  ;;  %v5696_v50 = vpop.eup %5695  ;;  %v8343_v2 = vadd.f32 %v4293_v19, %v3990_v43  ;;  %v3141_v44 = vadd.bf16 1065369472, %v5692_v20  ;;  %v9117_v43 = vld [vmem:[#allocation4_spill] sm:$0xff]  ;;  %v9118_v15 = vld [vmem:[#allocation33_spill] sm:$0xff]  ;;  %v9119_v20 = vld [vmem:[#allocation19_spill] sm:$0xff] }
 0x3a0   : > { %v4335_v25 = vadd.f32 %v4334_v4, %v3782_v8  ;;  %v3240_v3 = vadd.bf16 1065369472, %v5694_v42  ;;  %5709 = vrcp.bf16 %v3132_v46  ;;  %v3142_v38 = vadd.bf16 1065369472, %v5696_v50  ;;  %v9115_v4 = vld [vmem:[#allocation32_spill] sm:$0xff]  ;;  %v9120_v42 = vld [vmem:[#allocation22_spill] sm:$0xff] }
 0x3a1   : > { %v5698_v52 = vpop.eup %5697  ;;  %v8349_v5 = vadd.bf16 %v8066_v1, %v2069_v7  ;;  %v8355_v55 = vadd.bf16 %v8103_v29, %v2070_v62  ;;  %5711 = vrcp.bf16 %v3239_v35  ;;  %v2079_v14 = vpack.c.bf16 %v9111_v32, %v9110_v59  ;;  %v9113_v7 = vld [vmem:[#allocation31_spill] sm:$0xff]  ;;  %v9121_v46 = vld [vmem:[#allocation14_spill] sm:$0xff] }
 0x3a2   : > { %v5700_v60 = vpop.eup %5699  ;;  %v8357_v16 = vadd.f32 %v4335_v25, %v3792_v11  ;;  %v3249_v41 = vadd.bf16 1065369472, %v5698_v52  ;;  %5713 = vrcp.bf16 %v3141_v44  ;;  %v2080_v36 = vpack.c.bf16 %v9113_v7, %v9112_v21 }
 0x3a3   : > { %v5702_v6 = vpop.eup %5701  ;;  %v3151_v10 = vadd.bf16 1065369472, %v5700_v60  ;;  %v2089_v23 = vpack.c.bf16 %v9115_v4, %v9114_v58  ;;  %5715 = vrcp.bf16 %v3240_v3  ;;  %v8366_v62 = vadd.bf16 %v8066_v1, %v2079_v14  ;;  %v9122_v60 = vld [vmem:[#allocation18_spill] sm:$0xff] }
 0x3a4   : > { %v3250_v0 = vadd.bf16 1065369472, %v5702_v6  ;;  %v2090_v28 = vpack.c.bf16 %v9117_v43, %v9116_v33  ;;  %5717 = vrcp.bf16 %v3142_v38  ;;  %v8371_v24 = vadd.bf16 %v8103_v29, %v2080_v36 }
 0x3a5   : > { %v8374_v39 = vadd.bf16 %v8066_v1, %v2089_v23  ;;  %v2099_v19 = vpack.c.bf16 %v9119_v20, %v9118_v15  ;;  %5719 = vrcp.bf16 %v3249_v41  ;;  %v4828_v8 = vmul.bf16 3216621497, %v8349_v5  ;;  %v9123_v41 = vld [vmem:[#allocation21_spill] sm:$0xff] }
 0x3a6   : > { %v8380_v11 = vadd.bf16 %v8103_v29, %v2090_v28  ;;  %v2100_v35 = vpack.c.bf16 %v9121_v46, %v9120_v42  ;;  %5721 = vrcp.bf16 %v3151_v10  ;;  %v4829_v50 = vmul.bf16 3216621497, %v8355_v55  ;;  %v9124_v10 = vld [vmem:[#allocation28_spill] sm:$0xff] }
 0x3a7   : > { %v4838_v25 = vmul.bf16 3216621497, %v8366_v62  ;;  %v8387_v44 = vadd.bf16 %v8066_v1, %v2099_v19  ;;  %v5704_v3 = vpop.eup %5703  ;;  %5723 = vrcp.bf16 %v3250_v0  ;;  %v4839_v52 = vmul.bf16 3216621497, %v8371_v24 }
 0x3a8   : > { %v4848_v38 = vmul.bf16 3216621497, %v8374_v39  ;;  %v2109_v59 = vpack.c.bf16 %v9123_v41, %v9122_v60  ;;  %v5706_v32 = vpop.eup %5705  ;;  %v3526_v14 = vmul.bf16 1065369472, %v5704_v3  ;;  %5725 = vpow.bf16 %v4819_v61 }
 0x3a9   : > { %v4849_v6 = vmul.bf16 3216621497, %v8380_v11  ;;  %v2110_v21 = vpack.c.bf16 %v8025_v9, %v9124_v10  ;;  %v3330_v36 = vmul.bf16 1065369472, %v5706_v32  ;;  %5727 = vpow.bf16 %v4828_v8 }
 0x3aa   : > { %v5708_v7 = vpop.eup %5707  ;;  %v4858_v58 = vmul.bf16 3216621497, %v8387_v44  ;;  %v8400_v4 = vadd.bf16 %v8103_v29, %v2100_v35  ;;  %v3709_v23 = vmul.bf16 %v3526_v14, %v8228_v49  ;;  %5729 = vpow.bf16 %v4829_v50 }
 0x3ab   : > { %v3528_v0 = vmul.bf16 1065369472, %v5708_v7  ;;  %v8404_v33 = vadd.bf16 %v8066_v1, %v2109_v59  ;;  %v5710_v61 = vpop.eup %5709  ;;  %v3611_v43 = vmul.bf16 %v3330_v36, %v8234_v30  ;;  %5731 = vpow.bf16 %v4838_v25 }
 0x3ac   : > { %v8408_v9 = vadd.bf16 %v8103_v29, %v2110_v21  ;;  %v2119_v28 = vpack.c.bf16 %v8040_v18, %v8032_v13  ;;  %v5712_v15 = vpop.eup %5711  ;;  %v3999_v20 = vunpack.c.l.bf16 %v3709_v23  ;;  %v4009_v19 = vunpack.c.h.bf16 %v3709_v23 }
 0x3ad   : > { %v3710_v49 = vmul.bf16 %v3528_v0, %v8240_v45  ;;  %v3332_v8 = vmul.bf16 1065369472, %v5710_v61  ;;  %v5714_v42 = vpop.eup %5713  ;;  %v3801_v46 = vunpack.c.l.bf16 %v3611_v43  ;;  %v3811_v35 = vunpack.c.h.bf16 %v3611_v43 }
 0x3ae   : > { %v3546_v50 = vmul.bf16 1065369472, %v5712_v15  ;;  %5733 = vpow.bf16 %v4839_v52  ;;  %v5716_v3 = vpop.eup %5715  ;;  %v4264_v30 = vadd.f32 %v8338_v31, %v3999_v20  ;;  %v3350_v10 = vmul.bf16 1065369472, %v5714_v42 }
 0x3af   : > { %v4000_v25 = vunpack.c.l.bf16 %v3710_v49  ;;  %v4010_v60 = vunpack.c.h.bf16 %v3710_v49  ;;  %v3612_v41 = vmul.bf16 %v3332_v8, %v8259_v40  ;;  %v5718_v59 = vpop.eup %5717  ;;  %v4306_v32 = vadd.f32 %v8341_v56, %v3801_v46 }
 0x3b0   : > { %v3719_v14 = vmul.bf16 %v3546_v50, %v8270_v37  ;;  %v3548_v45 = vmul.bf16 1065369472, %v5716_v3  ;;  %v5720_v21 = vpop.eup %5719  ;;  %v4265_v7 = vadd.f32 %v4264_v30, %v4009_v19  ;;  %v3621_v15 = vmul.bf16 %v3350_v10, %v8279_v47 }
 0x3b1   : > { %v4295_v36 = vadd.f32 %v8343_v2, %v4000_v25  ;;  %v3802_v23 = vunpack.c.l.bf16 %v3612_v41  ;;  %v3812_v52 = vunpack.c.h.bf16 %v3612_v41  ;;  %v5722_v0 = vpop.eup %5721  ;;  %v4307_v61 = vadd.f32 %v4306_v32, %v3811_v35 }
 0x3b2   : > { %v4019_v31 = vunpack.c.l.bf16 %v3719_v14  ;;  %v4029_v43 = vunpack.c.h.bf16 %v3719_v14  ;;  %v5724_v40 = vpop.eup %5723  ;;  %v3720_v37 = vmul.bf16 %v3548_v45, %v8290_v34  ;;  %v3352_v49 = vmul.bf16 1065369472, %v5718_v59 }
 0x3b3   : > { %v4296_v20 = vadd.f32 %v4295_v36, %v4010_v60  ;;  %v4337_v56 = vadd.f32 %v8357_v16, %v3802_v23  ;;  %v5726_v8 = vpop.eup %5725  ;;  %v3821_v19 = vunpack.c.l.bf16 %v3621_v15  ;;  %v3831_v46 = vunpack.c.h.bf16 %v3621_v15 }
 0x3b4   : > { %v4266_v42 = vadd.f32 %v4265_v7, %v4019_v31  ;;  %v3566_v2 = vmul.bf16 1065369472, %v5720_v21  ;;  %v5728_v50 = vpop.eup %5727  ;;  %v4020_v30 = vunpack.c.l.bf16 %v3720_v37  ;;  %v4030_v35 = vunpack.c.h.bf16 %v3720_v37 }
 0x3b5   : > { %v4338_v3 = vadd.f32 %v4337_v56, %v3812_v52  ;;  %v3622_v25 = vmul.bf16 %v3352_v49, %v8304_v63  ;;  %v5730_v41 = vpop.eup %5729  ;;  %v4308_v32 = vadd.f32 %v4307_v61, %v3821_v19  ;;  %v3370_v16 = vmul.bf16 1065369472, %v5722_v0 }
 0x3b6   : > { %v4267_v47 = vadd.f32 %v4266_v42, %v4029_v43  ;;  %v3729_v60 = vmul.bf16 %v3566_v2, %v8308_v54  ;;  %v5732_v14 = vpop.eup %5731  ;;  %v4297_v34 = vadd.f32 %v4296_v20, %v4020_v30  ;;  %v3568_v45 = vmul.bf16 1065369472, %v5724_v40 }
 0x3b7   : > { %v3822_v59 = vunpack.c.l.bf16 %v3622_v25  ;;  %v3832_v10 = vunpack.c.h.bf16 %v3622_v25  ;;  %v4309_v7 = vadd.f32 %v4308_v32, %v3831_v46  ;;  %v3631_v23 = vmul.bf16 %v3370_v16, %v8311_v51  ;;  %v9127_v32 = vld [vmem:[#allocation20_spill] sm:$0xff] }
 0x3b8   : > { %v4039_v36 = vunpack.c.l.bf16 %v3729_v60  ;;  %v4049_v21 = vunpack.c.h.bf16 %v3729_v60  ;;  %v4298_v31 = vadd.f32 %v4297_v34, %v4030_v35  ;;  %v3730_v63 = vmul.bf16 %v3568_v45, %v8316_v27 }
 0x3b9   : > { %v5734_v52 = vpop.eup %5733  ;;  %v4339_v15 = vadd.f32 %v4338_v3, %v3822_v59  ;;  %v3152_v43 = vadd.bf16 1065369472, %v5726_v8  ;;  %v3841_v56 = vunpack.c.l.bf16 %v3631_v23  ;;  %v3851_v54 = vunpack.c.h.bf16 %v3631_v23 }
 0x3ba   : > { %v4268_v61 = vadd.f32 %v4267_v47, %v4039_v36  ;;  %v3161_v0 = vadd.bf16 1065369472, %v5728_v50  ;;  %v4040_v20 = vunpack.c.l.bf16 %v3730_v63  ;;  %v4050_v49 = vunpack.c.h.bf16 %v3730_v63  ;;  %v9126_v47 = vld [vmem:[#allocation23_spill] sm:$0xff]  ;;  %v9131_v36 = vld [vmem:[#allocation62_spill] sm:$0xff] }
 0x3bb   : > { %v8425_v37 = vadd.f32 %v4339_v15, %v3832_v10  ;;  %5735 = vrcp.bf16 %v3152_v43  ;;  %v4310_v42 = vadd.f32 %v4309_v7, %v3841_v56  ;;  %v3162_v19 = vadd.bf16 1065369472, %v5730_v41  ;;  %v9130_v7 = vld [vmem:[#allocation24_spill] sm:$0xff]  ;;  %v9134_v63 = vld [vmem:[#allocation27_spill] sm:$0xff]  ;;  %v9135_v43 = vld [vmem:[#allocation29_spill] sm:$0xff] }
 0x3bc   : > { %v4269_v40 = vadd.f32 %v4268_v61, %v4049_v21  ;;  %5737 = vrcp.bf16 %v3161_v0  ;;  %v4299_v51 = vadd.f32 %v4298_v31, %v4040_v20  ;;  %v3171_v46 = vadd.bf16 1065369472, %v5732_v14  ;;  %v9133_v31 = vld [vmem:[#allocation64_spill] sm:$0xff]  ;;  %v9136_v56 = vld [vmem:[#allocation35_spill] sm:$0xff] }
 0x3bd   : > { %v3172_v2 = vadd.bf16 1065369472, %v5734_v52  ;;  %5739 = vpow.bf16 %v4848_v38  ;;  %v8429_v27 = vadd.f32 %v4310_v42, %v3851_v54  ;;  %v4859_v8 = vmul.bf16 3216621497, %v8400_v4  ;;  %v9125_v38 = vld [vmem:[#allocation26_spill] sm:$0xff]  ;;  %v9132_v52 = vld [vmem:[#allocation37_spill] sm:$0xff] }
 0x3be   : > { %5741 = vrcp.bf16 %v3162_v19  ;;  %v4868_v50 = vmul.bf16 3216621497, %v8404_v33  ;;  %v4300_v3 = vadd.f32 %v4299_v51, %v4050_v49  ;;  %v8437_v30 = vadd.bf16 %v8066_v1, %v2119_v28  ;;  %v9129_v28 = vld [vmem:[#allocation30_spill] sm:$0xff] }
 0x3bf   : > { %5743 = vrcp.bf16 %v3171_v46  ;;  %v2120_v35 = vpack.c.bf16 %v8044_v12, %v8034_v57  ;;  %v4402_v25 = vrot.slane %v4269_v40, 4  ;;  %v2129_v41 = vpack.c.bf16 %v9125_v38, %v8078_v48  ;;  %v9137_v54 = vld [vmem:[#allocation34_spill] sm:$0xff] }
 0x3c0   : > { %5745 = vrcp.bf16 %v3172_v2  ;;  %v2130_v60 = vpack.c.bf16 %v9127_v32, %v9126_v47  ;;  %v8448_v16 = vadd.f32 %v4392_v22, %v8261_v53  ;;  %v4869_v13 = vmul.bf16 3216621497, %v8408_v9 }
 0x3c1   : > { %5747 = vpow.bf16 %v4849_v6  ;;  %v8454_v57 = vadd.bf16 %v8103_v29, %v2120_v35  ;;  %v4878_v18 = vmul.bf16 3216621497, %v8437_v30  ;;  %v8460_v12 = vadd.bf16 %v8066_v1, %v2129_v41  ;;  %v9128_v6 = vld [vmem:[#allocation3_spill] sm:$0xff] }
 0x3c2   : > { %5749 = vpow.bf16 %v4858_v58  ;;  %v8463_v48 = vadd.bf16 %v8103_v29, %v2130_v60  ;;  %v4398_v53 = vrot.slane %v8282_v26, 2  ;;  %v2139_v14 = vpack.c.bf16 %v9129_v28, %v9128_v6 }
 0x3c3   : > { %5751 = vpow.bf16 %v4859_v8  ;;  %v4879_v22 = vmul.bf16 3216621497, %v8454_v57  ;;  %v4403_v34 = vadd.f32 %v4402_v25, %v4269_v40  ;;  %v4408_v59 = vrot.slane %v4300_v3, 4 }
 0x3c4   : > { %5753 = vpow.bf16 %v4868_v50  ;;  %v4888_v58 = vmul.bf16 3216621497, %v8460_v12  ;;  %v4889_v10 = vmul.bf16 3216621497, %v8463_v48  ;;  %v8472_v45 = vadd.bf16 %v8066_v1, %v2139_v14 }
 0x3c5   : > { %5755 = vpow.bf16 %v4869_v13  ;;  %v2140_v21 = vpack.c.bf16 %v9131_v36, %v9130_v7  ;;  %v2149_v15 = vpack.c.bf16 %v9133_v31, %v9132_v52  ;;  %v2150_v61 = vpack.c.bf16 %v9135_v43, %v9134_v63 }
 0x3c6   : > { %v5736_v23 = vpop.eup %5735  ;;  %5757 = vpow.bf16 %v4878_v18  ;;  %v2159_v0 = vpack.c.bf16 %v9137_v54, %v9136_v56  ;;  %v4898_v40 = vmul.bf16 3216621497, %v8472_v45  ;;  %v4394_v51 = vrot.slane %v8448_v16, 1 }
 0x3c7   : > { %v5738_v20 = vpop.eup %5737  ;;  %v3372_v49 = vmul.bf16 1065369472, %v5736_v23  ;;  %5759 = vpow.bf16 %v4879_v22  ;;  %v8484_v42 = vadd.bf16 %v8103_v29, %v2140_v21  ;;  %v8488_v46 = vadd.f32 %v4398_v53, %v8282_v26 }
 0x3c8   : > { %v5740_v19 = vpop.eup %5739  ;;  %v3390_v2 = vmul.bf16 1065369472, %v5738_v20  ;;  %5761 = vpow.bf16 %v4888_v58  ;;  %v4404_v41 = vrot.slane %v4403_v34, 2  ;;  %v8493_v13 = vadd.f32 %v4408_v59, %v4300_v3 }
 0x3c9   : > { %v5742_v8 = vpop.eup %5741  ;;  %v3632_v50 = vmul.bf16 %v3372_v49, %v8320_v17  ;;  %v3181_v35 = vadd.bf16 1065369472, %v5740_v19  ;;  %5763 = vpow.bf16 %v4889_v10  ;;  %v4899_v25 = vmul.bf16 3216621497, %v8484_v42 }
 0x3ca   : > { %v5744_v38 = vpop.eup %5743  ;;  %v3641_v47 = vmul.bf16 %v3390_v2, %v8349_v5  ;;  %v3392_v32 = vmul.bf16 1065369472, %v5742_v8  ;;  %5765 = vpow.bf16 %v4898_v40  ;;  %v8500_v20 = vadd.f32 %v4404_v41, %v4403_v34 }
 0x3cb   : > { %v5746_v60 = vpop.eup %5745  ;;  %v3842_v26 = vunpack.c.l.bf16 %v3632_v50  ;;  %v3410_v18 = vmul.bf16 1065369472, %v5744_v38  ;;  %5767 = vrcp.bf16 %v3181_v35  ;;  %v3852_v22 = vunpack.c.h.bf16 %v3632_v50 }
 0x3cc   : > { %v5748_v53 = vpop.eup %5747  ;;  %v3861_v6 = vunpack.c.l.bf16 %v3641_v47  ;;  %v3642_v17 = vmul.bf16 %v3392_v32, %v8355_v55  ;;  %v3412_v28 = vmul.bf16 1065369472, %v5746_v60  ;;  %5769 = vpow.bf16 %v4899_v25 }
 0x3cd   : > { %v5750_v14 = vpop.eup %5749  ;;  %v4341_v58 = vadd.f32 %v8425_v37, %v3842_v26  ;;  %v3651_v10 = vmul.bf16 %v3410_v18, %v8366_v62  ;;  %v3182_v5 = vadd.bf16 1065369472, %v5748_v53  ;;  %v3871_v36 = vunpack.c.h.bf16 %v3641_v47 }
 0x3ce   : > { %v5752_v7 = vpop.eup %5751  ;;  %v4312_v3 = vadd.f32 %v8429_v27, %v3861_v6  ;;  %v3862_v59 = vunpack.c.l.bf16 %v3642_v17  ;;  %v3652_v21 = vmul.bf16 %v3412_v28, %v8371_v24  ;;  %v3872_v37 = vunpack.c.h.bf16 %v3642_v17  ;;  %v9138_v6 = vld [vmem:[#allocation65_spill] sm:$0xff]  ;;  %v9139_v17 = vld [vmem:[#allocation67_spill] sm:$0xff] }
 0x3cf   : > { %v5754_v23 = vpop.eup %5753  ;;  %v4342_v49 = vadd.f32 %v4341_v58, %v3852_v22  ;;  %v3881_v55 = vunpack.c.l.bf16 %v3651_v10  ;;  %5771 = vrcp.bf16 %v3182_v5  ;;  %v3191_v62 = vadd.bf16 1065369472, %v5750_v14 }
 0x3d0   : > { %v5756_v40 = vpop.eup %5755  ;;  %v4313_v19 = vadd.f32 %v4312_v3, %v3871_v36  ;;  %v3882_v2 = vunpack.c.l.bf16 %v3652_v21  ;;  %v3192_v35 = vadd.bf16 1065369472, %v5752_v7  ;;  %v3201_v25 = vadd.bf16 1065369472, %v5754_v23 }
 0x3d1   : > { %v5758_v8 = vpop.eup %5757  ;;  %v4343_v50 = vadd.f32 %v4342_v49, %v3862_v59  ;;  %v3202_v38 = vadd.bf16 1065369472, %v5756_v40  ;;  %v3891_v47 = vunpack.c.h.bf16 %v3651_v10  ;;  %5773 = vrcp.bf16 %v3191_v62 }
 0x3d2   : > { %v5760_v27 = vpop.eup %5759  ;;  %v4314_v32 = vadd.f32 %v4313_v19, %v3881_v55  ;;  %v3211_v24 = vadd.bf16 1065369472, %v5758_v8  ;;  %5775 = vrcp.bf16 %v3192_v35  ;;  %v8506_v26 = vadd.bf16 %v8066_v1, %v2149_v15 }
 0x3d3   : > { %v5762_v34 = vpop.eup %5761  ;;  %v4344_v41 = vadd.f32 %v4343_v50, %v3872_v37  ;;  %v3212_v60 = vadd.bf16 1065369472, %v5760_v27  ;;  %5777 = vrcp.bf16 %v3201_v25  ;;  %v2160_v28 = vpack.c.bf16 %v9139_v17, %v9138_v6  ;;  %v9140_v37 = vld [vmem:[#allocation66_spill] sm:$0xff] }
 0x3d4   : > { %v5764_v18 = vpop.eup %5763  ;;  %v4315_v53 = vadd.f32 %v4314_v32, %v3891_v47  ;;  %v3221_v22 = vadd.bf16 1065369472, %v5762_v34  ;;  %v3892_v58 = vunpack.c.h.bf16 %v3652_v21  ;;  %5779 = vrcp.bf16 %v3202_v38 }
 0x3d5   : > { %v5766_v14 = vpop.eup %5765  ;;  %v4345_v10 = vadd.f32 %v4344_v41, %v3882_v2  ;;  %v3222_v5 = vadd.bf16 1065369472, %v5764_v18  ;;  %v4410_v36 = vrot.slane %v8493_v13, 2  ;;  %5781 = vrcp.bf16 %v3211_v24 }
 0x3d6   : > { %v5768_v7 = vpop.eup %5767  ;;  %v3231_v52 = vadd.bf16 1065369472, %v5766_v14  ;;  %v8515_v31 = vadd.bf16 %v8103_v29, %v2150_v61  ;;  %5783 = vrcp.bf16 %v3212_v60  ;;  %v8521_v59 = vadd.bf16 %v8066_v1, %v2159_v0 }
 0x3d7   : > { %v4346_v15 = vadd.f32 %v4345_v10, %v3892_v58  ;;  %v3430_v3 = vmul.bf16 1065369472, %v5768_v7  ;;  %v5770_v21 = vpop.eup %5769  ;;  %v4400_v23 = vrot.slane %v8488_v46, 1  ;;  %5785 = vrcp.bf16 %v3221_v22  ;;  %v8553_v10 = vld [vmem:[%s8617_s5] sm:$0xff] }
 0x3d8   : > { %v4908_v49 = vmul.bf16 3216621497, %v8506_v26  ;;  %v8526_v63 = vadd.bf16 %v8103_v29, %v2160_v28  ;;  %v4395_v43 = vadd.f32 %v4394_v51, %v8448_v16  ;;  %5787 = vrcp.bf16 %v3222_v5 }
 0x3d9   : > { %v3661_v61 = vmul.bf16 %v3430_v3, %v8374_v39  ;;  %v3232_v56 = vadd.bf16 1065369472, %v5770_v21  ;;  %5789 = vrcp.bf16 %v3231_v52  ;;  %v4909_v1 = vmul.bf16 3216621497, %v8515_v31 }
 0x3da   : > { %v5772_v54 = vpop.eup %5771  ;;  %v4406_v0 = vrot.slane %v8500_v20, 1  ;;  %v4411_v55 = vadd.f32 %v4410_v36, %v8493_v13  ;;  %v4918_v29 = vmul.bf16 3216621497, %v8521_v59  ;;  %v8537_v2 = vmul.f32 0.00390625, %v9140_v37 }
 0x3db   : > { %v3901_v40 = vunpack.c.l.bf16 %v3661_v61  ;;  %v3432_v19 = vmul.bf16 1065369472, %v5772_v54  ;;  %5791 = vrcp.bf16 %v3232_v56  ;;  %v4919_v39 = vmul.bf16 3216621497, %v8526_v63 }
 0x3dc   : > { %5793 = vpow.bf16 %v4908_v49  ;;  %v4401_v16 = vadd.f32 %v4400_v23, %v8488_v46  ;;  %v5774_v51 = vpop.eup %5773  ;;  %v3911_v62 = vunpack.c.h.bf16 %v3661_v61  ;;  %v8542_v35 = vmul.f32 0.00390625, %v4395_v43 }
 0x3dd   : > { %v4316_v8 = vadd.f32 %v4315_v53, %v3901_v40  ;;  %v3662_v50 = vmul.bf16 %v3432_v19, %v8380_v11  ;;  %v5776_v13 = vpop.eup %5775  ;;  %v3450_v25 = vmul.bf16 1065369472, %v5774_v51  ;;  %5795 = vpow.bf16 %v4909_v1 }
 0x3de   : > { %v4407_v38 = vadd.f32 %v4406_v0, %v8500_v20  ;;  %v4412_v27 = vrot.slane %v4411_v55, 1  ;;  %v5778_v47 = vpop.eup %5777  ;;  %v3452_v34 = vmul.bf16 1065369472, %v5776_v13  ;;  %5797 = vpow.bf16 %v4918_v29 }
 0x3df   : > { %v4317_v32 = vadd.f32 %v4316_v8, %v3911_v62  ;;  %v3902_v24 = vunpack.c.l.bf16 %v3662_v50  ;;  %v5780_v41 = vpop.eup %5779  ;;  %v3671_v46 = vmul.bf16 %v3450_v25, %v8387_v44  ;;  %v3470_v60 = vmul.bf16 1065369472, %v5778_v47  ;;  %v9141_v44 = vld [vmem:[#allocation9_spill] sm:$0xff] }
 0x3e0   : > { %5799 = vpow.bf16 %v4919_v39  ;;  %v8546_v18 = vmul.f32 0.00390625, %v4401_v16  ;;  %v5782_v11 = vpop.eup %5781  ;;  %v3912_v53 = vunpack.c.h.bf16 %v3662_v50  ;;  %v3672_v6 = vmul.bf16 %v3452_v34, %v8400_v4 }
 0x3e1   : > { %v4347_v22 = vadd.f32 %v4346_v15, %v3902_v24  ;;  %v3472_v17 = vmul.bf16 1065369472, %v5780_v41  ;;  %v5784_v20 = vpop.eup %5783  ;;  %v3921_v28 = vunpack.c.l.bf16 %v3671_v46  ;;  %v3681_v14 = vmul.bf16 %v3470_v60, %v8404_v33 }
 0x3e2   : > { %v3490_v58 = vmul.bf16 1065369472, %v5782_v11  ;;  %v9142_v5 = vsub.s32 2, %v9141_v44  ;;  %v5786_v36 = vpop.eup %5785  ;;  %v3922_v15 = vunpack.c.l.bf16 %v3672_v6  ;;  %v4413_v3 = vadd.f32 %v4412_v27, %v4411_v55 }
 0x3e3   : > { %v4348_v52 = vadd.f32 %v4347_v22, %v3912_v53  ;;  %v3682_v4 = vmul.bf16 %v3472_v17, %v8408_v9  ;;  %v5788_v21 = vpop.eup %5787  ;;  %v3931_v23 = vunpack.c.h.bf16 %v3671_v46  ;;  %v4318_v49 = vadd.f32 %v4317_v32, %v3921_v28 }
 0x3e4   : > { %v4449_v7 = vrot.slane %v8553_v10, %v9142_v5  ;;  %v3941_v33 = vunpack.c.l.bf16 %v3681_v14  ;;  %v3691_v43 = vmul.bf16 %v3490_v58, %v8437_v30  ;;  %v5790_v61 = vpop.eup %5789  ;;  %v3932_v56 = vunpack.c.h.bf16 %v3672_v6 }
 0x3e5   : > { %v4349_v54 = vadd.f32 %v4348_v52, %v3922_v15  ;;  %v3942_v1 = vunpack.c.l.bf16 %v3682_v4  ;;  %v3492_v0 = vmul.bf16 1065369472, %v5784_v20  ;;  %v4319_v19 = vadd.f32 %v4318_v49, %v3931_v23 }
 0x3e6   : > { %v5792_v40 = vpop.eup %5791  ;;  %v3951_v29 = vunpack.c.h.bf16 %v3681_v14  ;;  %v3952_v37 = vunpack.c.h.bf16 %v3682_v4  ;;  %v3510_v39 = vmul.bf16 1065369472, %v5786_v36  ;;  %v3961_v9 = vunpack.c.l.bf16 %v3691_v43 }
 0x3e7   : > { %v5794_v16 = vpop.eup %5793  ;;  %v4350_v51 = vadd.f32 %v4349_v54, %v3932_v56  ;;  %v3692_v55 = vmul.bf16 %v3492_v0, %v8454_v57  ;;  %v3512_v62 = vmul.bf16 1065369472, %v5788_v21  ;;  %v4320_v8 = vadd.f32 %v4319_v19, %v3941_v33 }
 0x3e8   : > { %v3701_v50 = vmul.bf16 %v3510_v39, %v8460_v12  ;;  %v3530_v30 = vmul.bf16 1065369472, %v5790_v61  ;;  %v3241_v13 = vadd.bf16 1065369472, %v5794_v16  ;;  %v5796_v25 = vpop.eup %5795  ;;  %v3532_v24 = vmul.bf16 1065369472, %v5792_v40 }
 0x3e9   : > { %v4351_v27 = vadd.f32 %v4350_v51, %v3942_v1  ;;  %v3962_v47 = vunpack.c.l.bf16 %v3692_v55  ;;  %v3702_v32 = vmul.bf16 %v3512_v62, %v8463_v48  ;;  %v5798_v34 = vpop.eup %5797  ;;  %v4321_v41 = vadd.f32 %v4320_v8, %v3951_v29  ;;  %v9148_v39 = vld [vmem:[#allocation25_spill] sm:$0xff]  ;;  %v9149_v16 = vld [vmem:[#allocation36_spill] sm:$0xff] }
 0x3ea   : > { %v4432_v46 = vmul.f32 0.00390625, %v4407_v38  ;;  %v9143_v60 = vsub.s32 3, %v9141_v44  ;;  %v9144_v57 = vsub.s32 4, %v9141_v44  ;;  %v3971_v6 = vunpack.c.h.bf16 %v3691_v43 }
 0x3eb   : > { %v5800_v12 = vpop.eup %5799  ;;  %v4352_v22 = vadd.f32 %v4351_v27, %v3952_v37  ;;  %v3972_v17 = vunpack.c.h.bf16 %v3692_v55  ;;  %v4433_v20 = vmul.f32 0.00390625, %v4413_v3  ;;  %v4322_v28 = vadd.f32 %v4321_v41, %v3961_v9  ;;  %v9146_v3 = vld [vmem:[#allocation39_spill] sm:$0xff] }
 0x3ec   : > { %v4453_v11 = vrot.slane %v8553_v10, %v9143_v60  ;;  %v4457_v53 = vrot.slane %v8553_v10, %v9144_v57  ;;  %v3981_v14 = vunpack.c.l.bf16 %v3701_v50  ;;  %v3711_v48 = vmul.bf16 %v3530_v30, %v8472_v45 }
 0x3ed   : > { %5801 = vrcp.bf16 %v3241_v13  ;;  %v4353_v58 = vadd.f32 %v4352_v22, %v3962_v47  ;;  %v3982_v38 = vunpack.c.l.bf16 %v3702_v32  ;;  %v3712_v5 = vmul.bf16 %v3532_v24, %v8484_v42 }
 0x3ee   : > { %v3242_v36 = vadd.bf16 1065369472, %v5796_v25  ;;  %v4323_v52 = vadd.f32 %v4322_v28, %v3971_v6  ;;  %v3251_v15 = vadd.bf16 1065369472, %v5798_v34  ;;  %v3252_v4 = vadd.bf16 1065369472, %v5800_v12 }
 0x3ef   : > { %v9145_v21 = vsub.s32 5, %v9141_v44  ;;  %v4354_v49 = vadd.f32 %v4353_v58, %v3972_v17  ;;  %v3991_v33 = vunpack.c.h.bf16 %v3701_v50  ;;  %v4490_v43 = vmul.f32 %v4449_v7, %v9146_v3 }
 0x3f0   : > { %5803 = vrcp.bf16 %v3242_v36  ;;  %v4324_v61 = vadd.f32 %v4323_v52, %v3981_v14  ;;  %v3992_v45 = vunpack.c.h.bf16 %v3702_v32  ;;  %v4001_v56 = vunpack.c.l.bf16 %v3711_v48 }
 0x3f1   : > { %v4461_v23 = vrot.slane %v8553_v10, %v9145_v21  ;;  %5805 = vrcp.bf16 %v3251_v15  ;;  %v4355_v54 = vadd.f32 %v4354_v49, %v3982_v38  ;;  %v4002_v1 = vunpack.c.l.bf16 %v3712_v5 }
 0x3f2   : > { %5807 = vrcp.bf16 %v3252_v4  ;;  %v4491_v42 = vmul.f32 %v4453_v11, %v8537_v2  ;;  %v4325_v0 = vadd.f32 %v4324_v61, %v3991_v33  ;;  %v9147_v40 = vsub.s32 6, %v9141_v44 }
 0x3f3   : > { %v4492_v29 = vmul.f32 %v4457_v53, %v8542_v35  ;;  %v4356_v37 = vadd.f32 %v4355_v54, %v3992_v45  ;;  %v4499_v7 = vsel %vm4498_vm1, %v9148_v39, 0.0  ;;  %v4500_v51 = vsel %vm4498_vm1, %v9149_v16, 0.0 }
 0x3f4   : > { %v4465_v19 = vrot.slane %v8553_v10, %v9147_v40  ;;  %v4502_v9 = vsel %vm4498_vm1, %v4490_v43, 0.0  ;;  %v4011_v55 = vunpack.c.h.bf16 %v3711_v48  ;;  %v4326_v62 = vadd.f32 %v4325_v0, %v4001_v56 }
 0x3f5   : > { %v9150_v2 = vsub.s32 7, %v9141_v44  ;;  %v4501_v50 = vadd.f32 %v4500_v51, %v4499_v7  ;;  %v4012_v30 = vunpack.c.h.bf16 %v3712_v5  ;;  %v4357_v13 = vadd.f32 %v4356_v37, %v4002_v1  ;;  %v9151_v51 = vld [vmem:[#allocation10_spill] sm:$0xff] }
 0x3f6   : > { %v4493_v35 = vmul.f32 %v4461_v23, %v8546_v18  ;;  %v4504_v25 = vsel %vm4498_vm1, %v4491_v42, 0.0  ;;  %v4327_v27 = vadd.f32 %v4326_v62, %v4011_v55  ;;  %v4494_v34 = vmul.f32 %v4465_v19, %v4432_v46 }
 0x3f7   : > { %v4469_v8 = vrot.slane %v8553_v10, %v9150_v2  ;;  %v4503_v47 = vadd.f32 %v4502_v9, %v4501_v50  ;;  %v4358_v24 = vadd.f32 %v4357_v13, %v4012_v30  ;;  %v4506_v41 = vsel %vm4498_vm1, %v4492_v29, 0.0 }
 0x3f8   : > { %v5802_v32 = vpop.eup %5801  ;;  %v4508_v44 = vsel %vm4498_vm1, %v4493_v35, 0.0  ;;  %v4510_v6 = vsel %vm4498_vm1, %v4494_v34, 0.0 }
 0x3f9   : > { %v3550_v60 = vmul.bf16 1065369472, %v5802_v32  ;;  %v4505_v11 = vadd.f32 %v4504_v25, %v4503_v47  ;;  %v4495_v57 = vmul.f32 %v4469_v8, %v4433_v20  ;;  %v9152_v8 = vld [vmem:[#allocation11_spill] sm:$0xff] }
 0x3fb   : > { %v5804_v10 = vpop.eup %5803  ;;  %v3721_v53 = vmul.bf16 %v3550_v60, %v8506_v26  ;;  %v4507_v12 = vadd.f32 %v4506_v41, %v4505_v11  ;;  %v4512_v38 = vsel %vm4498_vm1, %v4495_v57, 0.0 }
 0x3fc   : > { %v5806_v22 = vpop.eup %5805  ;;  %v3552_v18 = vmul.bf16 1065369472, %v5804_v10 }
 0x3fd   : > { %v5808_v17 = vpop.eup %5807  ;;  %v4021_v28 = vunpack.c.l.bf16 %v3721_v53  ;;  %v3570_v14 = vmul.bf16 1065369472, %v5806_v22  ;;  %v4509_v48 = vadd.f32 %v4508_v44, %v4507_v12  ;;  %v4031_v20 = vunpack.c.h.bf16 %v3721_v53 }
 0x3fe   : > { %v3722_v46 = vmul.bf16 %v3552_v18, %v8515_v31  ;;  %v3572_v58 = vmul.bf16 1065369472, %v5808_v17 }
 0x3ff   : > { %v4328_v5 = vadd.f32 %v4327_v27, %v4021_v28  ;;  %v3731_v36 = vmul.bf16 %v3570_v14, %v8521_v59  ;;  %v4511_v52 = vadd.f32 %v4510_v6, %v4509_v48 }
 0x400   : > { %v4022_v26 = vunpack.c.l.bf16 %v3722_v46  ;;  %v3732_v15 = vmul.bf16 %v3572_v58, %v8526_v63  ;;  %v4032_v49 = vunpack.c.h.bf16 %v3722_v46  ;;  %v4364_v63 = vld [vmem:[%s8617_s5 + $0x8] sm:$0x3] }
 0x401   : > { %v4329_v4 = vadd.f32 %v4328_v5, %v4031_v20  ;;  %v4041_v21 = vunpack.c.l.bf16 %v3731_v36  ;;  %v4513_v23 = vadd.f32 %v4512_v38, %v4511_v52  ;;  %v4051_v43 = vunpack.c.h.bf16 %v3731_v36 }
 0x402   : > { %v4359_v33 = vadd.f32 %v4358_v24, %v4022_v26  ;;  %v4042_v3 = vunpack.c.l.bf16 %v3732_v15  ;;  %v4052_v56 = vunpack.c.h.bf16 %v3732_v15  ;;  %v4473_v9 = vrot.slane %v4364_v63, %v9151_v51  ;;  %v4365_v24 = vld [vmem:[#allocation2] sm:$0x1] }
 0x403   : > { %v4330_v61 = vadd.f32 %v4329_v4, %v4041_v21  ;;  %v4477_v50 = vrot.slane %v4364_v63, %v9152_v8 }
 0x404   : > { %v4360_v31 = vadd.f32 %v4359_v33, %v4032_v49 }
 0x405   : > { %v4331_v45 = vadd.f32 %v4330_v61, %v4051_v43 }
 0x406   : > { %v4361_v54 = vadd.f32 %v4360_v31, %v4042_v3 }
 0x407   : > { %v4414_v1 = vrot.slane %v4331_v45, 4 }
 0x408   : > { %v4362_v42 = vadd.f32 %v4361_v54, %v4052_v56 }
 0x409   : > { %v4415_v0 = vadd.f32 %v4414_v1, %v4331_v45 }
 0x40a   : > { %v4420_v59 = vrot.slane %v4362_v42, 4 }
 0x40b   : > { %v4416_v40 = vrot.slane %v4415_v0, 2 }
 0x40c   : > { %v4421_v19 = vadd.f32 %v4420_v59, %v4362_v42 }
 0x40d   : > { %v4417_v29 = vadd.f32 %v4416_v40, %v4415_v0 }
 0x40e   : > { %v4422_v37 = vrot.slane %v4421_v19, 2 }
 0x40f   : > { %v4418_v39 = vrot.slane %v4417_v29, 1 }
 0x410   : > { %v4423_v7 = vadd.f32 %v4422_v37, %v4421_v19 }
 0x411   : > { %v4419_v16 = vadd.f32 %v4418_v39, %v4417_v29 }
 0x412   : > { %v4424_v55 = vrot.slane %v4423_v7, 1 }
 0x413   : > { %v4434_v62 = vmul.f32 0.00390625, %v4419_v16 }
 0x414   : > { %v4425_v2 = vadd.f32 %v4424_v55, %v4423_v7 }
 0x415   : > { %v4496_v30 = vmul.f32 %v4473_v9, %v4434_v62 }
 0x416   : > { %v4435_v13 = vmul.f32 0.00390625, %v4425_v2 }
 0x417   : > { %v4514_v35 = vsel %vm4498_vm1, %v4496_v30, 0.0 }
 0x418   : > { %v4497_v25 = vmul.f32 %v4477_v50, %v4435_v13  ;;  %v4515_v27 = vadd.f32 %v4514_v35, %v4513_v23 }
 0x41a   : > { %v4516_v47 = vsel %vm4498_vm1, %v4497_v25, 0.0 }
 0x41b   : > { %v4517_v32 = vadd.f32 %v4516_v47, %v4515_v27 }
 0x41d   : > { %4518 = vadd.xlane.f32.xlu0 %v4517_v32 }
 0x4aa   : > { %v4519_v34 = vpop.xlane.xlu0 %4518 }
 0x4ab   : > { %v4520_v41 = vadd.f32 %v4519_v34, %v4365_v24 }
 0x4ad   : > { %v4920_v60 = vmul.f32 -1.442695, %v4520_v41 }
 0x4af   : > { %5809 = vpow2.f32 %v4920_v60 }
 0x4b9   : > { %v5810_v11 = vpop.eup %5809 }
 0x4ba   : > { %v4524_v57 = vadd.f32 1.0, %v5810_v11 }
 0x4bc   : > { %5811 = vrcp.f32 %v4524_v57 }
 0x4c6   : > { %v5812_v44 = vpop.eup %5811 }
 0x4c7   : > { %4982 = vpush %v5812_v44 }
 0x4f8   : > { %s4983_s28 = spop %4982 }
 0x4f9   : > { %v4529_v10 = vstv %s4983_s28 }
 0x4fa   : > { %4531 = vst [vmem:[%s278_s25] sm:$0xff] %v4529_v10 }
 0x4fb PF: > { %s19_s26 = sadd.s32 1, %s5821_s26  }
 0x4fc   : > { %p16_p4 = scmp.ge.s32.totalorder %s19_s26, 4  }
 0x4fe   :  { %18 = sbr.rel (!%p16_p4) target bundleno = 3 (0x3), region = 78 }

</bundles_post_ra>
